<compile_context>
chip_gen: v5e
topology: v5e:2x2
jax: 0.10.0
libtpu: 0.0.40
codegen_flags: <defaults>
</compile_context>

<pallas_src>
import numpy as np
import jax
import jax.numpy as jnp
from jax import lax
from jax.experimental import pallas as pl
from jax.experimental.pallas import tpu as pltpu

# ---------------- configuration (small shapes consistent with the forward) --
B = 2            # batch
L = 16           # sequence length
H = 32           # hidden size (stand-in for 1024)
NH = 4           # attention heads
HD = H // NH     # per-head dim
FF = 64          # FFN intermediate
NLAYERS = 2
VOCAB = 100
TYPE_VOCAB = 2
MAX_POS = 64
INNER = 16       # GlobalPointer inner_dim
ENT_MENTION = 2  # mention_detect entity types
ENT_SO = 3       # s_o_head / s_o_tail predicate types
NEG = 1e12
LN_EPS = 1e-12

# GlobalPointer concatenated-projection column offsets.
ROT_OFF = ENT_MENTION * 2 * INNER            # 64   (mention, pre-rotated copy)
SOH_OFF = 2 * ENT_MENTION * 2 * INNER        # 128  (s_o_head)
SOT_OFF = SOH_OFF + ENT_SO * 2 * INNER       # 224  (s_o_tail)
GP_COLS = SOT_OFF + ENT_SO * 2 * INNER       # 320
N_HEADS = ENT_MENTION + 2 * ENT_SO           # 8 -> output slab last dim 8*L=128


def _layer_norm(x, g, b, eps=LN_EPS):
    mu = jnp.mean(x, axis=-1, keepdims=True)
    var = jnp.mean((x - mu) ** 2, axis=-1, keepdims=True)
    return (x - mu) * lax.rsqrt(var + eps) * g + b


# ------------------------------ Pallas kernels -------------------------------
def encoder_kernel(x_ref, m_ref, wqkv_ref, bqkv_ref, wo_ref, bo_ref,
                   g1_ref, be1_ref, w1_ref, b1_ref, w2_ref, b2_ref,
                   g2_ref, be2_ref, o_ref):
    """All NLAYERS BERT encoder layers fused, for one batch element."""
    x = x_ref[0]                                   # (L, H) f32
    m = m_ref[0]                                   # (1, L) float {0,1}
    # Hoisted: additive key-padding mask, materialized once at (L, L).
    add_mask = jnp.broadcast_to((m - 1.0) * 10000.0, (L, L))

    for li in range(NLAYERS):                      # static unroll over layers
        # Merged QKV projection (1/sqrt(HD) pre-folded into the Q columns).
        qkv = jnp.dot(x.astype(jnp.bfloat16), wqkv_ref[li],
                      preferred_element_type=jnp.float32) + bqkv_ref[li]   # (L, 3H)

        ctxs = []
        for h in range(NH):                        # small static head loop
            q = qkv[:, h * HD:(h + 1) * HD]
            k = qkv[:, H + h * HD:H + (h + 1) * HD]
            v = qkv[:, 2 * H + h * HD:2 * H + (h + 1) * HD]
            sc = lax.dot_general(q, k, (((1,), (1,)), ((), ())),
                                 preferred_element_type=jnp.float32)       # (L, L)
            sc = sc + add_mask
            sc = sc - jnp.max(sc, axis=-1, keepdims=True)
            p = jnp.exp(sc)
            p = p / jnp.sum(p, axis=-1, keepdims=True)
            ctxs.append(jnp.dot(p, v, preferred_element_type=jnp.float32))  # (L, HD)

        # Single output projection on the concatenated contexts.
        ctx = jnp.concatenate(ctxs, axis=1)                                 # (L, H)
        attn = jnp.dot(ctx.astype(jnp.bfloat16), wo_ref[li],
                       preferred_element_type=jnp.float32) + bo_ref[li]
        x = _layer_norm(x + attn, g1_ref[li], be1_ref[li])

        hmid = jax.nn.gelu(jnp.dot(x.astype(jnp.bfloat16), w1_ref[li],
                                   preferred_element_type=jnp.float32) + b1_ref[li])
        y = jnp.dot(hmid.astype(jnp.bfloat16), w2_ref[li],
                    preferred_element_type=jnp.float32) + b2_ref[li]
        x = _layer_norm(x + y, g2_ref[li], be2_ref[li])

    o_ref[0] = x


def global_pointer_kernel(x_ref, pad_ref, w_ref, b_ref, cos_ref, sin_ref, o_ref):
    """All three RawGlobalPointer heads fused, for one batch element.

    Output: (L, N_HEADS*L) slab, heads ordered [mention(2), s_o_head(3),
    s_o_tail(3)].  1/sqrt(INNER) and the RoPE pair-rotation are folded into the
    projection weights (so masked logits are exactly -1e12 instead of the
    reference's -1e12/sqrt(INNER); numerically equivalent for thresholding).
    """
    x = x_ref[0]                                   # (L, H)
    pad2d = pad_ref[0]                             # (L, L) = m_q * m_k

    # Single concatenated projection for all heads (lane-dense: 320 cols).
    qk = jnp.dot(x.astype(jnp.bfloat16), w_ref[...],
                 preferred_element_type=jnp.float32) + b_ref[...]          # (L, 320)
    cos = cos_ref[...]                             # (L, INNER)
    sin = sin_ref[...]

    # Hoisted masks (shared across all entity types / heads).
    neg_pad = (1.0 - pad2d) * NEG
    row = lax.broadcasted_iota(jnp.int32, (L, L), 0)
    col = lax.broadcasted_iota(jnp.int32, (L, L), 1)
    bias_mention = neg_pad + (row > col).astype(jnp.float32) * NEG

    def pair_logits(qw, kw):
        return lax.dot_general(qw, kw, (((1,), (1,)), ((), ())),
                               preferred_element_type=jnp.float32)          # (L, L)

    logits = []
    # mention_detect: RoPE + tril mask.
    for e in range(ENT_MENTION):
        base = e * 2 * INNER
        qw = (qk[:, base:base + INNER] * cos
              + qk[:, ROT_OFF + base:ROT_OFF + base + INNER] * sin)
        kw = (qk[:, base + INNER:base + 2 * INNER] * cos
              + qk[:, ROT_OFF + base + INNER:ROT_OFF + base + 2 * INNER] * sin)
        logits.append(pair_logits(qw, kw) * pad2d - bias_mention)
    # s_o_head / s_o_tail: no RoPE, no tril.
    for off in (SOH_OFF, SOT_OFF):
        for e in range(ENT_SO):
            base = off + e * 2 * INNER
            qw = qk[:, base:base + INNER]
            kw = qk[:, base + INNER:base + 2 * INNER]
            logits.append(pair_logits(qw, kw) * pad2d - neg_pad)

    # One lane-dense (16, 128) store instead of 8 masked 16-lane stores.
    o_ref[0] = jnp.concatenate(logits, axis=1)


# ------------------------------ pallas_call wrappers -------------------------
def _full_spec(shape):
    nd = len(shape)
    return pl.BlockSpec(shape, lambda b, _nd=nd: (0,) * _nd)


ENC_KEYS = ("wqkv", "bqkv", "wo", "bo", "g1", "be1",
            "w1", "b1", "w2", "b2", "g2", "be2")


def run_encoder(x, mask3, enc):
    stacked = [enc[k] for k in ENC_KEYS]
    in_specs = [pl.BlockSpec((1, L, H), lambda b: (b, 0, 0)),
                pl.BlockSpec((1, 1, L), lambda b: (b, 0, 0))]
    in_specs += [_full_spec(a.shape) for a in stacked]
    return pl.pallas_call(
        encoder_kernel,
        out_shape=jax.ShapeDtypeStruct((B, L, H), jnp.float32),
        grid_spec=pl.GridSpec(
            grid=(B,),
            in_specs=in_specs,
            out_specs=pl.BlockSpec((1, L, H), lambda b: (b, 0, 0))),
        compiler_params=pltpu.CompilerParams(dimension_semantics=("parallel",)),
    )(x, mask3, *stacked)


def run_global_pointers(x, pad2d, w_all, b_all, cos, sin):
    slab = pl.pallas_call(
        global_pointer_kernel,
        out_shape=jax.ShapeDtypeStruct((B, L, N_HEADS * L), jnp.float32),
        grid_spec=pl.GridSpec(
            grid=(B,),
            in_specs=[pl.BlockSpec((1, L, H), lambda b: (b, 0, 0)),
                      pl.BlockSpec((1, L, L), lambda b: (b, 0, 0)),
                      _full_spec(w_all.shape), _full_spec(b_all.shape),
                      _full_spec(cos.shape), _full_spec(sin.shape)],
            out_specs=pl.BlockSpec((1, L, N_HEADS * L), lambda b: (b, 0, 0))),
        compiler_params=pltpu.CompilerParams(dimension_semantics=("parallel",)),
    )(x, pad2d, w_all, b_all, cos, sin)
    # (B, L, 8, L) -> (B, 8, L, L); cheap XLA-side unpack of the lane-dense slab.
    heads = slab.reshape(B, L, N_HEADS, L).transpose(0, 2, 1, 3)
    mention = heads[:, :ENT_MENTION]
    so_head = heads[:, ENT_MENTION:ENT_MENTION + ENT_SO]
    so_tail = heads[:, ENT_MENTION + ENT_SO:]
    return mention, so_head, so_tail


# ------------------------------ parameters / glue ----------------------------
def rope_tables(seq, d):
    inv = 1.0 / (10000.0 ** (np.arange(0, d, 2, dtype=np.float64) / d))
    ang = np.arange(seq, dtype=np.float64)[:, None] * inv[None, :]          # (L, d/2)
    cos = np.repeat(np.cos(ang), 2, axis=-1).astype(np.float32)             # (L, d)
    sin = np.repeat(np.sin(ang), 2, axis=-1).astype(np.float32)
    return jnp.asarray(cos), jnp.asarray(sin)


def init_params(key):
    keys = iter(jax.random.split(key, 32))

    def nrm(shape, s=0.02):
        return (s * jax.random.normal(next(keys), shape)).astype(jnp.float32)

    params = {
        "word_emb": nrm((VOCAB, H)),
        "type_emb": nrm((TYPE_VOCAB, H)),
        "pos_emb": nrm((MAX_POS, H)),
        "emb_ln_g": jnp.ones((H,), jnp.float32),
        "emb_ln_b": jnp.zeros((H,), jnp.float32),
    }

    # --- encoder: stacked per-layer weights, Q-scale folded, matmul weights bf16
    inv_hd = np.float32(1.0 / np.sqrt(HD))
    acc = {k: [] for k in ENC_KEYS}
    for _ in range(NLAYERS):
        wq, wk, wv = nrm((H, H)), nrm((H, H)), nrm((H, H))
        acc["wqkv"].append(jnp.concatenate([wq * inv_hd, wk, wv], axis=1))
        acc["bqkv"].append(jnp.zeros((1, 3 * H), jnp.float32))
        acc["wo"].append(nrm((H, H)))
        acc["bo"].append(jnp.zeros((1, H), jnp.float32))
        acc["g1"].append(jnp.ones((1, H), jnp.float32))
        acc["be1"].append(jnp.zeros((1, H), jnp.float32))
        acc["w1"].append(nrm((H, FF)))
        acc["b1"].append(jnp.zeros((1, FF), jnp.float32))
        acc["w2"].append(nrm((FF, H)))
        acc["b2"].append(jnp.zeros((1, H), jnp.float32))
        acc["g2"].append(jnp.ones((1, H), jnp.float32))
        acc["be2"].append(jnp.zeros((1, H), jnp.float32))

    bf16_keys = {"wqkv", "wo", "w1", "w2"}
    params["enc"] = {
        k: jnp.stack(v).astype(jnp.bfloat16 if k in bf16_keys else jnp.float32)
        for k, v in acc.items()}

    # --- GlobalPointer heads: concatenated projection, scale + RoPE folded in.
    rot = np.zeros((INNER, INNER), np.float32)   # q2[2i] = -q[2i+1]; q2[2i+1] = q[2i]
    for i in range(INNER // 2):
        rot[2 * i + 1, 2 * i] = -1.0
        rot[2 * i, 2 * i + 1] = 1.0
    inv_inner = np.float32(1.0 / np.sqrt(INNER))

    def head(ent):
        w = nrm((H, ent * 2 * INNER))
        b = jnp.zeros((1, ent * 2 * INNER), jnp.float32)
        scale = np.ones((ent * 2 * INNER,), np.float32)
        for e in range(ent):                       # fold 1/sqrt(INNER) into q cols
            scale[e * 2 * INNER:e * 2 * INNER + INNER] = inv_inner
        return w * scale, b * scale

    wm, bm = head(ENT_MENTION)
    wh, bh = head(ENT_SO)
    wt, bt = head(ENT_SO)
    R = jnp.asarray(np.kron(np.eye(2 * ENT_MENTION, dtype=np.float32), rot))
    params["gp_w"] = jnp.concatenate([wm, wm @ R, wh, wt], axis=1).astype(jnp.bfloat16)
    params["gp_b"] = jnp.concatenate([bm, bm @ R, bh, bt], axis=1)

    cos, sin = rope_tables(L, INNER)
    params["rope_cos"], params["rope_sin"] = cos, sin
    return params


def erenet_forward(params, batch_token_ids, batch_mask_ids, batch_token_type_ids):
    # Encoder embeddings (gathers: plain JAX glue).
    x = (jnp.take(params["word_emb"], batch_token_ids, axis=0)
         + jnp.take(params["type_emb"], batch_token_type_ids, axis=0)
         + params["pos_emb"][None, :L, :])
    x = _layer_norm(x, params["emb_ln_g"], params["emb_ln_b"])

    mask_f = batch_mask_ids.astype(jnp.float32)
    mask3 = mask_f.reshape(B, 1, L)                       # encoder additive mask
    pad2d = mask_f[:, :, None] * mask_f[:, None, :]       # (B, L, L) GP pad mask

    # Whole encoder in one Pallas kernel.
    x = run_encoder(x, mask3, params["enc"])

    # All three GlobalPointer heads in one Pallas kernel.
    return run_global_pointers(x, pad2d, params["gp_w"], params["gp_b"],
                               params["rope_cos"], params["rope_sin"])


if __name__ == "__main__":
    key = jax.random.PRNGKey(0)
    kp, kt = jax.random.split(key)
    params = init_params(kp)

    batch_token_ids = jax.random.randint(kt, (B, L), 0, VOCAB, dtype=jnp.int32)
    batch_mask_ids = jnp.ones((B, L), jnp.int32).at[1, L - 3:].set(0)  # pad tail
    batch_token_type_ids = jnp.zeros((B, L), jnp.int32)

    outs = jax.jit(erenet_forward)(params, batch_token_ids, batch_mask_ids,
                                   batch_token_type_ids)
    outs = jax.block_until_ready(outs)

    assert outs[0].shape == (B, ENT_MENTION, L, L)
    assert outs[1].shape == (B, ENT_SO, L, L)
    assert outs[2].shape == (B, ENT_SO, L, L)
    assert all(jnp.all(jnp.isfinite(o) | (o < -1e10)) for o in outs)
    print("KERNEL_OK")
</pallas_src>

<mosaic_0001>
module attributes {stable_mosaic.version = 11 : i64} {
  func.func @global_pointer_kernel(%arg0: i32, %arg1: memref<1x16x32xf32, #tpu.memory_space<vmem>>, %arg2: memref<1x16x16xf32, #tpu.memory_space<vmem>>, %arg3: memref<32x320xbf16, #tpu.memory_space<vmem>>, %arg4: memref<1x320xf32, #tpu.memory_space<vmem>>, %arg5: memref<16x16xf32, #tpu.memory_space<vmem>>, %arg6: memref<16x16xf32, #tpu.memory_space<vmem>>, %arg7: memref<1x16x128xf32, #tpu.memory_space<vmem>>) attributes {dimension_semantics = [#tpu.dimension_semantics<parallel>], iteration_bounds = array<i64: 2>, scalar_prefetch = 0 : i64, scratch_operands = 0 : i64, tpu.core_type = #tpu.core_type<tc>, window_params = [{transform_indices = @transform_0, window_bounds = array<i64: 1, 16, 32>}, {transform_indices = @transform_1, window_bounds = array<i64: 1, 16, 16>}, {pipeline_mode = #tpu.pipeline_mode<synchronous>, transform_indices = @transform_2, window_bounds = array<i64: 32, 320>}, {pipeline_mode = #tpu.pipeline_mode<synchronous>, transform_indices = @transform_3, window_bounds = array<i64: 1, 320>}, {pipeline_mode = #tpu.pipeline_mode<synchronous>, transform_indices = @transform_4, window_bounds = array<i64: 16, 16>}, {pipeline_mode = #tpu.pipeline_mode<synchronous>, transform_indices = @transform_5, window_bounds = array<i64: 16, 16>}, {transform_indices = @transform_6, window_bounds = array<i64: 1, 16, 128>}]} {
    %c0 = arith.constant 0 : index
    %c0_0 = arith.constant 0 : index
    %c0_1 = arith.constant 0 : index
    %0 = vector.load %arg1[%c0, %c0_0, %c0_1] : memref<1x16x32xf32, #tpu.memory_space<vmem>>, vector<1x16x32xf32>
    %1 = vector.shape_cast %0 : vector<1x16x32xf32> to vector<16x32xf32>
    %c0_2 = arith.constant 0 : index
    %c0_3 = arith.constant 0 : index
    %c0_4 = arith.constant 0 : index
    %2 = vector.load %arg2[%c0_2, %c0_3, %c0_4] : memref<1x16x16xf32, #tpu.memory_space<vmem>>, vector<1x16x16xf32>
    %3 = vector.shape_cast %2 : vector<1x16x16xf32> to vector<16x16xf32>
    %4 = arith.truncf %1 : vector<16x32xf32> to vector<16x32xbf16>
    %c0_5 = arith.constant 0 : index
    %c0_6 = arith.constant 0 : index
    %5 = vector.load %arg3[%c0_5, %c0_6] : memref<32x320xbf16, #tpu.memory_space<vmem>>, vector<32x320xbf16>
    %cst = arith.constant dense<0.000000e+00> : vector<16x320xf32>
    %6 = tpu.matmul %4, %5, %cst {dimension_numbers = #tpu.dot_dimension_numbers<[1], [0], [0], [1], [0, 0, 1, 1], [], []>} : vector<16x32xbf16>, vector<32x320xbf16>, vector<16x320xf32> -> vector<16x320xf32>
    %c0_7 = arith.constant 0 : index
    %c0_8 = arith.constant 0 : index
    %7 = vector.load %arg4[%c0_7, %c0_8] : memref<1x320xf32, #tpu.memory_space<vmem>>, vector<1x320xf32>
    %8 = vector.broadcast %7 : vector<1x320xf32> to vector<16x320xf32>
    %9 = arith.addf %6, %8 : vector<16x320xf32>
    %c0_9 = arith.constant 0 : index
    %c0_10 = arith.constant 0 : index
    %10 = vector.load %arg5[%c0_9, %c0_10] : memref<16x16xf32, #tpu.memory_space<vmem>>, vector<16x16xf32>
    %c0_11 = arith.constant 0 : index
    %c0_12 = arith.constant 0 : index
    %11 = vector.load %arg6[%c0_11, %c0_12] : memref<16x16xf32, #tpu.memory_space<vmem>>, vector<16x16xf32>
    %cst_13 = arith.constant 1.000000e+00 : f32
    %12 = vector.broadcast %cst_13 : f32 to vector<16x16xf32>
    %13 = arith.subf %12, %3 : vector<16x16xf32>
    %cst_14 = arith.constant 9.99999995E+11 : f32
    %14 = vector.broadcast %cst_14 : f32 to vector<16x16xf32>
    %15 = arith.mulf %13, %14 : vector<16x16xf32>
    %16 = tpu.iota {dimensions = array<i32: 0>} : vector<16x16xi32>
    %17 = tpu.iota {dimensions = array<i32: 1>} : vector<16x16xi32>
    %18 = arith.cmpi sgt, %16, %17 : vector<16x16xi32>
    %19 = arith.extui %18 : vector<16x16xi1> to vector<16x16xi32>
    %20 = arith.sitofp %19 : vector<16x16xi32> to vector<16x16xf32>
    %cst_15 = arith.constant 9.99999995E+11 : f32
    %21 = vector.broadcast %cst_15 : f32 to vector<16x16xf32>
    %22 = arith.mulf %20, %21 : vector<16x16xf32>
    %23 = arith.addf %15, %22 : vector<16x16xf32>
    %24 = vector.extract_strided_slice %9 {offsets = [0, 0], sizes = [16, 16], strides = [1, 1]} : vector<16x320xf32> to vector<16x16xf32>
    %25 = arith.mulf %24, %10 : vector<16x16xf32>
    %26 = vector.extract_strided_slice %9 {offsets = [0, 64], sizes = [16, 16], strides = [1, 1]} : vector<16x320xf32> to vector<16x16xf32>
    %27 = arith.mulf %26, %11 : vector<16x16xf32>
    %28 = arith.addf %25, %27 : vector<16x16xf32>
    %29 = vector.extract_strided_slice %9 {offsets = [0, 16], sizes = [16, 16], strides = [1, 1]} : vector<16x320xf32> to vector<16x16xf32>
    %30 = arith.mulf %29, %10 : vector<16x16xf32>
    %31 = vector.extract_strided_slice %9 {offsets = [0, 80], sizes = [16, 16], strides = [1, 1]} : vector<16x320xf32> to vector<16x16xf32>
    %32 = arith.mulf %31, %11 : vector<16x16xf32>
    %33 = arith.addf %30, %32 : vector<16x16xf32>
    %cst_16 = arith.constant dense<0.000000e+00> : vector<16x16xf32>
    %34 = tpu.matmul %28, %33, %cst_16 {dimension_numbers = #tpu.dot_dimension_numbers<[1], [1], [0], [0], [0, 0, 1, 0], [], []>} : vector<16x16xf32>, vector<16x16xf32>, vector<16x16xf32> -> vector<16x16xf32>
    %35 = arith.mulf %34, %3 : vector<16x16xf32>
    %36 = arith.subf %35, %23 : vector<16x16xf32>
    %37 = vector.extract_strided_slice %9 {offsets = [0, 32], sizes = [16, 16], strides = [1, 1]} : vector<16x320xf32> to vector<16x16xf32>
    %38 = arith.mulf %37, %10 : vector<16x16xf32>
    %39 = vector.extract_strided_slice %9 {offsets = [0, 96], sizes = [16, 16], strides = [1, 1]} : vector<16x320xf32> to vector<16x16xf32>
    %40 = arith.mulf %39, %11 : vector<16x16xf32>
    %41 = arith.addf %38, %40 : vector<16x16xf32>
    %42 = vector.extract_strided_slice %9 {offsets = [0, 48], sizes = [16, 16], strides = [1, 1]} : vector<16x320xf32> to vector<16x16xf32>
    %43 = arith.mulf %42, %10 : vector<16x16xf32>
    %44 = vector.extract_strided_slice %9 {offsets = [0, 112], sizes = [16, 16], strides = [1, 1]} : vector<16x320xf32> to vector<16x16xf32>
    %45 = arith.mulf %44, %11 : vector<16x16xf32>
    %46 = arith.addf %43, %45 : vector<16x16xf32>
    %cst_17 = arith.constant dense<0.000000e+00> : vector<16x16xf32>
    %47 = tpu.matmul %41, %46, %cst_17 {dimension_numbers = #tpu.dot_dimension_numbers<[1], [1], [0], [0], [0, 0, 1, 0], [], []>} : vector<16x16xf32>, vector<16x16xf32>, vector<16x16xf32> -> vector<16x16xf32>
    %48 = arith.mulf %47, %3 : vector<16x16xf32>
    %49 = arith.subf %48, %23 : vector<16x16xf32>
    %50 = vector.extract_strided_slice %9 {offsets = [0, 128], sizes = [16, 16], strides = [1, 1]} : vector<16x320xf32> to vector<16x16xf32>
    %51 = vector.extract_strided_slice %9 {offsets = [0, 144], sizes = [16, 16], strides = [1, 1]} : vector<16x320xf32> to vector<16x16xf32>
    %cst_18 = arith.constant dense<0.000000e+00> : vector<16x16xf32>
    %52 = tpu.matmul %50, %51, %cst_18 {dimension_numbers = #tpu.dot_dimension_numbers<[1], [1], [0], [0], [0, 0, 1, 0], [], []>} : vector<16x16xf32>, vector<16x16xf32>, vector<16x16xf32> -> vector<16x16xf32>
    %53 = arith.mulf %52, %3 : vector<16x16xf32>
    %54 = arith.subf %53, %15 : vector<16x16xf32>
    %55 = vector.extract_strided_slice %9 {offsets = [0, 160], sizes = [16, 16], strides = [1, 1]} : vector<16x320xf32> to vector<16x16xf32>
    %56 = vector.extract_strided_slice %9 {offsets = [0, 176], sizes = [16, 16], strides = [1, 1]} : vector<16x320xf32> to vector<16x16xf32>
    %cst_19 = arith.constant dense<0.000000e+00> : vector<16x16xf32>
    %57 = tpu.matmul %55, %56, %cst_19 {dimension_numbers = #tpu.dot_dimension_numbers<[1], [1], [0], [0], [0, 0, 1, 0], [], []>} : vector<16x16xf32>, vector<16x16xf32>, vector<16x16xf32> -> vector<16x16xf32>
    %58 = arith.mulf %57, %3 : vector<16x16xf32>
    %59 = arith.subf %58, %15 : vector<16x16xf32>
    %60 = vector.extract_strided_slice %9 {offsets = [0, 192], sizes = [16, 16], strides = [1, 1]} : vector<16x320xf32> to vector<16x16xf32>
    %61 = vector.extract_strided_slice %9 {offsets = [0, 208], sizes = [16, 16], strides = [1, 1]} : vector<16x320xf32> to vector<16x16xf32>
    %cst_20 = arith.constant dense<0.000000e+00> : vector<16x16xf32>
    %62 = tpu.matmul %60, %61, %cst_20 {dimension_numbers = #tpu.dot_dimension_numbers<[1], [1], [0], [0], [0, 0, 1, 0], [], []>} : vector<16x16xf32>, vector<16x16xf32>, vector<16x16xf32> -> vector<16x16xf32>
    %63 = arith.mulf %62, %3 : vector<16x16xf32>
    %64 = arith.subf %63, %15 : vector<16x16xf32>
    %65 = vector.extract_strided_slice %9 {offsets = [0, 224], sizes = [16, 16], strides = [1, 1]} : vector<16x320xf32> to vector<16x16xf32>
    %66 = vector.extract_strided_slice %9 {offsets = [0, 240], sizes = [16, 16], strides = [1, 1]} : vector<16x320xf32> to vector<16x16xf32>
    %cst_21 = arith.constant dense<0.000000e+00> : vector<16x16xf32>
    %67 = tpu.matmul %65, %66, %cst_21 {dimension_numbers = #tpu.dot_dimension_numbers<[1], [1], [0], [0], [0, 0, 1, 0], [], []>} : vector<16x16xf32>, vector<16x16xf32>, vector<16x16xf32> -> vector<16x16xf32>
    %68 = arith.mulf %67, %3 : vector<16x16xf32>
    %69 = arith.subf %68, %15 : vector<16x16xf32>
    %70 = vector.extract_strided_slice %9 {offsets = [0, 256], sizes = [16, 16], strides = [1, 1]} : vector<16x320xf32> to vector<16x16xf32>
    %71 = vector.extract_strided_slice %9 {offsets = [0, 272], sizes = [16, 16], strides = [1, 1]} : vector<16x320xf32> to vector<16x16xf32>
    %cst_22 = arith.constant dense<0.000000e+00> : vector<16x16xf32>
    %72 = tpu.matmul %70, %71, %cst_22 {dimension_numbers = #tpu.dot_dimension_numbers<[1], [1], [0], [0], [0, 0, 1, 0], [], []>} : vector<16x16xf32>, vector<16x16xf32>, vector<16x16xf32> -> vector<16x16xf32>
    %73 = arith.mulf %72, %3 : vector<16x16xf32>
    %74 = arith.subf %73, %15 : vector<16x16xf32>
    %75 = vector.extract_strided_slice %9 {offsets = [0, 288], sizes = [16, 16], strides = [1, 1]} : vector<16x320xf32> to vector<16x16xf32>
    %76 = vector.extract_strided_slice %9 {offsets = [0, 304], sizes = [16, 16], strides = [1, 1]} : vector<16x320xf32> to vector<16x16xf32>
    %cst_23 = arith.constant dense<0.000000e+00> : vector<16x16xf32>
    %77 = tpu.matmul %75, %76, %cst_23 {dimension_numbers = #tpu.dot_dimension_numbers<[1], [1], [0], [0], [0, 0, 1, 0], [], []>} : vector<16x16xf32>, vector<16x16xf32>, vector<16x16xf32> -> vector<16x16xf32>
    %78 = arith.mulf %77, %3 : vector<16x16xf32>
    %79 = arith.subf %78, %15 : vector<16x16xf32>
    %80 = tpu.concatenate %36, %49, %54, %59, %64, %69, %74, %79 in 1 : vector<16x16xf32>, vector<16x16xf32>, vector<16x16xf32>, vector<16x16xf32>, vector<16x16xf32>, vector<16x16xf32>, vector<16x16xf32>, vector<16x16xf32> -> vector<16x128xf32>
    %c0_24 = arith.constant 0 : index
    %c0_25 = arith.constant 0 : index
    %c0_26 = arith.constant 0 : index
    %81 = vector.load %arg7[%c0_24, %c0_25, %c0_26] : memref<1x16x128xf32, #tpu.memory_space<vmem>>, vector<1x16x128xf32>
    %82 = vector.shape_cast %81 : vector<1x16x128xf32> to vector<16x128xf32>
    %83 = vector.shape_cast %80 : vector<16x128xf32> to vector<1x16x128xf32>
    tpu.vector_store %arg7[%c0_24, %c0_25, %c0_26], %83 {strides = array<i32>} : memref<1x16x128xf32, #tpu.memory_space<vmem>>, vector<1x16x128xf32>,
    return
  }
  func.func @transform_0(%arg0: i32) -> (i32, i32, i32) {
    %c0_i32 = arith.constant 0 : i32
    %c0_i32_0 = arith.constant 0 : i32
    %c0_i32_1 = arith.constant 0 : i32
    return %arg0, %c0_i32, %c0_i32_0 : i32, i32, i32
  }
  func.func @transform_1(%arg0: i32) -> (i32, i32, i32) {
    %c0_i32 = arith.constant 0 : i32
    %c0_i32_0 = arith.constant 0 : i32
    %c0_i32_1 = arith.constant 0 : i32
    return %arg0, %c0_i32, %c0_i32_0 : i32, i32, i32
  }
  func.func @transform_2(%arg0: i32) -> (i32, i32) {
    %c0_i32 = arith.constant 0 : i32
    %c0_i32_0 = arith.constant 0 : i32
    %c0_i32_1 = arith.constant 0 : i32
    return %c0_i32, %c0_i32_0 : i32, i32
  }
  func.func @transform_3(%arg0: i32) -> (i32, i32) {
    %c0_i32 = arith.constant 0 : i32
    %c0_i32_0 = arith.constant 0 : i32
    %c0_i32_1 = arith.constant 0 : i32
    return %c0_i32, %c0_i32_0 : i32, i32
  }
  func.func @transform_4(%arg0: i32) -> (i32, i32) {
    %c0_i32 = arith.constant 0 : i32
    %c0_i32_0 = arith.constant 0 : i32
    %c0_i32_1 = arith.constant 0 : i32
    return %c0_i32, %c0_i32_0 : i32, i32
  }
  func.func @transform_5(%arg0: i32) -> (i32, i32) {
    %c0_i32 = arith.constant 0 : i32
    %c0_i32_0 = arith.constant 0 : i32
    %c0_i32_1 = arith.constant 0 : i32
    return %c0_i32, %c0_i32_0 : i32, i32
  }
  func.func @transform_6(%arg0: i32) -> (i32, i32, i32) {
    %c0_i32 = arith.constant 0 : i32
    %c0_i32_0 = arith.constant 0 : i32
    %c0_i32_1 = arith.constant 0 : i32
    return %arg0, %c0_i32, %c0_i32_0 : i32, i32, i32
  }
}

module attributes {stable_mosaic.version = 11 : i64} {
  func.func @encoder_kernel(%arg0: i32, %arg1: memref<1x16x32xf32, #tpu.memory_space<vmem>>, %arg2: memref<1x1x16xf32, #tpu.memory_space<vmem>>, %arg3: memref<2x32x96xbf16, #tpu.memory_space<vmem>>, %arg4: memref<2x1x96xf32, #tpu.memory_space<vmem>>, %arg5: memref<2x32x32xbf16, #tpu.memory_space<vmem>>, %arg6: memref<2x1x32xf32, #tpu.memory_space<vmem>>, %arg7: memref<2x1x32xf32, #tpu.memory_space<vmem>>, %arg8: memref<2x1x32xf32, #tpu.memory_space<vmem>>, %arg9: memref<2x32x64xbf16, #tpu.memory_space<vmem>>, %arg10: memref<2x1x64xf32, #tpu.memory_space<vmem>>, %arg11: memref<2x64x32xbf16, #tpu.memory_space<vmem>>, %arg12: memref<2x1x32xf32, #tpu.memory_space<vmem>>, %arg13: memref<2x1x32xf32, #tpu.memory_space<vmem>>, %arg14: memref<2x1x32xf32, #tpu.memory_space<vmem>>, %arg15: memref<1x16x32xf32, #tpu.memory_space<vmem>>) attributes {dimension_semantics = [#tpu.dimension_semantics<parallel>], iteration_bounds = array<i64: 2>, scalar_prefetch = 0 : i64, scratch_operands = 0 : i64, tpu.core_type = #tpu.core_type<tc>, window_params = [{transform_indices = @transform_0, window_bounds = array<i64: 1, 16, 32>}, {transform_indices = @transform_1, window_bounds = array<i64: 1, 1, 16>}, {pipeline_mode = #tpu.pipeline_mode<synchronous>, transform_indices = @transform_2, window_bounds = array<i64: 2, 32, 96>}, {pipeline_mode = #tpu.pipeline_mode<synchronous>, transform_indices = @transform_3, window_bounds = array<i64: 2, 1, 96>}, {pipeline_mode = #tpu.pipeline_mode<synchronous>, transform_indices = @transform_4, window_bounds = array<i64: 2, 32, 32>}, {pipeline_mode = #tpu.pipeline_mode<synchronous>, transform_indices = @transform_5, window_bounds = array<i64: 2, 1, 32>}, {pipeline_mode = #tpu.pipeline_mode<synchronous>, transform_indices = @transform_6, window_bounds = array<i64: 2, 1, 32>}, {pipeline_mode = #tpu.pipeline_mode<synchronous>, transform_indices = @transform_7, window_bounds = array<i64: 2, 1, 32>}, {pipeline_mode = #tpu.pipeline_mode<synchronous>, transform_indices = @transform_8, window_bounds = array<i64: 2, 32, 64>}, {pipeline_mode = #tpu.pipeline_mode<synchronous>, transform_indices = @transform_9, window_bounds = array<i64: 2, 1, 64>}, {pipeline_mode = #tpu.pipeline_mode<synchronous>, transform_indices = @transform_10, window_bounds = array<i64: 2, 64, 32>}, {pipeline_mode = #tpu.pipeline_mode<synchronous>, transform_indices = @transform_11, window_bounds = array<i64: 2, 1, 32>}, {pipeline_mode = #tpu.pipeline_mode<synchronous>, transform_indices = @transform_12, window_bounds = array<i64: 2, 1, 32>}, {pipeline_mode = #tpu.pipeline_mode<synchronous>, transform_indices = @transform_13, window_bounds = array<i64: 2, 1, 32>}, {transform_indices = @transform_14, window_bounds = array<i64: 1, 16, 32>}]} {
    %c0 = arith.constant 0 : index
    %c0_0 = arith.constant 0 : index
    %c0_1 = arith.constant 0 : index
    %0 = vector.load %arg1[%c0, %c0_0, %c0_1] : memref<1x16x32xf32, #tpu.memory_space<vmem>>, vector<1x16x32xf32>
    %1 = vector.shape_cast %0 : vector<1x16x32xf32> to vector<16x32xf32>
    %c0_2 = arith.constant 0 : index
    %c0_3 = arith.constant 0 : index
    %c0_4 = arith.constant 0 : index
    %2 = vector.load %arg2[%c0_2, %c0_3, %c0_4] : memref<1x1x16xf32, #tpu.memory_space<vmem>>, vector<1x1x16xf32>
    %3 = vector.shape_cast %2 : vector<1x1x16xf32> to vector<1x16xf32>
    %cst = arith.constant 1.000000e+00 : f32
    %4 = vector.broadcast %cst : f32 to vector<1x16xf32>
    %5 = arith.subf %3, %4 : vector<1x16xf32>
    %cst_5 = arith.constant 1.000000e+04 : f32
    %6 = vector.broadcast %cst_5 : f32 to vector<1x16xf32>
    %7 = arith.mulf %5, %6 : vector<1x16xf32>
    %8 = vector.shape_cast %7 : vector<1x16xf32> to vector<1x16xf32>
    %9 = vector.broadcast %8 : vector<1x16xf32> to vector<16x16xf32>
    %10 = arith.truncf %1 : vector<16x32xf32> to vector<16x32xbf16>
    %c0_6 = arith.constant 0 : index
    %c0_7 = arith.constant 0 : index
    %c0_8 = arith.constant 0 : index
    %11 = vector.load %arg3[%c0_6, %c0_7, %c0_8] : memref<2x32x96xbf16, #tpu.memory_space<vmem>>, vector<1x32x96xbf16>
    %12 = vector.shape_cast %11 : vector<1x32x96xbf16> to vector<32x96xbf16>
    %cst_9 = arith.constant dense<0.000000e+00> : vector<16x96xf32>
    %13 = tpu.matmul %10, %12, %cst_9 {dimension_numbers = #tpu.dot_dimension_numbers<[1], [0], [0], [1], [0, 0, 1, 1], [], []>} : vector<16x32xbf16>, vector<32x96xbf16>, vector<16x96xf32> -> vector<16x96xf32>
    %c0_10 = arith.constant 0 : index
    %c0_11 = arith.constant 0 : index
    %c0_12 = arith.constant 0 : index
    %14 = vector.load %arg4[%c0_10, %c0_11, %c0_12] : memref<2x1x96xf32, #tpu.memory_space<vmem>>, vector<1x1x96xf32>
    %15 = vector.shape_cast %14 : vector<1x1x96xf32> to vector<1x96xf32>
    %16 = vector.broadcast %15 : vector<1x96xf32> to vector<16x96xf32>
    %17 = arith.addf %13, %16 : vector<16x96xf32>
    %18 = vector.extract_strided_slice %17 {offsets = [0, 0], sizes = [16, 8], strides = [1, 1]} : vector<16x96xf32> to vector<16x8xf32>
    %19 = vector.extract_strided_slice %17 {offsets = [0, 32], sizes = [16, 8], strides = [1, 1]} : vector<16x96xf32> to vector<16x8xf32>
    %20 = vector.extract_strided_slice %17 {offsets = [0, 64], sizes = [16, 8], strides = [1, 1]} : vector<16x96xf32> to vector<16x8xf32>
    %cst_13 = arith.constant dense<0.000000e+00> : vector<16x16xf32>
    %21 = tpu.matmul %18, %19, %cst_13 {dimension_numbers = #tpu.dot_dimension_numbers<[1], [1], [0], [0], [0, 0, 1, 0], [], []>} : vector<16x8xf32>, vector<16x8xf32>, vector<16x16xf32> -> vector<16x16xf32>
    %22 = arith.addf %21, %9 : vector<16x16xf32>
    %cst_14 = arith.constant dense<0xFF800000> : vector<16xf32>
    %23 = vector.multi_reduction <maximumf>, %22, %cst_14 [1] : vector<16x16xf32> to vector<16xf32>
    %24 = vector.shape_cast %23 : vector<16xf32> to vector<16x1xf32>
    %25 = vector.broadcast %24 : vector<16x1xf32> to vector<16x16xf32>
    %26 = arith.subf %22, %25 : vector<16x16xf32>
    %27 = math.exp %26 : vector<16x16xf32>
    %cst_15 = arith.constant dense<0.000000e+00> : vector<16xf32>
    %28 = vector.multi_reduction <add>, %27, %cst_15 [1] : vector<16x16xf32> to vector<16xf32>
    %29 = vector.shape_cast %28 : vector<16xf32> to vector<16x1xf32>
    %30 = vector.broadcast %29 : vector<16x1xf32> to vector<16x16xf32>
    %31 = arith.divf %27, %30 : vector<16x16xf32>
    %cst_16 = arith.constant dense<0.000000e+00> : vector<16x8xf32>
    %32 = tpu.matmul %31, %20, %cst_16 {dimension_numbers = #tpu.dot_dimension_numbers<[1], [0], [0], [1], [0, 0, 1, 1], [], []>} : vector<16x16xf32>, vector<16x8xf32>, vector<16x8xf32> -> vector<16x8xf32>
    %33 = vector.extract_strided_slice %17 {offsets = [0, 8], sizes = [16, 8], strides = [1, 1]} : vector<16x96xf32> to vector<16x8xf32>
    %34 = vector.extract_strided_slice %17 {offsets = [0, 40], sizes = [16, 8], strides = [1, 1]} : vector<16x96xf32> to vector<16x8xf32>
    %35 = vector.extract_strided_slice %17 {offsets = [0, 72], sizes = [16, 8], strides = [1, 1]} : vector<16x96xf32> to vector<16x8xf32>
    %cst_17 = arith.constant dense<0.000000e+00> : vector<16x16xf32>
    %36 = tpu.matmul %33, %34, %cst_17 {dimension_numbers = #tpu.dot_dimension_numbers<[1], [1], [0], [0], [0, 0, 1, 0], [], []>} : vector<16x8xf32>, vector<16x8xf32>, vector<16x16xf32> -> vector<16x16xf32>
    %37 = arith.addf %36, %9 : vector<16x16xf32>
    %cst_18 = arith.constant dense<0xFF800000> : vector<16xf32>
    %38 = vector.multi_reduction <maximumf>, %37, %cst_18 [1] : vector<16x16xf32> to vector<16xf32>
    %39 = vector.shape_cast %38 : vector<16xf32> to vector<16x1xf32>
    %40 = vector.broadcast %39 : vector<16x1xf32> to vector<16x16xf32>
    %41 = arith.subf %37, %40 : vector<16x16xf32>
    %42 = math.exp %41 : vector<16x16xf32>
    %cst_19 = arith.constant dense<0.000000e+00> : vector<16xf32>
    %43 = vector.multi_reduction <add>, %42, %cst_19 [1] : vector<16x16xf32> to vector<16xf32>
    %44 = vector.shape_cast %43 : vector<16xf32> to vector<16x1xf32>
    %45 = vector.broadcast %44 : vector<16x1xf32> to vector<16x16xf32>
    %46 = arith.divf %42, %45 : vector<16x16xf32>
    %cst_20 = arith.constant dense<0.000000e+00> : vector<16x8xf32>
    %47 = tpu.matmul %46, %35, %cst_20 {dimension_numbers = #tpu.dot_dimension_numbers<[1], [0], [0], [1], [0, 0, 1, 1], [], []>} : vector<16x16xf32>, vector<16x8xf32>, vector<16x8xf32> -> vector<16x8xf32>
    %48 = vector.extract_strided_slice %17 {offsets = [0, 16], sizes = [16, 8], strides = [1, 1]} : vector<16x96xf32> to vector<16x8xf32>
    %49 = vector.extract_strided_slice %17 {offsets = [0, 48], sizes = [16, 8], strides = [1, 1]} : vector<16x96xf32> to vector<16x8xf32>
    %50 = vector.extract_strided_slice %17 {offsets = [0, 80], sizes = [16, 8], strides = [1, 1]} : vector<16x96xf32> to vector<16x8xf32>
    %cst_21 = arith.constant dense<0.000000e+00> : vector<16x16xf32>
    %51 = tpu.matmul %48, %49, %cst_21 {dimension_numbers = #tpu.dot_dimension_numbers<[1], [1], [0], [0], [0, 0, 1, 0], [], []>} : vector<16x8xf32>, vector<16x8xf32>, vector<16x16xf32> -> vector<16x16xf32>
    %52 = arith.addf %51, %9 : vector<16x16xf32>
    %cst_22 = arith.constant dense<0xFF800000> : vector<16xf32>
    %53 = vector.multi_reduction <maximumf>, %52, %cst_22 [1] : vector<16x16xf32> to vector<16xf32>
    %54 = vector.shape_cast %53 : vector<16xf32> to vector<16x1xf32>
    %55 = vector.broadcast %54 : vector<16x1xf32> to vector<16x16xf32>
    %56 = arith.subf %52, %55 : vector<16x16xf32>
    %57 = math.exp %56 : vector<16x16xf32>
    %cst_23 = arith.constant dense<0.000000e+00> : vector<16xf32>
    %58 = vector.multi_reduction <add>, %57, %cst_23 [1] : vector<16x16xf32> to vector<16xf32>
    %59 = vector.shape_cast %58 : vector<16xf32> to vector<16x1xf32>
    %60 = vector.broadcast %59 : vector<16x1xf32> to vector<16x16xf32>
    %61 = arith.divf %57, %60 : vector<16x16xf32>
    %cst_24 = arith.constant dense<0.000000e+00> : vector<16x8xf32>
    %62 = tpu.matmul %61, %50, %cst_24 {dimension_numbers = #tpu.dot_dimension_numbers<[1], [0], [0], [1], [0, 0, 1, 1], [], []>} : vector<16x16xf32>, vector<16x8xf32>, vector<16x8xf32> -> vector<16x8xf32>
    %63 = vector.extract_strided_slice %17 {offsets = [0, 24], sizes = [16, 8], strides = [1, 1]} : vector<16x96xf32> to vector<16x8xf32>
    %64 = vector.extract_strided_slice %17 {offsets = [0, 56], sizes = [16, 8], strides = [1, 1]} : vector<16x96xf32> to vector<16x8xf32>
    %65 = vector.extract_strided_slice %17 {offsets = [0, 88], sizes = [16, 8], strides = [1, 1]} : vector<16x96xf32> to vector<16x8xf32>
    %cst_25 = arith.constant dense<0.000000e+00> : vector<16x16xf32>
    %66 = tpu.matmul %63, %64, %cst_25 {dimension_numbers = #tpu.dot_dimension_numbers<[1], [1], [0], [0], [0, 0, 1, 0], [], []>} : vector<16x8xf32>, vector<16x8xf32>, vector<16x16xf32> -> vector<16x16xf32>
    %67 = arith.addf %66, %9 : vector<16x16xf32>
    %cst_26 = arith.constant dense<0xFF800000> : vector<16xf32>
    %68 = vector.multi_reduction <maximumf>, %67, %cst_26 [1] : vector<16x16xf32> to vector<16xf32>
    %69 = vector.shape_cast %68 : vector<16xf32> to vector<16x1xf32>
    %70 = vector.broadcast %69 : vector<16x1xf32> to vector<16x16xf32>
    %71 = arith.subf %67, %70 : vector<16x16xf32>
    %72 = math.exp %71 : vector<16x16xf32>
    %cst_27 = arith.constant dense<0.000000e+00> : vector<16xf32>
    %73 = vector.multi_reduction <add>, %72, %cst_27 [1] : vector<16x16xf32> to vector<16xf32>
    %74 = vector.shape_cast %73 : vector<16xf32> to vector<16x1xf32>
    %75 = vector.broadcast %74 : vector<16x1xf32> to vector<16x16xf32>
    %76 = arith.divf %72, %75 : vector<16x16xf32>
    %cst_28 = arith.constant dense<0.000000e+00> : vector<16x8xf32>
    %77 = tpu.matmul %76, %65, %cst_28 {dimension_numbers = #tpu.dot_dimension_numbers<[1], [0], [0], [1], [0, 0, 1, 1], [], []>} : vector<16x16xf32>, vector<16x8xf32>, vector<16x8xf32> -> vector<16x8xf32>
    %78 = tpu.concatenate %32, %47, %62, %77 in 1 : vector<16x8xf32>, vector<16x8xf32>, vector<16x8xf32>, vector<16x8xf32> -> vector<16x32xf32>
    %79 = arith.truncf %78 : vector<16x32xf32> to vector<16x32xbf16>
    %c0_29 = arith.constant 0 : index
    %c0_30 = arith.constant 0 : index
    %c0_31 = arith.constant 0 : index
    %80 = vector.load %arg5[%c0_29, %c0_30, %c0_31] : memref<2x32x32xbf16, #tpu.memory_space<vmem>>, vector<1x32x32xbf16>
    %81 = vector.shape_cast %80 : vector<1x32x32xbf16> to vector<32x32xbf16>
    %cst_32 = arith.constant dense<0.000000e+00> : vector<16x32xf32>
    %82 = tpu.matmul %79, %81, %cst_32 {dimension_numbers = #tpu.dot_dimension_numbers<[1], [0], [0], [1], [0, 0, 1, 1], [], []>} : vector<16x32xbf16>, vector<32x32xbf16>, vector<16x32xf32> -> vector<16x32xf32>
    %c0_33 = arith.constant 0 : index
    %c0_34 = arith.constant 0 : index
    %c0_35 = arith.constant 0 : index
    %83 = vector.load %arg6[%c0_33, %c0_34, %c0_35] : memref<2x1x32xf32, #tpu.memory_space<vmem>>, vector<1x1x32xf32>
    %84 = vector.shape_cast %83 : vector<1x1x32xf32> to vector<1x32xf32>
    %85 = vector.broadcast %84 : vector<1x32xf32> to vector<16x32xf32>
    %86 = arith.addf %82, %85 : vector<16x32xf32>
    %87 = arith.addf %1, %86 : vector<16x32xf32>
    %c0_36 = arith.constant 0 : index
    %c0_37 = arith.constant 0 : index
    %c0_38 = arith.constant 0 : index
    %88 = vector.load %arg7[%c0_36, %c0_37, %c0_38] : memref<2x1x32xf32, #tpu.memory_space<vmem>>, vector<1x1x32xf32>
    %89 = vector.shape_cast %88 : vector<1x1x32xf32> to vector<1x32xf32>
    %c0_39 = arith.constant 0 : index
    %c0_40 = arith.constant 0 : index
    %c0_41 = arith.constant 0 : index
    %90 = vector.load %arg8[%c0_39, %c0_40, %c0_41] : memref<2x1x32xf32, #tpu.memory_space<vmem>>, vector<1x1x32xf32>
    %91 = vector.shape_cast %90 : vector<1x1x32xf32> to vector<1x32xf32>
    %cst_42 = arith.constant dense<0.000000e+00> : vector<16xf32>
    %92 = vector.multi_reduction <add>, %87, %cst_42 [1] : vector<16x32xf32> to vector<16xf32>
    %93 = vector.shape_cast %92 : vector<16xf32> to vector<16x1xf32>
    %cst_43 = arith.constant 3.200000e+01 : f32
    %94 = vector.broadcast %cst_43 : f32 to vector<16x1xf32>
    %95 = arith.divf %93, %94 : vector<16x1xf32>
    %96 = vector.broadcast %95 : vector<16x1xf32> to vector<16x32xf32>
    %97 = arith.subf %87, %96 : vector<16x32xf32>
    %98 = arith.mulf %97, %97 : vector<16x32xf32>
    %cst_44 = arith.constant dense<0.000000e+00> : vector<16xf32>
    %99 = vector.multi_reduction <add>, %98, %cst_44 [1] : vector<16x32xf32> to vector<16xf32>
    %100 = vector.shape_cast %99 : vector<16xf32> to vector<16x1xf32>
    %cst_45 = arith.constant 3.200000e+01 : f32
    %101 = vector.broadcast %cst_45 : f32 to vector<16x1xf32>
    %102 = arith.divf %100, %101 : vector<16x1xf32>
    %103 = vector.broadcast %95 : vector<16x1xf32> to vector<16x32xf32>
    %104 = arith.subf %87, %103 : vector<16x32xf32>
    %cst_46 = arith.constant 9.99999996E-13 : f32
    %105 = vector.broadcast %cst_46 : f32 to vector<16x1xf32>
    %106 = arith.addf %102, %105 : vector<16x1xf32>
    %107 = math.rsqrt %106 : vector<16x1xf32>
    %108 = vector.broadcast %107 : vector<16x1xf32> to vector<16x32xf32>
    %109 = arith.mulf %104, %108 : vector<16x32xf32>
    %110 = vector.broadcast %89 : vector<1x32xf32> to vector<16x32xf32>
    %111 = arith.mulf %109, %110 : vector<16x32xf32>
    %112 = vector.broadcast %91 : vector<1x32xf32> to vector<16x32xf32>
    %113 = arith.addf %111, %112 : vector<16x32xf32>
    %114 = arith.truncf %113 : vector<16x32xf32> to vector<16x32xbf16>
    %c0_47 = arith.constant 0 : index
    %c0_48 = arith.constant 0 : index
    %c0_49 = arith.constant 0 : index
    %115 = vector.load %arg9[%c0_47, %c0_48, %c0_49] : memref<2x32x64xbf16, #tpu.memory_space<vmem>>, vector<1x32x64xbf16>
    %116 = vector.shape_cast %115 : vector<1x32x64xbf16> to vector<32x64xbf16>
    %cst_50 = arith.constant dense<0.000000e+00> : vector<16x64xf32>
    %117 = tpu.matmul %114, %116, %cst_50 {dimension_numbers = #tpu.dot_dimension_numbers<[1], [0], [0], [1], [0, 0, 1, 1], [], []>} : vector<16x32xbf16>, vector<32x64xbf16>, vector<16x64xf32> -> vector<16x64xf32>
    %c0_51 = arith.constant 0 : index
    %c0_52 = arith.constant 0 : index
    %c0_53 = arith.constant 0 : index
    %118 = vector.load %arg10[%c0_51, %c0_52, %c0_53] : memref<2x1x64xf32, #tpu.memory_space<vmem>>, vector<1x1x64xf32>
    %119 = vector.shape_cast %118 : vector<1x1x64xf32> to vector<1x64xf32>
    %120 = vector.broadcast %119 : vector<1x64xf32> to vector<16x64xf32>
    %121 = arith.addf %117, %120 : vector<16x64xf32>
    %122 = arith.mulf %121, %121 : vector<16x64xf32>
    %123 = arith.mulf %121, %122 : vector<16x64xf32>
    %cst_54 = arith.constant 4.471500e-02 : f32
    %124 = vector.broadcast %cst_54 : f32 to vector<16x64xf32>
    %125 = arith.mulf %124, %123 : vector<16x64xf32>
    %126 = arith.addf %121, %125 : vector<16x64xf32>
    %cst_55 = arith.constant 0.797884583 : f32
    %127 = vector.broadcast %cst_55 : f32 to vector<16x64xf32>
    %128 = arith.mulf %127, %126 : vector<16x64xf32>
    %129 = math.tanh %128 : vector<16x64xf32>
    %cst_56 = arith.constant 1.000000e+00 : f32
    %130 = vector.broadcast %cst_56 : f32 to vector<16x64xf32>
    %131 = arith.addf %130, %129 : vector<16x64xf32>
    %cst_57 = arith.constant 5.000000e-01 : f32
    %132 = vector.broadcast %cst_57 : f32 to vector<16x64xf32>
    %133 = arith.mulf %132, %131 : vector<16x64xf32>
    %134 = arith.mulf %121, %133 : vector<16x64xf32>
    %135 = arith.truncf %134 : vector<16x64xf32> to vector<16x64xbf16>
    %c0_58 = arith.constant 0 : index
    %c0_59 = arith.constant 0 : index
    %c0_60 = arith.constant 0 : index
    %136 = vector.load %arg11[%c0_58, %c0_59, %c0_60] : memref<2x64x32xbf16, #tpu.memory_space<vmem>>, vector<1x64x32xbf16>
    %137 = vector.shape_cast %136 : vector<1x64x32xbf16> to vector<64x32xbf16>
    %cst_61 = arith.constant dense<0.000000e+00> : vector<16x32xf32>
    %138 = tpu.matmul %135, %137, %cst_61 {dimension_numbers = #tpu.dot_dimension_numbers<[1], [0], [0], [1], [0, 0, 1, 1], [], []>} : vector<16x64xbf16>, vector<64x32xbf16>, vector<16x32xf32> -> vector<16x32xf32>
    %c0_62 = arith.constant 0 : index
    %c0_63 = arith.constant 0 : index
    %c0_64 = arith.constant 0 : index
    %139 = vector.load %arg12[%c0_62, %c0_63, %c0_64] : memref<2x1x32xf32, #tpu.memory_space<vmem>>, vector<1x1x32xf32>
    %140 = vector.shape_cast %139 : vector<1x1x32xf32> to vector<1x32xf32>
    %141 = vector.broadcast %140 : vector<1x32xf32> to vector<16x32xf32>
    %142 = arith.addf %138, %141 : vector<16x32xf32>
    %143 = arith.addf %113, %142 : vector<16x32xf32>
    %c0_65 = arith.constant 0 : index
    %c0_66 = arith.constant 0 : index
    %c0_67 = arith.constant 0 : index
    %144 = vector.load %arg13[%c0_65, %c0_66, %c0_67] : memref<2x1x32xf32, #tpu.memory_space<vmem>>, vector<1x1x32xf32>
    %145 = vector.shape_cast %144 : vector<1x1x32xf32> to vector<1x32xf32>
    %c0_68 = arith.constant 0 : index
    %c0_69 = arith.constant 0 : index
    %c0_70 = arith.constant 0 : index
    %146 = vector.load %arg14[%c0_68, %c0_69, %c0_70] : memref<2x1x32xf32, #tpu.memory_space<vmem>>, vector<1x1x32xf32>
    %147 = vector.shape_cast %146 : vector<1x1x32xf32> to vector<1x32xf32>
    %cst_71 = arith.constant dense<0.000000e+00> : vector<16xf32>
    %148 = vector.multi_reduction <add>, %143, %cst_71 [1] : vector<16x32xf32> to vector<16xf32>
    %149 = vector.shape_cast %148 : vector<16xf32> to vector<16x1xf32>
    %cst_72 = arith.constant 3.200000e+01 : f32
    %150 = vector.broadcast %cst_72 : f32 to vector<16x1xf32>
    %151 = arith.divf %149, %150 : vector<16x1xf32>
    %152 = vector.broadcast %151 : vector<16x1xf32> to vector<16x32xf32>
    %153 = arith.subf %143, %152 : vector<16x32xf32>
    %154 = arith.mulf %153, %153 : vector<16x32xf32>
    %cst_73 = arith.constant dense<0.000000e+00> : vector<16xf32>
    %155 = vector.multi_reduction <add>, %154, %cst_73 [1] : vector<16x32xf32> to vector<16xf32>
    %156 = vector.shape_cast %155 : vector<16xf32> to vector<16x1xf32>
    %cst_74 = arith.constant 3.200000e+01 : f32
    %157 = vector.broadcast %cst_74 : f32 to vector<16x1xf32>
    %158 = arith.divf %156, %157 : vector<16x1xf32>
    %159 = vector.broadcast %151 : vector<16x1xf32> to vector<16x32xf32>
    %160 = arith.subf %143, %159 : vector<16x32xf32>
    %cst_75 = arith.constant 9.99999996E-13 : f32
    %161 = vector.broadcast %cst_75 : f32 to vector<16x1xf32>
    %162 = arith.addf %158, %161 : vector<16x1xf32>
    %163 = math.rsqrt %162 : vector<16x1xf32>
    %164 = vector.broadcast %163 : vector<16x1xf32> to vector<16x32xf32>
    %165 = arith.mulf %160, %164 : vector<16x32xf32>
    %166 = vector.broadcast %145 : vector<1x32xf32> to vector<16x32xf32>
    %167 = arith.mulf %165, %166 : vector<16x32xf32>
    %168 = vector.broadcast %147 : vector<1x32xf32> to vector<16x32xf32>
    %169 = arith.addf %167, %168 : vector<16x32xf32>
    %170 = arith.truncf %169 : vector<16x32xf32> to vector<16x32xbf16>
    %c1 = arith.constant 1 : index
    %c0_76 = arith.constant 0 : index
    %c0_77 = arith.constant 0 : index
    %171 = vector.load %arg3[%c1, %c0_76, %c0_77] : memref<2x32x96xbf16, #tpu.memory_space<vmem>>, vector<1x32x96xbf16>
    %172 = vector.shape_cast %171 : vector<1x32x96xbf16> to vector<32x96xbf16>
    %cst_78 = arith.constant dense<0.000000e+00> : vector<16x96xf32>
    %173 = tpu.matmul %170, %172, %cst_78 {dimension_numbers = #tpu.dot_dimension_numbers<[1], [0], [0], [1], [0, 0, 1, 1], [], []>} : vector<16x32xbf16>, vector<32x96xbf16>, vector<16x96xf32> -> vector<16x96xf32>
    %c1_79 = arith.constant 1 : index
    %c0_80 = arith.constant 0 : index
    %c0_81 = arith.constant 0 : index
    %174 = vector.load %arg4[%c1_79, %c0_80, %c0_81] : memref<2x1x96xf32, #tpu.memory_space<vmem>>, vector<1x1x96xf32>
    %175 = vector.shape_cast %174 : vector<1x1x96xf32> to vector<1x96xf32>
    %176 = vector.broadcast %175 : vector<1x96xf32> to vector<16x96xf32>
    %177 = arith.addf %173, %176 : vector<16x96xf32>
    %178 = vector.extract_strided_slice %177 {offsets = [0, 0], sizes = [16, 8], strides = [1, 1]} : vector<16x96xf32> to vector<16x8xf32>
    %179 = vector.extract_strided_slice %177 {offsets = [0, 32], sizes = [16, 8], strides = [1, 1]} : vector<16x96xf32> to vector<16x8xf32>
    %180 = vector.extract_strided_slice %177 {offsets = [0, 64], sizes = [16, 8], strides = [1, 1]} : vector<16x96xf32> to vector<16x8xf32>
    %cst_82 = arith.constant dense<0.000000e+00> : vector<16x16xf32>
    %181 = tpu.matmul %178, %179, %cst_82 {dimension_numbers = #tpu.dot_dimension_numbers<[1], [1], [0], [0], [0, 0, 1, 0], [], []>} : vector<16x8xf32>, vector<16x8xf32>, vector<16x16xf32> -> vector<16x16xf32>
    %182 = arith.addf %181, %9 : vector<16x16xf32>
    %cst_83 = arith.constant dense<0xFF800000> : vector<16xf32>
    %183 = vector.multi_reduction <maximumf>, %182, %cst_83 [1] : vector<16x16xf32> to vector<16xf32>
    %184 = vector.shape_cast %183 : vector<16xf32> to vector<16x1xf32>
    %185 = vector.broadcast %184 : vector<16x1xf32> to vector<16x16xf32>
    %186 = arith.subf %182, %185 : vector<16x16xf32>
    %187 = math.exp %186 : vector<16x16xf32>
    %cst_84 = arith.constant dense<0.000000e+00> : vector<16xf32>
    %188 = vector.multi_reduction <add>, %187, %cst_84 [1] : vector<16x16xf32> to vector<16xf32>
    %189 = vector.shape_cast %188 : vector<16xf32> to vector<16x1xf32>
    %190 = vector.broadcast %189 : vector<16x1xf32> to vector<16x16xf32>
    %191 = arith.divf %187, %190 : vector<16x16xf32>
    %cst_85 = arith.constant dense<0.000000e+00> : vector<16x8xf32>
    %192 = tpu.matmul %191, %180, %cst_85 {dimension_numbers = #tpu.dot_dimension_numbers<[1], [0], [0], [1], [0, 0, 1, 1], [], []>} : vector<16x16xf32>, vector<16x8xf32>, vector<16x8xf32> -> vector<16x8xf32>
    %193 = vector.extract_strided_slice %177 {offsets = [0, 8], sizes = [16, 8], strides = [1, 1]} : vector<16x96xf32> to vector<16x8xf32>
    %194 = vector.extract_strided_slice %177 {offsets = [0, 40], sizes = [16, 8], strides = [1, 1]} : vector<16x96xf32> to vector<16x8xf32>
    %195 = vector.extract_strided_slice %177 {offsets = [0, 72], sizes = [16, 8], strides = [1, 1]} : vector<16x96xf32> to vector<16x8xf32>
    %cst_86 = arith.constant dense<0.000000e+00> : vector<16x16xf32>
    %196 = tpu.matmul %193, %194, %cst_86 {dimension_numbers = #tpu.dot_dimension_numbers<[1], [1], [0], [0], [0, 0, 1, 0], [], []>} : vector<16x8xf32>, vector<16x8xf32>, vector<16x16xf32> -> vector<16x16xf32>
    %197 = arith.addf %196, %9 : vector<16x16xf32>
    %cst_87 = arith.constant dense<0xFF800000> : vector<16xf32>
    %198 = vector.multi_reduction <maximumf>, %197, %cst_87 [1] : vector<16x16xf32> to vector<16xf32>
    %199 = vector.shape_cast %198 : vector<16xf32> to vector<16x1xf32>
    %200 = vector.broadcast %199 : vector<16x1xf32> to vector<16x16xf32>
    %201 = arith.subf %197, %200 : vector<16x16xf32>
    %202 = math.exp %201 : vector<16x16xf32>
    %cst_88 = arith.constant dense<0.000000e+00> : vector<16xf32>
    %203 = vector.multi_reduction <add>, %202, %cst_88 [1] : vector<16x16xf32> to vector<16xf32>
    %204 = vector.shape_cast %203 : vector<16xf32> to vector<16x1xf32>
    %205 = vector.broadcast %204 : vector<16x1xf32> to vector<16x16xf32>
    %206 = arith.divf %202, %205 : vector<16x16xf32>
    %cst_89 = arith.constant dense<0.000000e+00> : vector<16x8xf32>
    %207 = tpu.matmul %206, %195, %cst_89 {dimension_numbers = #tpu.dot_dimension_numbers<[1], [0], [0], [1], [0, 0, 1, 1], [], []>} : vector<16x16xf32>, vector<16x8xf32>, vector<16x8xf32> -> vector<16x8xf32>
    %208 = vector.extract_strided_slice %177 {offsets = [0, 16], sizes = [16, 8], strides = [1, 1]} : vector<16x96xf32> to vector<16x8xf32>
    %209 = vector.extract_strided_slice %177 {offsets = [0, 48], sizes = [16, 8], strides = [1, 1]} : vector<16x96xf32> to vector<16x8xf32>
    %210 = vector.extract_strided_slice %177 {offsets = [0, 80], sizes = [16, 8], strides = [1, 1]} : vector<16x96xf32> to vector<16x8xf32>
    %cst_90 = arith.constant dense<0.000000e+00> : vector<16x16xf32>
    %211 = tpu.matmul %208, %209, %cst_90 {dimension_numbers = #tpu.dot_dimension_numbers<[1], [1], [0], [0], [0, 0, 1, 0], [], []>} : vector<16x8xf32>, vector<16x8xf32>, vector<16x16xf32> -> vector<16x16xf32>
    %212 = arith.addf %211, %9 : vector<16x16xf32>
    %cst_91 = arith.constant dense<0xFF800000> : vector<16xf32>
    %213 = vector.multi_reduction <maximumf>, %212, %cst_91 [1] : vector<16x16xf32> to vector<16xf32>
    %214 = vector.shape_cast %213 : vector<16xf32> to vector<16x1xf32>
    %215 = vector.broadcast %214 : vector<16x1xf32> to vector<16x16xf32>
    %216 = arith.subf %212, %215 : vector<16x16xf32>
    %217 = math.exp %216 : vector<16x16xf32>
    %cst_92 = arith.constant dense<0.000000e+00> : vector<16xf32>
    %218 = vector.multi_reduction <add>, %217, %cst_92 [1] : vector<16x16xf32> to vector<16xf32>
    %219 = vector.shape_cast %218 : vector<16xf32> to vector<16x1xf32>
    %220 = vector.broadcast %219 : vector<16x1xf32> to vector<16x16xf32>
    %221 = arith.divf %217, %220 : vector<16x16xf32>
    %cst_93 = arith.constant dense<0.000000e+00> : vector<16x8xf32>
    %222 = tpu.matmul %221, %210, %cst_93 {dimension_numbers = #tpu.dot_dimension_numbers<[1], [0], [0], [1], [0, 0, 1, 1], [], []>} : vector<16x16xf32>, vector<16x8xf32>, vector<16x8xf32> -> vector<16x8xf32>
    %223 = vector.extract_strided_slice %177 {offsets = [0, 24], sizes = [16, 8], strides = [1, 1]} : vector<16x96xf32> to vector<16x8xf32>
    %224 = vector.extract_strided_slice %177 {offsets = [0, 56], sizes = [16, 8], strides = [1, 1]} : vector<16x96xf32> to vector<16x8xf32>
    %225 = vector.extract_strided_slice %177 {offsets = [0, 88], sizes = [16, 8], strides = [1, 1]} : vector<16x96xf32> to vector<16x8xf32>
    %cst_94 = arith.constant dense<0.000000e+00> : vector<16x16xf32>
    %226 = tpu.matmul %223, %224, %cst_94 {dimension_numbers = #tpu.dot_dimension_numbers<[1], [1], [0], [0], [0, 0, 1, 0], [], []>} : vector<16x8xf32>, vector<16x8xf32>, vector<16x16xf32> -> vector<16x16xf32>
    %227 = arith.addf %226, %9 : vector<16x16xf32>
    %cst_95 = arith.constant dense<0xFF800000> : vector<16xf32>
    %228 = vector.multi_reduction <maximumf>, %227, %cst_95 [1] : vector<16x16xf32> to vector<16xf32>
    %229 = vector.shape_cast %228 : vector<16xf32> to vector<16x1xf32>
    %230 = vector.broadcast %229 : vector<16x1xf32> to vector<16x16xf32>
    %231 = arith.subf %227, %230 : vector<16x16xf32>
    %232 = math.exp %231 : vector<16x16xf32>
    %cst_96 = arith.constant dense<0.000000e+00> : vector<16xf32>
    %233 = vector.multi_reduction <add>, %232, %cst_96 [1] : vector<16x16xf32> to vector<16xf32>
    %234 = vector.shape_cast %233 : vector<16xf32> to vector<16x1xf32>
    %235 = vector.broadcast %234 : vector<16x1xf32> to vector<16x16xf32>
    %236 = arith.divf %232, %235 : vector<16x16xf32>
    %cst_97 = arith.constant dense<0.000000e+00> : vector<16x8xf32>
    %237 = tpu.matmul %236, %225, %cst_97 {dimension_numbers = #tpu.dot_dimension_numbers<[1], [0], [0], [1], [0, 0, 1, 1], [], []>} : vector<16x16xf32>, vector<16x8xf32>, vector<16x8xf32> -> vector<16x8xf32>
    %238 = tpu.concatenate %192, %207, %222, %237 in 1 : vector<16x8xf32>, vector<16x8xf32>, vector<16x8xf32>, vector<16x8xf32> -> vector<16x32xf32>
    %239 = arith.truncf %238 : vector<16x32xf32> to vector<16x32xbf16>
    %c1_98 = arith.constant 1 : index
    %c0_99 = arith.constant 0 : index
    %c0_100 = arith.constant 0 : index
    %240 = vector.load %arg5[%c1_98, %c0_99, %c0_100] : memref<2x32x32xbf16, #tpu.memory_space<vmem>>, vector<1x32x32xbf16>
    %241 = vector.shape_cast %240 : vector<1x32x32xbf16> to vector<32x32xbf16>
    %cst_101 = arith.constant dense<0.000000e+00> : vector<16x32xf32>
    %242 = tpu.matmul %239, %241, %cst_101 {dimension_numbers = #tpu.dot_dimension_numbers<[1], [0], [0], [1], [0, 0, 1, 1], [], []>} : vector<16x32xbf16>, vector<32x32xbf16>, vector<16x32xf32> -> vector<16x32xf32>
    %c1_102 = arith.constant 1 : index
    %c0_103 = arith.constant 0 : index
    %c0_104 = arith.constant 0 : index
    %243 = vector.load %arg6[%c1_102, %c0_103, %c0_104] : memref<2x1x32xf32, #tpu.memory_space<vmem>>, vector<1x1x32xf32>
    %244 = vector.shape_cast %243 : vector<1x1x32xf32> to vector<1x32xf32>
    %245 = vector.broadcast %244 : vector<1x32xf32> to vector<16x32xf32>
    %246 = arith.addf %242, %245 : vector<16x32xf32>
    %247 = arith.addf %169, %246 : vector<16x32xf32>
    %c1_105 = arith.constant 1 : index
    %c0_106 = arith.constant 0 : index
    %c0_107 = arith.constant 0 : index
    %248 = vector.load %arg7[%c1_105, %c0_106, %c0_107] : memref<2x1x32xf32, #tpu.memory_space<vmem>>, vector<1x1x32xf32>
    %249 = vector.shape_cast %248 : vector<1x1x32xf32> to vector<1x32xf32>
    %c1_108 = arith.constant 1 : index
    %c0_109 = arith.constant 0 : index
    %c0_110 = arith.constant 0 : index
    %250 = vector.load %arg8[%c1_108, %c0_109, %c0_110] : memref<2x1x32xf32, #tpu.memory_space<vmem>>, vector<1x1x32xf32>
    %251 = vector.shape_cast %250 : vector<1x1x32xf32> to vector<1x32xf32>
    %cst_111 = arith.constant dense<0.000000e+00> : vector<16xf32>
    %252 = vector.multi_reduction <add>, %247, %cst_111 [1] : vector<16x32xf32> to vector<16xf32>
    %253 = vector.shape_cast %252 : vector<16xf32> to vector<16x1xf32>
    %cst_112 = arith.constant 3.200000e+01 : f32
    %254 = vector.broadcast %cst_112 : f32 to vector<16x1xf32>
    %255 = arith.divf %253, %254 : vector<16x1xf32>
    %256 = vector.broadcast %255 : vector<16x1xf32> to vector<16x32xf32>
    %257 = arith.subf %247, %256 : vector<16x32xf32>
    %258 = arith.mulf %257, %257 : vector<16x32xf32>
    %cst_113 = arith.constant dense<0.000000e+00> : vector<16xf32>
    %259 = vector.multi_reduction <add>, %258, %cst_113 [1] : vector<16x32xf32> to vector<16xf32>
    %260 = vector.shape_cast %259 : vector<16xf32> to vector<16x1xf32>
    %cst_114 = arith.constant 3.200000e+01 : f32
    %261 = vector.broadcast %cst_114 : f32 to vector<16x1xf32>
    %262 = arith.divf %260, %261 : vector<16x1xf32>
    %263 = vector.broadcast %255 : vector<16x1xf32> to vector<16x32xf32>
    %264 = arith.subf %247, %263 : vector<16x32xf32>
    %cst_115 = arith.constant 9.99999996E-13 : f32
    %265 = vector.broadcast %cst_115 : f32 to vector<16x1xf32>
    %266 = arith.addf %262, %265 : vector<16x1xf32>
    %267 = math.rsqrt %266 : vector<16x1xf32>
    %268 = vector.broadcast %267 : vector<16x1xf32> to vector<16x32xf32>
    %269 = arith.mulf %264, %268 : vector<16x32xf32>
    %270 = vector.broadcast %249 : vector<1x32xf32> to vector<16x32xf32>
    %271 = arith.mulf %269, %270 : vector<16x32xf32>
    %272 = vector.broadcast %251 : vector<1x32xf32> to vector<16x32xf32>
    %273 = arith.addf %271, %272 : vector<16x32xf32>
    %274 = arith.truncf %273 : vector<16x32xf32> to vector<16x32xbf16>
    %c1_116 = arith.constant 1 : index
    %c0_117 = arith.constant 0 : index
    %c0_118 = arith.constant 0 : index
    %275 = vector.load %arg9[%c1_116, %c0_117, %c0_118] : memref<2x32x64xbf16, #tpu.memory_space<vmem>>, vector<1x32x64xbf16>
    %276 = vector.shape_cast %275 : vector<1x32x64xbf16> to vector<32x64xbf16>
    %cst_119 = arith.constant dense<0.000000e+00> : vector<16x64xf32>
    %277 = tpu.matmul %274, %276, %cst_119 {dimension_numbers = #tpu.dot_dimension_numbers<[1], [0], [0], [1], [0, 0, 1, 1], [], []>} : vector<16x32xbf16>, vector<32x64xbf16>, vector<16x64xf32> -> vector<16x64xf32>
    %c1_120 = arith.constant 1 : index
    %c0_121 = arith.constant 0 : index
    %c0_122 = arith.constant 0 : index
    %278 = vector.load %arg10[%c1_120, %c0_121, %c0_122] : memref<2x1x64xf32, #tpu.memory_space<vmem>>, vector<1x1x64xf32>
    %279 = vector.shape_cast %278 : vector<1x1x64xf32> to vector<1x64xf32>
    %280 = vector.broadcast %279 : vector<1x64xf32> to vector<16x64xf32>
    %281 = arith.addf %277, %280 : vector<16x64xf32>
    %282 = arith.mulf %281, %281 : vector<16x64xf32>
    %283 = arith.mulf %281, %282 : vector<16x64xf32>
    %cst_123 = arith.constant 4.471500e-02 : f32
    %284 = vector.broadcast %cst_123 : f32 to vector<16x64xf32>
    %285 = arith.mulf %284, %283 : vector<16x64xf32>
    %286 = arith.addf %281, %285 : vector<16x64xf32>
    %cst_124 = arith.constant 0.797884583 : f32
    %287 = vector.broadcast %cst_124 : f32 to vector<16x64xf32>
    %288 = arith.mulf %287, %286 : vector<16x64xf32>
    %289 = math.tanh %288 : vector<16x64xf32>
    %cst_125 = arith.constant 1.000000e+00 : f32
    %290 = vector.broadcast %cst_125 : f32 to vector<16x64xf32>
    %291 = arith.addf %290, %289 : vector<16x64xf32>
    %cst_126 = arith.constant 5.000000e-01 : f32
    %292 = vector.broadcast %cst_126 : f32 to vector<16x64xf32>
    %293 = arith.mulf %292, %291 : vector<16x64xf32>
    %294 = arith.mulf %281, %293 : vector<16x64xf32>
    %295 = arith.truncf %294 : vector<16x64xf32> to vector<16x64xbf16>
    %c1_127 = arith.constant 1 : index
    %c0_128 = arith.constant 0 : index
    %c0_129 = arith.constant 0 : index
    %296 = vector.load %arg11[%c1_127, %c0_128, %c0_129] : memref<2x64x32xbf16, #tpu.memory_space<vmem>>, vector<1x64x32xbf16>
    %297 = vector.shape_cast %296 : vector<1x64x32xbf16> to vector<64x32xbf16>
    %cst_130 = arith.constant dense<0.000000e+00> : vector<16x32xf32>
    %298 = tpu.matmul %295, %297, %cst_130 {dimension_numbers = #tpu.dot_dimension_numbers<[1], [0], [0], [1], [0, 0, 1, 1], [], []>} : vector<16x64xbf16>, vector<64x32xbf16>, vector<16x32xf32> -> vector<16x32xf32>
    %c1_131 = arith.constant 1 : index
    %c0_132 = arith.constant 0 : index
    %c0_133 = arith.constant 0 : index
    %299 = vector.load %arg12[%c1_131, %c0_132, %c0_133] : memref<2x1x32xf32, #tpu.memory_space<vmem>>, vector<1x1x32xf32>
    %300 = vector.shape_cast %299 : vector<1x1x32xf32> to vector<1x32xf32>
    %301 = vector.broadcast %300 : vector<1x32xf32> to vector<16x32xf32>
    %302 = arith.addf %298, %301 : vector<16x32xf32>
    %303 = arith.addf %273, %302 : vector<16x32xf32>
    %c1_134 = arith.constant 1 : index
    %c0_135 = arith.constant 0 : index
    %c0_136 = arith.constant 0 : index
    %304 = vector.load %arg13[%c1_134, %c0_135, %c0_136] : memref<2x1x32xf32, #tpu.memory_space<vmem>>, vector<1x1x32xf32>
    %305 = vector.shape_cast %304 : vector<1x1x32xf32> to vector<1x32xf32>
    %c1_137 = arith.constant 1 : index
    %c0_138 = arith.constant 0 : index
    %c0_139 = arith.constant 0 : index
    %306 = vector.load %arg14[%c1_137, %c0_138, %c0_139] : memref<2x1x32xf32, #tpu.memory_space<vmem>>, vector<1x1x32xf32>
    %307 = vector.shape_cast %306 : vector<1x1x32xf32> to vector<1x32xf32>
    %cst_140 = arith.constant dense<0.000000e+00> : vector<16xf32>
    %308 = vector.multi_reduction <add>, %303, %cst_140 [1] : vector<16x32xf32> to vector<16xf32>
    %309 = vector.shape_cast %308 : vector<16xf32> to vector<16x1xf32>
    %cst_141 = arith.constant 3.200000e+01 : f32
    %310 = vector.broadcast %cst_141 : f32 to vector<16x1xf32>
    %311 = arith.divf %309, %310 : vector<16x1xf32>
    %312 = vector.broadcast %311 : vector<16x1xf32> to vector<16x32xf32>
    %313 = arith.subf %303, %312 : vector<16x32xf32>
    %314 = arith.mulf %313, %313 : vector<16x32xf32>
    %cst_142 = arith.constant dense<0.000000e+00> : vector<16xf32>
    %315 = vector.multi_reduction <add>, %314, %cst_142 [1] : vector<16x32xf32> to vector<16xf32>
    %316 = vector.shape_cast %315 : vector<16xf32> to vector<16x1xf32>
    %cst_143 = arith.constant 3.200000e+01 : f32
    %317 = vector.broadcast %cst_143 : f32 to vector<16x1xf32>
    %318 = arith.divf %316, %317 : vector<16x1xf32>
    %319 = vector.broadcast %311 : vector<16x1xf32> to vector<16x32xf32>
    %320 = arith.subf %303, %319 : vector<16x32xf32>
    %cst_144 = arith.constant 9.99999996E-13 : f32
    %321 = vector.broadcast %cst_144 : f32 to vector<16x1xf32>
    %322 = arith.addf %318, %321 : vector<16x1xf32>
    %323 = math.rsqrt %322 : vector<16x1xf32>
    %324 = vector.broadcast %323 : vector<16x1xf32> to vector<16x32xf32>
    %325 = arith.mulf %320, %324 : vector<16x32xf32>
    %326 = vector.broadcast %305 : vector<1x32xf32> to vector<16x32xf32>
    %327 = arith.mulf %325, %326 : vector<16x32xf32>
    %328 = vector.broadcast %307 : vector<1x32xf32> to vector<16x32xf32>
    %329 = arith.addf %327, %328 : vector<16x32xf32>
    %c0_145 = arith.constant 0 : index
    %c0_146 = arith.constant 0 : index
    %c0_147 = arith.constant 0 : index
    %330 = vector.load %arg15[%c0_145, %c0_146, %c0_147] : memref<1x16x32xf32, #tpu.memory_space<vmem>>, vector<1x16x32xf32>
    %331 = vector.shape_cast %330 : vector<1x16x32xf32> to vector<16x32xf32>
    %332 = vector.shape_cast %329 : vector<16x32xf32> to vector<1x16x32xf32>
    tpu.vector_store %arg15[%c0_145, %c0_146, %c0_147], %332 {strides = array<i32>} : memref<1x16x32xf32, #tpu.memory_space<vmem>>, vector<1x16x32xf32>,
    return
  }
  func.func @transform_0(%arg0: i32) -> (i32, i32, i32) {
    %c0_i32 = arith.constant 0 : i32
    %c0_i32_0 = arith.constant 0 : i32
    %c0_i32_1 = arith.constant 0 : i32
    return %arg0, %c0_i32, %c0_i32_0 : i32, i32, i32
  }
  func.func @transform_1(%arg0: i32) -> (i32, i32, i32) {
    %c0_i32 = arith.constant 0 : i32
    %c0_i32_0 = arith.constant 0 : i32
    %c0_i32_1 = arith.constant 0 : i32
    return %arg0, %c0_i32, %c0_i32_0 : i32, i32, i32
  }
  func.func @transform_2(%arg0: i32) -> (i32, i32, i32) {
    %c0_i32 = arith.constant 0 : i32
    %c0_i32_0 = arith.constant 0 : i32
    %c0_i32_1 = arith.constant 0 : i32
    %c0_i32_2 = arith.constant 0 : i32
    return %c0_i32, %c0_i32_0, %c0_i32_1 : i32, i32, i32
  }
  func.func @transform_3(%arg0: i32) -> (i32, i32, i32) {
    %c0_i32 = arith.constant 0 : i32
    %c0_i32_0 = arith.constant 0 : i32
    %c0_i32_1 = arith.constant 0 : i32
    %c0_i32_2 = arith.constant 0 : i32
    return %c0_i32, %c0_i32_0, %c0_i32_1 : i32, i32, i32
  }
  func.func @transform_4(%arg0: i32) -> (i32, i32, i32) {
    %c0_i32 = arith.constant 0 : i32
    %c0_i32_0 = arith.constant 0 : i32
    %c0_i32_1 = arith.constant 0 : i32
    %c0_i32_2 = arith.constant 0 : i32
    return %c0_i32, %c0_i32_0, %c0_i32_1 : i32, i32, i32
  }
  func.func @transform_5(%arg0: i32) -> (i32, i32, i32) {
    %c0_i32 = arith.constant 0 : i32
    %c0_i32_0 = arith.constant 0 : i32
    %c0_i32_1 = arith.constant 0 : i32
    %c0_i32_2 = arith.constant 0 : i32
    return %c0_i32, %c0_i32_0, %c0_i32_1 : i32, i32, i32
  }
  func.func @transform_6(%arg0: i32) -> (i32, i32, i32) {
    %c0_i32 = arith.constant 0 : i32
    %c0_i32_0 = arith.constant 0 : i32
    %c0_i32_1 = arith.constant 0 : i32
    %c0_i32_2 = arith.constant 0 : i32
    return %c0_i32, %c0_i32_0, %c0_i32_1 : i32, i32, i32
  }
  func.func @transform_7(%arg0: i32) -> (i32, i32, i32) {
    %c0_i32 = arith.constant 0 : i32
    %c0_i32_0 = arith.constant 0 : i32
    %c0_i32_1 = arith.constant 0 : i32
    %c0_i32_2 = arith.constant 0 : i32
    return %c0_i32, %c0_i32_0, %c0_i32_1 : i32, i32, i32
  }
  func.func @transform_8(%arg0: i32) -> (i32, i32, i32) {
    %c0_i32 = arith.constant 0 : i32
    %c0_i32_0 = arith.constant 0 : i32
    %c0_i32_1 = arith.constant 0 : i32
    %c0_i32_2 = arith.constant 0 : i32
    return %c0_i32, %c0_i32_0, %c0_i32_1 : i32, i32, i32
  }
  func.func @transform_9(%arg0: i32) -> (i32, i32, i32) {
    %c0_i32 = arith.constant 0 : i32
    %c0_i32_0 = arith.constant 0 : i32
    %c0_i32_1 = arith.constant 0 : i32
    %c0_i32_2 = arith.constant 0 : i32
    return %c0_i32, %c0_i32_0, %c0_i32_1 : i32, i32, i32
  }
  func.func @transform_10(%arg0: i32) -> (i32, i32, i32) {
    %c0_i32 = arith.constant 0 : i32
    %c0_i32_0 = arith.constant 0 : i32
    %c0_i32_1 = arith.constant 0 : i32
    %c0_i32_2 = arith.constant 0 : i32
    return %c0_i32, %c0_i32_0, %c0_i32_1 : i32, i32, i32
  }
  func.func @transform_11(%arg0: i32) -> (i32, i32, i32) {
    %c0_i32 = arith.constant 0 : i32
    %c0_i32_0 = arith.constant 0 : i32
    %c0_i32_1 = arith.constant 0 : i32
    %c0_i32_2 = arith.constant 0 : i32
    return %c0_i32, %c0_i32_0, %c0_i32_1 : i32, i32, i32
  }
  func.func @transform_12(%arg0: i32) -> (i32, i32, i32) {
    %c0_i32 = arith.constant 0 : i32
    %c0_i32_0 = arith.constant 0 : i32
    %c0_i32_1 = arith.constant 0 : i32
    %c0_i32_2 = arith.constant 0 : i32
    return %c0_i32, %c0_i32_0, %c0_i32_1 : i32, i32, i32
  }
  func.func @transform_13(%arg0: i32) -> (i32, i32, i32) {
    %c0_i32 = arith.constant 0 : i32
    %c0_i32_0 = arith.constant 0 : i32
    %c0_i32_1 = arith.constant 0 : i32
    %c0_i32_2 = arith.constant 0 : i32
    return %c0_i32, %c0_i32_0, %c0_i32_1 : i32, i32, i32
  }
  func.func @transform_14(%arg0: i32) -> (i32, i32, i32) {
    %c0_i32 = arith.constant 0 : i32
    %c0_i32_0 = arith.constant 0 : i32
    %c0_i32_1 = arith.constant 0 : i32
    return %arg0, %c0_i32, %c0_i32_0 : i32, i32, i32
  }
}

</mosaic_0001>

<bundles_post_ra>
// kernel: erenet_forward.3
= control target key start
LH: loop header
LB: loop body
LE: loop exit
PB: predicated region body
PF: predicated region fallthrough
CT: control target
= control target key end

     0   :  { %s1138_s21 = smov 0   ;;  %s1434_s0 = inlined_call_operand.vmem [shape: f32[2,16,32], index: 0, kind: input, shape index: {}]   ;;  %s1435_s1 = inlined_call_operand.vmem [shape: f32[2,16,16], index: 1, kind: input, shape index: {}]   ;;  %s1436_s2 = inlined_call_operand.vmem [shape: bf16[32,320], index: 2, kind: input, shape index: {}]   ;;  %s1437_s3 = inlined_call_operand.vmem [shape: f32[1,320], index: 3, kind: input, shape index: {}]   ;;  %s1438_s4 = inlined_call_operand.vmem [shape: f32[16,16], index: 4, kind: input, shape index: {}]   ;;  %s1439_s5 = inlined_call_operand.vmem [shape: f32[16,16], index: 5, kind: input, shape index: {}]   ;;  %s1440_s6 = inlined_call_operand.vmem [shape: f32[2,16,128], index: 6, kind: output, shape index: {}]  }
   0x1 LB: > { %s986_s22 = sadd.s32 4294967295, %s1093_s21   ;;  %p990_p0 = scmp.ge.s32.totalorder %s1093_s21, 1  ;;  %s1093_s21 = sphi %s1138_s21, %s16_s21  }
   0x2   : > { %p222_p1 = scmp.lt.s32.totalorder %s1093_s21, 3 }
   0x4   : > { %p223_p2 = pnand %p990_p0, %p222_p1 }
   0x5   : > { %s1095_s29 = smov (!%p223_p2), 80   ;;  %s1096_s10 = smov (!%p223_p2), 112  }
   0x6   : > { %226 = sbr.rel (%p223_p2) target bundleno = 689 (0x2b1), region = 44  ;;  %p257_p3 = scmp.lt.s32.totalorder (!%p223_p2), %s986_s22, 1 }
   0x7   : > { %s1097_s19 = smov (!%p223_p2), 96   ;;  %s1098_s15 = smov (!%p223_p2), 16  }
   0x8   : > { %s1099_s16 = smov (!%p223_p2), 64   ;;  %s1100_s20 = smov (!%p223_p2), 48  }
   0x9   : > { %s1101_s23 = smov (!%p223_p2), 32  }
   0xb   : > { %v375_v0 = vld [vmem:[%s1439_s5 + $0x8] sm:$0xff]  ;;  %v1011_v1 = vld [vmem:[%s1436_s2 + $0x18] sm:$0xf]  ;;  %v1067_v2 = vld [vmem:[%s1436_s2 + $0x20] sm:$0xf0]  ;;  %s1442_s22 = smov (!%p257_p3, %s986_s22), 1 }
   0xc   : > { %429 = vrot.lane.b32.xlu0 %v375_v0, %s1095_s29  ;;  %v1012_v3 = vor.u32 %v1067_v2, %v1011_v1  ;;  %v1066_v4 = vld [vmem:[%s1436_s2 + $0x1c] sm:$0xf]  ;;  %v1013_v5 = vld [vmem:[%s1436_s2 + $0x24] sm:$0xf0]  ;;  %525 = vrot.lane.b32.xlu1 %v375_v0, %s1096_s10  ;;  %s1191_s9 = sshll.u32 %s1442_s22, 4  ;;  %vm326_vm0 = vcmask 261120  }
   0xd   : > { %v1016_v6 = vor.u32 %v1066_v4, %v1013_v5  ;;  %v999_v7 = vld [vmem:[%s1436_s2] sm:$0xf]  ;;  %v1064_v8 = vld [vmem:[%s1436_s2 + $0x8] sm:$0xf0]  ;;  %v1063_v9 = vld [vmem:[%s1436_s2 + $0x4] sm:$0xf]  ;;  %499 = vrot.lane.b32.xlu2 %v375_v0, %s1097_s19  ;;  %s261_s13 = scalar_lea.vmem %s1434_s0, %s1191_s9  ;;  %s266_s28 = scalar_lea.vmem %s1435_s1, %s1191_s9 }
   0xe   : > { %336 = vmatpush.bf16.msra.mxu0 %v1012_v3  ;;  %v1000_v10 = vor.u32 %v1064_v8, %v999_v7  ;;  %v1001_v11 = vld [vmem:[%s1436_s2 + $0xc] sm:$0xf0]  ;;  %v1019_v13 = vld [vmem:[%s1436_s2 + $0x20] sm:$0xf]  ;;  %v1068_v14 = vld [vmem:[%s1436_s2 + $0x28] sm:$0xf0] }
   0xf   : > { %350 = vmatpush.bf16.msra.mxu1 %v1016_v6  ;;  %v1004_v12 = vor.u32 %v1063_v9, %v1001_v11  ;;  %v374_v15 = vld [vmem:[%s1439_s5] sm:$0xff]  ;;  %v1020_v16 = vor.u32 %v1068_v14, %v1019_v13  ;;  %v1007_v17 = vld [vmem:[%s1436_s2 + $0x8] sm:$0xf]  ;;  %v1065_v18 = vld [vmem:[%s1436_s2 + $0x10] sm:$0xf0]  ;;  %vm451_vm1 = vcmask 130048  }
  0x10   : > { %v273_v19 = vld [vmem:[%s261_s13] sm:$0xff]  ;;  %v274_v20 = vld [vmem:[%s261_s13 + $0x8] sm:$0xff]  ;;  %v1008_v21 = vor.u32 %v1065_v18, %v1007_v17  ;;  %vm905_vm4 = vcmask 523264   ;;  %vm902_vm5 = vcmask 392192   ;;  %vm908_vm6 = vcmask 654336  }
  0x11   : > { %364 = vmatpush.bf16.msra.mxu2 %v1020_v16  ;;  %v277_v22 = vpack.c.bf16 %v274_v20, %v273_v19  ;;  %v1205_v23 = vld [vmem:[%s1438_s4 + $0x8] sm:$0xff]  ;;  %v1214_v24 = vld [vmem:[%s1438_s4] sm:$0xff]  ;;  %vm911_vm7 = vcmask 785408   ;;  %vm914_vm8 = vcmask 916480  }
  0x12   : > { %337 = vmatpush.bf16.msra.mxu0 %v1000_v10  ;;  %v286_v28 = vld [vmem:[%s1437_s3] sm:$0x7] }
  0x13   : > { %351 = vmatpush.bf16.msra.mxu1 %v1004_v12  ;;  %v288_v29 = vperm.slane %v286_v28, 0  ;;  %v289_v38 = vperm.slane %v286_v28, 1  ;;  %v290_v46 = vperm.slane %v286_v28, 2 }
  0x14   : > { %427 = vrot.lane.b32.xlu0 %v374_v15, %s1095_s29  ;;  %523 = vrot.lane.b32.xlu1 %v374_v15, %s1096_s10 }
  0x15   : > { %1021 = vmatmul.msk.bf16.vlgmr.msra.gmra.mxu0 %vm326_vm0, %v277_v22  ;;  %497 = vrot.lane.b32.xlu2 %v374_v15, %s1097_s19 }
  0x16   : > { %1022 = vmatmul.msk.bf16.vlgmr.msra.gmra.mxu1 %vm326_vm0, %v277_v22  ;;  %365 = vmatpush.bf16.msra.mxu2 %v1008_v21 }
  0x19   : > { %1023 = vmatmul.msk.bf16.vlgmr.msra.gmra.mxu2 %vm326_vm0, %v277_v22 }
  0x1c   : > { %421 = vrot.lane.b32.xlu0 %v1205_v23, %s1098_s15  ;;  %399 = vrot.lane.b32.xlu1 %v374_v15, %s1099_s16 }
  0x1d   : > { %419 = vrot.lane.b32.xlu2 %v1214_v24, %s1098_s15 }
  0x24   : > { %517 = vrot.lane.b32.xlu0 %v1205_v23, %s1100_s20  ;;  %491 = vrot.lane.b32.xlu1 %v1205_v23, %s1101_s23 }
  0x25   : > { %401 = vrot.lane.b32.xlu2 %v375_v0, %s1099_s16 }
  0x2c   : > { %489 = vrot.lane.b32.xlu0 %v1214_v24, %s1101_s23 }
  0x2d   : > { %515 = vrot.lane.b32.xlu2 %v1214_v24, %s1100_s20 }
  0x67   : > { %v500_v25 = vpop.permute.xlu2 %499 }
  0x6f   : > { %v498_v27 = vpop.permute.xlu2 %497 }
  0x77   : > { %v420_v35 = vpop.permute.xlu2 %419 }
  0x7e   : > { %v430_v26 = vpop.permute.xlu0 %429  ;;  %v526_v30 = vpop.permute.xlu1 %525 }
  0x7f   : > { %v402_v54 = vpop.permute.xlu2 %401 }
  0x86   : > { %v428_v34 = vpop.permute.xlu0 %427  ;;  %v524_v43 = vpop.permute.xlu1 %523 }
  0x87   : > { %v516_v60 = vpop.permute.xlu2 %515 }
  0x8e   : > { %v400_v53 = vpop.permute.xlu1 %399  ;;  %v422_v59 = vpop.permute.xlu0 %421 }
  0x92   : > { %v339_v31 = vpop.f32.mrf.mxu0 }
  0x93   : > { %v353_v32 = vpop.f32.mrf.mxu1  ;;  %v1230_v33 = vadd.f32 %v339_v31, %v288_v29 }
  0x94   : > { %v1254_v51 = vadd.f32 %v353_v32, %v289_v38 }
  0x95   : > { %v433_v36 = vmul.f32 %v428_v34, %v1230_v33  ;;  %v425_v37 = vmul.f32 %v420_v35, %v1230_v33  ;;  %v529_v45 = vmul.f32 %v524_v43, %v1230_v33  ;;  %v503_v49 = vmul.f32 %v498_v27, %v1230_v33 }
  0x96   : > { %v405_v55 = vmul.f32 %v400_v53, %v1230_v33  ;;  %v518_v61 = vpop.permute.xlu0 %517  ;;  %v492_v1 = vpop.permute.xlu1 %491  ;;  %v521_v7 = vmul.f32 %v516_v60, %v1230_v33  ;;  %v395_v20 = vmul.f32 %v1214_v24, %v1230_v33 }
  0x97   : > { %437 = vrot.lane.b32.xlu0 %v433_v36, %s1099_s16 }
  0x9a   : > { %v341_v39 = vpop.f32.mrf.mxu0 }
  0x9b   : > { %v355_v40 = vpop.f32.mrf.mxu1  ;;  %v1235_v41 = vadd.f32 %v341_v39, %v288_v29 }
  0x9c   : > { %v1237_v42 = vadd.f32 %v355_v40, %v289_v38  ;;  %v367_v47 = vpop.f32.mrf.mxu2 }
  0x9d   : > { %v434_v44 = vmul.f32 %v430_v26, %v1235_v41  ;;  %v1245_v48 = vadd.f32 %v367_v47, %v290_v46  ;;  %v504_v50 = vmul.f32 %v500_v25, %v1235_v41  ;;  %v530_v52 = vmul.f32 %v526_v30, %v1235_v41 }
  0x9e   : > { %635 = vrot.lane.b32.xlu2 %v1237_v42, %s1095_s29  ;;  %v406_v56 = vmul.f32 %v402_v54, %v1235_v41  ;;  %v490_v0 = vpop.permute.xlu0 %489  ;;  %v496_v2 = vmul.f32 %v492_v1, %v1235_v41  ;;  %v426_v12 = vmul.f32 %v422_v59, %v1235_v41  ;;  %v522_v19 = vmul.f32 %v518_v61, %v1235_v41 }
  0x9f   : > { %439 = vrot.lane.b32.xlu1 %v434_v44, %s1099_s16  ;;  %533 = vrot.lane.b32.xlu0 %v529_v45, %s1099_s16  ;;  %v495_v11 = vmul.f32 %v490_v0, %v1230_v33  ;;  %v396_v36 = vmul.f32 %v1205_v23, %v1235_v41  ;;  %v1352_v44 = vld [vmem:[%s266_s28] sm:$0xff]  ;;  %v380_v0 = vlaneseq }
  0xa0   : > { %v376_v45 = vsub.f32 1.0, %v1352_v44 }
  0xa1   : > { %v381_v1 = vshrl.u32 %v380_v0, 7 }
  0xa4   : > { %v369_v57 = vpop.f32.mrf.mxu2 }
  0xa5   : > { %v1269_v58 = vadd.f32 %v369_v57, %v290_v46 }
  0xa6   : > { %678 = vrot.lane.b32.xlu2 %v1237_v42, %s1100_s20 }
  0xa7   : > { %507 = vrot.lane.b32.xlu1 %v503_v49, %s1099_s16  ;;  %592 = vrot.lane.b32.xlu0 %v1237_v42, %s1096_s10  ;;  %v1358_v49 = vmul.f32 1e+12, %v376_v45 }
  0xae   : > { %509 = vrot.lane.b32.xlu2 %v504_v50, %s1099_s16  ;;  %v1360_v50 = vld [vmem:[%s266_s28 + $0x8] sm:$0xff] }
  0xaf   : > { %535 = vrot.lane.b32.xlu1 %v530_v52, %s1099_s16  ;;  %590 = vrot.lane.b32.xlu0 %v1254_v51, %s1096_s10  ;;  %v377_v54 = vsub.f32 1.0, %v1360_v50 }
  0xb1   : > { %v1369_v57 = vmul.f32 1e+12, %v377_v54 }
  0xb7   : > { %411 = vrot.lane.b32.xlu0 %v406_v56, %s1099_s16  ;;  %409 = vrot.lane.b32.xlu1 %v405_v55, %s1099_s16 }
  0xbf   : > { %633 = vrot.lane.b32.xlu1 %v1254_v51, %s1095_s29 }
  0xc7   : > { %629 = vrot.lane.b32.xlu1 %v1254_v51, %s1097_s19 }
  0xcf   : > { %805 = vrot.lane.b32.xlu1 %v1269_v58, %s1095_s29 }
  0xd7   : > { %672 = vrot.lane.b32.xlu1 %v1254_v51, %s1099_s16 }
  0xf8   : > { %v636_v62 = vpop.permute.xlu2 %635 }
  0xf9   : > { %1038 = vmatpush.xpose.msk.msrb.mxu2 %vm451_vm1, %v636_v62 }
 0x100   : > { %v1276_v63 = vpop.permute.xlu2 %678 }
 0x108   : > { %v510_v3 = vpop.permute.xlu2 %509 }
 0x109   : > { %v514_v4 = vadd.f32 %v510_v3, %v496_v2  ;;  %v438_v5 = vpop.permute.xlu0 %437  ;;  %v384_v2 = vand.u32 127, %v380_v0  ;;  %v1102_v3 = vmov 0.0  }
 0x10a   : > { %v443_v6 = vadd.f32 %v438_v5, %v425_v37  ;;  %v382_v5 = vadd.s32 8, %v381_v1 }
 0x10b   : > { %545 = vrot.lane.b32.xlu1 %v514_v4, %s1097_s19  ;;  %vm385_vm2 = vcmp.gt.s32.totalorder %v381_v1, %v384_v2 }
 0x10c   : > { %447 = vrot.lane.b32.xlu0 %v443_v6, %s1096_s10  ;;  %v1024_v4 = vsel %vm385_vm2, 1.0, %v1102_v3  ;;  %vm386_vm3 = vcmp.gt.s32.totalorder %v382_v5, %v384_v2 }
 0x10d   : > { %v391_v6 = vmul.f32 1e+12, %v1024_v4 }
 0x111   : > { %v440_v8 = vpop.permute.xlu1 %439  ;;  %v534_v9 = vpop.permute.xlu0 %533 }
 0x112   : > { %v539_v10 = vadd.f32 %v534_v9, %v521_v7  ;;  %v444_v15 = vadd.f32 %v440_v8, %v426_v12  ;;  %v1379_v7 = vadd.f32 %v391_v6, %v1358_v49  ;;  %v1025_v9 = vsel %vm386_vm3, 1.0, %v1102_v3 }
 0x113   : > { %762 = vrot.lane.b32.xlu1 %v1269_v58, %s1096_s10  ;;  %v392_v12 = vmul.f32 1e+12, %v1025_v9 }
 0x114   : > { %549 = vrot.lane.b32.xlu2 %v539_v10, %s1095_s29  ;;  %631 = vrot.lane.b32.xlu0 %v1237_v42, %s1097_s19 }
 0x119   : > { %v508_v13 = vpop.permute.xlu1 %507  ;;  %v593_v14 = vpop.permute.xlu0 %592 }
 0x11a   : > { %v513_v16 = vadd.f32 %v508_v13, %v495_v11  ;;  %1034 = vmatpush.xpose.msk.msrb.mxu1 %vm451_vm1, %v593_v14 }
 0x11b   : > { %760 = vrot.lane.b32.xlu1 %v1245_v48, %s1096_s10 }
 0x11c   : > { %449 = vrot.lane.b32.xlu2 %v444_v15, %s1096_s10  ;;  %543 = vrot.lane.b32.xlu0 %v513_v16, %s1097_s19  ;;  %v394_v16 = vadd.f32 %v392_v12, %v1369_v57 }
 0x121   : > { %v536_v17 = vpop.permute.xlu1 %535  ;;  %v591_v18 = vpop.permute.xlu0 %590 }
 0x122   : > { %1035 = vmatpush.xpose.msk.msrb.mxu1 %vm451_vm1, %v591_v18  ;;  %v540_v22 = vadd.f32 %v536_v17, %v522_v19 }
 0x123   : > { %801 = vrot.lane.b32.xlu1 %v1269_v58, %s1097_s19 }
 0x124   : > { %676 = vrot.lane.b32.xlu2 %v1254_v51, %s1100_s20  ;;  %803 = vrot.lane.b32.xlu0 %v1245_v48, %s1095_s29 }
 0x125   : > { %1036 = vmatmul.msk.f32.vlgmr.msrb.gmra.mxu1 %vm451_vm1, %v1254_v51 }
 0x129   : > { %v410_v21 = vpop.permute.xlu1 %409  ;;  %v412_v30 = vpop.permute.xlu0 %411 }
 0x12a   : > { %v415_v25 = vadd.f32 %v410_v21, %v395_v20  ;;  %v416_v39 = vadd.f32 %v412_v30, %v396_v36 }
 0x12c   : > { %551 = vrot.lane.b32.xlu2 %v540_v22, %s1095_s29  ;;  %719 = vrot.lane.b32.xlu0 %v1254_v51, %s1098_s15 }
 0x12d   : > { %1037 = vmatmul.msk.f32.gmra.mxu1 %vm451_vm1, %v1237_v42 }
 0x131   : > { %v634_v26 = vpop.permute.xlu1 %633 }
 0x132   : > { %1039 = vmatpush.xpose.msk.msrb.mxu2 %vm451_vm1, %v634_v26 }
 0x134   : > { %721 = vrot.lane.b32.xlu2 %v1237_v42, %s1098_s15  ;;  %674 = vrot.lane.b32.xlu0 %v1237_v42, %s1099_s16 }
 0x139   : > { %v630_v24 = vpop.permute.xlu1 %629 }
 0x13a   : > { %1040 = vmatmul.msk.f32.vlgmr.msrb.gmra.mxu2 %vm451_vm1, %v630_v24 }
 0x13c   : > { %799 = vrot.lane.b32.xlu2 %v1245_v48, %s1097_s19 }
 0x141   : > { %v806_v27 = vpop.permute.xlu1 %805 }
 0x142   : > { %1054 = vmatpush.xpose.msk.msra.mxu2 %vm451_vm1, %v806_v27 }
 0x144   : > { %715 = vrot.lane.b32.xlu2 %v1254_v51, %s1101_s23 }
 0x149   : > { %v673_v29 = vpop.permute.xlu1 %672 }
 0x14c   : > { %717 = vrot.lane.b32.xlu2 %v1237_v42, %s1101_s23 }
 0x16e   : > { %v550_v28 = vpop.permute.xlu2 %549 }
 0x176   : > { %v450_v31 = vpop.permute.xlu2 %449 }
 0x177   : > { %1026 = vmatpush.xpose.msk.msra.mxu3 %vm451_vm1, %v450_v31 }
 0x17d   : > { %v546_v32 = vpop.permute.xlu1 %545 }
 0x17e   : > { %v677_v33 = vpop.permute.xlu2 %676  ;;  %v448_v34 = vpop.permute.xlu0 %447 }
 0x17f   : > { %1027 = vmatpush.xpose.msk.msra.mxu3 %vm451_vm1, %v448_v34 }
 0x182   : > { %1028 = vmatmul.msk.f32.vlgmr.msra.gmra.mxu3 %vm451_vm1, %v415_v25 }
 0x185   : > { %v763_v35 = vpop.permute.xlu1 %762 }
 0x186   : > { %1050 = vmatpush.xpose.msk.msra.mxu1 %vm451_vm1, %v763_v35  ;;  %v552_v37 = vpop.permute.xlu2 %551  ;;  %v632_v38 = vpop.permute.xlu0 %631 }
 0x187   : > { %1030 = vmatpush.xpose.msk.msrb.mxu0 %vm451_vm1, %v552_v37  ;;  %1069 = vmatpush.xpose.msk.msrb.mxu3 %vm451_vm1, %v552_v37 }
 0x188   : > { %1041 = vmatmul.msk.f32.gmra.mxu2 %vm451_vm1, %v632_v38 }
 0x18a   : > { %1029 = vmatmul.msk.f32.gmra.mxu3 %vm451_vm1, %v416_v39 }
 0x18b   : > { %1031 = vmatpush.xpose.msk.msrb.mxu0 %vm451_vm1, %v550_v28  ;;  %1070 = vmatpush.xpose.msk.msrb.mxu3 %vm451_vm1, %v550_v28 }
 0x18d   : > { %v761_v40 = vpop.permute.xlu1 %760 }
 0x18e   : > { %1051 = vmatpush.xpose.msk.msra.mxu1 %vm451_vm1, %v761_v40  ;;  %v722_v23 = vpop.permute.xlu2 %721  ;;  %v544_v41 = vpop.permute.xlu0 %543 }
 0x18f   : > { %1042 = vmatpush.xpose.msk.msra.mxu3 %vm451_vm1, %v1276_v63  ;;  %1032 = vmatmul.msk.f32.vlgmr.msrb.gmra.mxu0 %vm451_vm1, %v544_v41 }
 0x190   : > { %1046 = vmatpush.xpose.msk.msra.mxu0 %vm451_vm1, %v722_v23 }
 0x191   : > { %1052 = vmatmul.msk.f32.vlgmr.msra.gmra.mxu1 %vm451_vm1, %v1245_v48 }
 0x192   : > { %1033 = vmatmul.msk.f32.vlgmr.msrb.gmra.mxu3 %vm451_vm1, %v546_v32 }
 0x193   : > { %1043 = vmatpush.xpose.msk.msra.mxu3 %vm451_vm1, %v677_v33 }
 0x195   : > { %v802_v48 = vpop.permute.xlu1 %801 }
 0x196   : > { %v800_v42 = vpop.permute.xlu2 %799  ;;  %v804_v43 = vpop.permute.xlu0 %803 }
 0x197   : > { %1055 = vmatpush.xpose.msk.msra.mxu2 %vm451_vm1, %v804_v43 }
 0x199   : > { %1053 = vmatmul.msk.f32.gmra.mxu1 %vm451_vm1, %v1269_v58 }
 0x19a   : > { %1044 = vmatmul.msk.f32.vlgmr.msra.gmra.mxu3 %vm451_vm1, %v673_v29  ;;  %1056 = vmatmul.msk.f32.vlgmr.msra.gmra.mxu2 %vm451_vm1, %v800_v42 }
 0x19e   : > { %v720_v46 = vpop.permute.xlu0 %719  ;;  %v716_v47 = vpop.permute.xlu2 %715 }
 0x19f   : > { %1047 = vmatpush.xpose.msk.msra.mxu0 %vm451_vm1, %v720_v46 }
 0x1a2   : > { %v619_v51 = vpop.f32.mrf.mxu1  ;;  %1048 = vmatmul.msk.f32.vlgmr.msra.gmra.mxu0 %vm451_vm1, %v716_v47  ;;  %1057 = vmatmul.msk.f32.gmra.mxu2 %vm451_vm1, %v802_v48 }
 0x1a3   : > { %v625_v52 = vmul.f32 %v619_v51, %v1352_v44 }
 0x1a5   : > { %v627_v53 = vsub.f32 %v625_v52, %v1358_v49 }
 0x1a6   : > { %v675_v55 = vpop.permute.xlu0 %674  ;;  %v718_v56 = vpop.permute.xlu2 %717 }
 0x1a7   : > { %852 = vrot.lane.b32.xlu2 %v627_v53, %s1101_s23  ;;  %1045 = vmatmul.msk.f32.gmra.mxu3 %vm451_vm1, %v675_v55 }
 0x1aa   : > { %v622_v58 = vpop.f32.mrf.mxu1  ;;  %1049 = vmatmul.msk.f32.gmra.mxu0 %vm451_vm1, %v718_v56 }
 0x1ab   : > { %v626_v59 = vmul.f32 %v622_v58, %v1360_v50 }
 0x1ad   : > { %v628_v60 = vsub.f32 %v626_v59, %v1369_v57 }
 0x1af   : > { %854 = vrot.lane.b32.xlu0 %v628_v60, %s1101_s23 }
 0x1bd   : > { %v662_v61 = vpop.f32.mrf.mxu2 }
 0x1be   : > { %v668_v62 = vmul.f32 %v662_v61, %v1352_v44 }
 0x1c0   : > { %v670_v63 = vsub.f32 %v668_v62, %v1358_v49 }
 0x1c2   : > { %860 = vrot.lane.b32.xlu1 %v670_v63, %s1100_s20 }
 0x201   : > { %v853_v54 = vpop.permute.xlu2 %852 }
 0x205   : > { %v479_v8 = vpop.f32.mrf.mxu3 }
 0x206   : > { %v1382_v10 = vmul.f32 %v479_v8, %v1352_v44 }
 0x208   : > { %v487_v11 = vsub.f32 %v1382_v10, %v1379_v7 }
 0x20b   : > { %v665_v13 = vpop.f32.mrf.mxu2 }
 0x20c   : > { %v669_v14 = vmul.f32 %v665_v13, %v1360_v50  ;;  %v578_v15 = vpop.f32.mrf.mxu0 }
 0x20d   : > { %v584_v17 = vmul.f32 %v578_v15, %v1352_v44  ;;  %v482_v18 = vpop.f32.mrf.mxu3 }
 0x20e   : > { %v671_v19 = vsub.f32 %v669_v14, %v1369_v57  ;;  %v486_v20 = vmul.f32 %v482_v18, %v1360_v50  ;;  %v789_v21 = vpop.f32.mrf.mxu1 }
 0x20f   : > { %v586_v22 = vsub.f32 %v584_v17, %v1379_v7  ;;  %v795_v25 = vmul.f32 %v789_v21, %v1352_v44 }
 0x210   : > { %v488_v26 = vsub.f32 %v486_v20, %v394_v16  ;;  %862 = vrot.lane.b32.xlu2 %v671_v19, %s1100_s20 }
 0x211   : > { %v797_v24 = vsub.f32 %v795_v25, %v1358_v49  ;;  %844 = vrot.lane.b32.xlu0 %v586_v22, %s1098_s15 }
 0x213   : > { %884 = vrot.lane.b32.xlu1 %v797_v24, %s1097_s19 }
 0x215   : > { %v581_v27 = vpop.f32.mrf.mxu3 }
 0x216   : > { %v585_v28 = vmul.f32 %v581_v27, %v1360_v50  ;;  %v792_v34 = vpop.f32.mrf.mxu1 }
 0x217   : > { %v796_v36 = vmul.f32 %v792_v34, %v1360_v50 }
 0x218   : > { %v587_v29 = vsub.f32 %v585_v28, %v394_v16 }
 0x219   : > { %v798_v39 = vsub.f32 %v796_v36, %v1369_v57 }
 0x21b   : > { %846 = vrot.lane.b32.xlu1 %v587_v29, %s1098_s15 }
 0x21d   : > { %v705_v32 = vpop.f32.mrf.mxu3  ;;  %v832_v35 = vpop.f32.mrf.mxu2 }
 0x21e   : > { %v711_v43 = vmul.f32 %v705_v32, %v1352_v44  ;;  %v838_v51 = vmul.f32 %v832_v35, %v1352_v44 }
 0x21f   : > { %v748_v30 = vpop.f32.mrf.mxu0 }
 0x220   : > { %v754_v31 = vmul.f32 %v748_v30, %v1352_v44  ;;  %v713_v47 = vsub.f32 %v711_v43, %v1358_v49  ;;  %v840_v52 = vsub.f32 %v838_v51, %v1358_v49 }
 0x221   : > { %v855_v55 = vpop.permute.xlu0 %854 }
 0x222   : > { %v756_v33 = vsub.f32 %v754_v31, %v1358_v49 }
 0x224   : > { %876 = vrot.lane.b32.xlu2 %v756_v33, %s1095_s29 }
 0x225   : > { %v835_v45 = vpop.f32.mrf.mxu2 }
 0x226   : > { %v839_v46 = vmul.f32 %v835_v45, %v1360_v50 }
 0x227   : > { %v751_v37 = vpop.f32.mrf.mxu0 }
 0x228   : > { %v755_v38 = vmul.f32 %v751_v37, %v1360_v50  ;;  %v841_v48 = vsub.f32 %v839_v46, %v1369_v57 }
 0x22a   : > { %v757_v40 = vsub.f32 %v755_v38, %v1369_v57  ;;  %v708_v23 = vpop.f32.mrf.mxu3 }
 0x22b   : > { %v712_v41 = vmul.f32 %v708_v23, %v1360_v50 }
 0x22c   : > { %878 = vrot.lane.b32.xlu0 %v757_v40, %s1095_s29  ;;  %886 = vrot.lane.b32.xlu2 %v798_v39, %s1097_s19  ;;  %s271_s19 = scalar_lea.vmem %s1440_s6, %s1191_s9 }
 0x22d   : > { %v714_v42 = vsub.f32 %v712_v41, %v1369_v57 }
 0x22f   : > { %870 = vrot.lane.b32.xlu1 %v714_v42, %s1099_s16 }
 0x234   : > { %868 = vrot.lane.b32.xlu0 %v713_v47, %s1099_s16  ;;  %v861_v53 = vpop.permute.xlu1 %860 }
 0x237   : > { %894 = vrot.lane.b32.xlu1 %v841_v48, %s1096_s10 }
 0x23c   : > { %892 = vrot.lane.b32.xlu0 %v840_v52, %s1096_s10 }
 0x26a   : > { %v863_v58 = vpop.permute.xlu2 %862 }
 0x27e   : > { %v877_v61 = vpop.permute.xlu2 %876 }
 0x283   : > { %v845_v50 = vpop.permute.xlu0 %844 }
 0x284   : > { %v898_v44 = vsel %vm451_vm1, %v487_v11, %v845_v50 }
 0x285   : > { %v885_v56 = vpop.permute.xlu1 %884  ;;  %v900_v1 = vsel %vm326_vm0, %v898_v44, %v853_v54 }
 0x286   : > { %v903_v4 = vsel %vm902_vm5, %v900_v1, %v861_v53  ;;  %v887_v5 = vpop.permute.xlu2 %886 }
 0x28d   : > { %v847_v59 = vpop.permute.xlu1 %846 }
 0x28e   : > { %v899_v60 = vsel %vm451_vm1, %v488_v26, %v847_v59 }
 0x28f   : > { %v901_v57 = vsel %vm326_vm0, %v899_v60, %v855_v55 }
 0x290   : > { %v904_v63 = vsel %vm902_vm5, %v901_v57, %v863_v58 }
 0x29e   : > { %v879_v62 = vpop.permute.xlu0 %878 }
 0x2a1   : > { %v871_v49 = vpop.permute.xlu1 %870 }
 0x2a2   : > { %v907_v0 = vsel %vm905_vm4, %v904_v63, %v871_v49 }
 0x2a3   : > { %v910_v2 = vsel %vm908_vm6, %v907_v0, %v879_v62 }
 0x2a4   : > { %v913_v8 = vsel %vm911_vm7, %v910_v2, %v887_v5 }
 0x2a6   : > { %v869_v3 = vpop.permute.xlu0 %868 }
 0x2a7   : > { %v906_v6 = vsel %vm905_vm4, %v903_v4, %v869_v3 }
 0x2a8   : > { %v909_v10 = vsel %vm908_vm6, %v906_v6, %v877_v61 }
 0x2a9   : > { %v895_v7 = vpop.permute.xlu1 %894  ;;  %v912_v11 = vsel %vm911_vm7, %v909_v10, %v885_v56 }
 0x2aa   : > { %v916_v9 = vsel %vm914_vm8, %v913_v8, %v895_v7 }
 0x2ab   : > { %918 = vst [vmem:[%s271_s19 + $0x8] sm:$0xff] %v916_v9 }
 0x2ae   : > { %v893_v12 = vpop.permute.xlu0 %892 }
 0x2af   : > { %v915_v13 = vsel %vm914_vm8, %v912_v11, %v893_v12 }
 0x2b0   : > { %917 = vst [vmem:[%s271_s19] sm:$0xff] %v915_v13 }
 0x2b1 PF: > { %s16_s21 = sadd.s32 1, %s1093_s21  }
 0x2b2   : > { %p13_p4 = scmp.ge.s32.totalorder %s16_s21, 4  }
 0x2b4   :  { %15 = sbr.rel (!%p13_p4) target bundleno = 1 (0x1), region = 77 }

// kernel: erenet_forward.2
= control target key start
LH: loop header
LB: loop body
LE: loop exit
PB: predicated region body
PF: predicated region fallthrough
CT: control target
= control target key end

     0   :  { %s2712_s29 = smov 0   ;;  %s3239_s0 = inlined_call_operand.vmem [shape: f32[2,16,32], index: 0, kind: input, shape index: {}]   ;;  %s3240_s1 = inlined_call_operand.vmem [shape: f32[2,1,16], index: 1, kind: input, shape index: {}]   ;;  %s3241_s2 = inlined_call_operand.vmem [shape: bf16[2,32,96], index: 2, kind: input, shape index: {}]   ;;  %s3242_s3 = inlined_call_operand.vmem [shape: f32[2,1,96], index: 3, kind: input, shape index: {}]   ;;  %s3243_s4 = inlined_call_operand.vmem [shape: bf16[2,32,32], index: 4, kind: input, shape index: {}]   ;;  %s3244_s5 = inlined_call_operand.vmem [shape: f32[2,1,32], index: 5, kind: input, shape index: {}]   ;;  %s3245_s6 = inlined_call_operand.vmem [shape: f32[2,1,32], index: 6, kind: input, shape index: {}]   ;;  %s3246_s7 = inlined_call_operand.vmem [shape: f32[2,1,32], index: 7, kind: input, shape index: {}]   ;;  %s3247_s8 = inlined_call_operand.vmem [shape: bf16[2,32,64], index: 8, kind: input, shape index: {}]   ;;  %s3248_s9 = inlined_call_operand.vmem [shape: f32[2,1,64], index: 9, kind: input, shape index: {}]   ;;  %s3249_s10 = inlined_call_operand.vmem [shape: bf16[2,64,32], index: 10, kind: input, shape index: {}]   ;;  %s3250_s11 = inlined_call_operand.vmem [shape: f32[2,1,32], index: 11, kind: input, shape index: {}]   ;;  %s3251_s12 = inlined_call_operand.vmem [shape: f32[2,1,32], index: 12, kind: input, shape index: {}]   ;;  %s3252_s13 = inlined_call_operand.vmem [shape: f32[2,1,32], index: 13, kind: input, shape index: {}]   ;;  %s3253_s14 = inlined_call_operand.vmem [shape: f32[2,16,32], index: 14, kind: output, shape index: {}]  }
   0x1 LB: > { %s2217_s30 = sadd.s32 4294967295, %s2620_s29   ;;  %p2221_p0 = scmp.ge.s32.totalorder %s2620_s29, 1  ;;  %s2620_s29 = sphi %s2712_s29, %s24_s29  }
   0x2   : > { %p420_p1 = scmp.lt.s32.totalorder %s2620_s29, 3 }
   0x4   : > { %p421_p2 = pnand %p2221_p0, %p420_p1 }
   0x5   : > { %p469_p3 = scmp.lt.s32.totalorder (!%p421_p2), %s2217_s30, 1  ;;  %s2622_s25 = smov (!%p421_p2), 120  }
   0x6   : > { %424 = sbr.rel (%p421_p2) target bundleno = 3888 (0xf30), region = 76  ;;  %s2623_s26 = smov (!%p421_p2), 88  }
   0x7   : > { %s2624_s27 = smov (!%p421_p2), 96   ;;  %s3262_s28 = smov (!%p421_p2), 104  }
   0x8   : > { %s2626_s15 = smov (!%p421_p2), 72   ;;  %s2627_s16 = smov (!%p421_p2), 80  }
   0x9   : > { %s3264_s17 = smov (!%p421_p2), 112   ;;  %s3258_s23 = smov (!%p421_p2), 64  }
   0xa   : > { %s3255_s24 = smov (!%p421_p2), 48   ;;  %s3256_s18 = smov (!%p421_p2), 40  }
   0xb   : > { %v2396_v0 = vld [vmem:[%s3241_s2 + $0x8] sm:$0xff]  ;;  %v2395_v1 = vld [vmem:[%s3241_s2] sm:$0xff]  ;;  %s3281_s30 = smov (!%p469_p3, %s2217_s30), 1  ;;  %vm512_vm0 = vcmask 261120   ;;  %vm536_vm1 = vcmask 64512   ;;  %vm568_vm2 = vcmask 130048  }
   0xc   : > { %522 = vmatpush.bf16.msra.mxu0 %v2396_v0  ;;  %s3254_s19 = sshll.u32 %s3281_s30, 4  ;;  %v2508_v5 = vld [vmem:[%s3242_s3] ss:$0 sm:$0xff]  ;;  %s476_s21 = scalar_lea.vmem %s3240_s1, %s3281_s30 }
   0xd   : > { %s473_s22 = scalar_lea.vmem %s3239_s0, %s3254_s19  ;;  %v485_v24 = vld [vmem:[%s476_s21] sm:$0x1]  ;;  %s3261_s20 = smov 8  }
   0xe   : > { %v2734_v2 = vld [vmem:[%s473_s22] sm:$0xff]  ;;  %v2736_v3 = vld [vmem:[%s473_s22 + $0x8] sm:$0xff]  ;;  %v2226_v25 = vadd.f32 -1.0, %v485_v24  ;;  %s3257_s22 = smov 56   ;;  %s3259_s21 = smov 16  }
   0xf   : > { %v491_v4 = vpack.c.bf16 %v2736_v3, %v2734_v2  ;;  %s3260_s19 = smov 24  }
  0x10   : > { %523 = vmatpush.bf16.msra.mxu0 %v2395_v1  ;;  %v487_v26 = vmul.f32 10000.0, %v2226_v25 }
  0x12   : > { %v2798_v27 = vperm.slane %v487_v26, 0 }
  0x13   : > { %2235 = vmatmul.msk.bf16.vlgmr.msra.gmra.mxu0 %vm512_vm0, %v491_v4 }
  0x90   : > { %v525_v6 = vpop.f32.mrf.mxu0 }
  0x91   : > { %v2744_v7 = vadd.f32 %v2508_v5, %v525_v6 }
  0x93   : > { %652 = vrot.lane.b32.xlu2 %v2744_v7, %s2622_s25 }
  0x98   : > { %v527_v8 = vpop.f32.mrf.mxu0 }
  0x99   : > { %v2748_v9 = vadd.f32 %v2508_v5, %v527_v8 }
  0x9b   : > { %658 = vrot.lane.b32.xlu1 %v2748_v9, %s2623_s26  ;;  %534 = vrot.lane.b32.xlu0 %v2748_v9, %s2624_s27  ;;  %v2821_v52 = vpack.i.bf16 %v2744_v7, %v2748_v9 }
  0x9c   : > { %654 = vrot.lane.b32.xlu2 %v2748_v9, %s2622_s25 }
  0xa3   : > { %656 = vrot.lane.b32.xlu1 %v2744_v7, %s2623_s26  ;;  %532 = vrot.lane.b32.xlu0 %v2744_v7, %s2624_s27 }
  0xa4   : > { %896 = vrot.lane.b32.xlu2 %v2744_v7, %s3262_s28 }
  0xab   : > { %900 = vrot.lane.b32.xlu1 %v2744_v7, %s2626_s15  ;;  %902 = vrot.lane.b32.xlu0 %v2748_v9, %s2626_s15 }
  0xac   : > { %898 = vrot.lane.b32.xlu2 %v2748_v9, %s3262_s28 }
  0xb3   : > { %778 = vrot.lane.b32.xlu1 %v2744_v7, %s2627_s16  ;;  %780 = vrot.lane.b32.xlu0 %v2748_v9, %s2627_s16 }
  0xbb   : > { %776 = vrot.lane.b32.xlu1 %v2748_v9, %s3264_s17  ;;  %774 = vrot.lane.b32.xlu0 %v2744_v7, %s3264_s17 }
  0xed   : > { %v653_v12 = vpop.permute.xlu2 %652 }
  0xf6   : > { %v655_v15 = vpop.permute.xlu2 %654 }
  0xfe   : > { %v897_v19 = vpop.permute.xlu2 %896 }
 0x106   : > { %v899_v22 = vpop.permute.xlu2 %898 }
 0x10d   : > { %v659_v10 = vpop.permute.xlu1 %658  ;;  %v535_v11 = vpop.permute.xlu0 %534 }
 0x10e   : > { %2236 = vmatpush.xpose.msk.msra.mxu1 %vm536_vm1, %v535_v11  ;;  %2242 = vmatpush.xpose.msk.msra.mxu3 %vm536_vm1, %v659_v10 }
 0x115   : > { %v657_v13 = vpop.permute.xlu1 %656  ;;  %v533_v14 = vpop.permute.xlu0 %532 }
 0x116   : > { %2237 = vmatpush.xpose.msk.msra.mxu1 %vm536_vm1, %v533_v14  ;;  %2243 = vmatpush.xpose.msk.msra.mxu3 %vm536_vm1, %v657_v13 }
 0x119   : > { %2238 = vmatmul.msk.f32.vlgmr.msra.gmra.mxu1 %vm536_vm1, %v2744_v7  ;;  %2244 = vmatmul.msk.f32.vlgmr.msra.gmra.mxu3 %vm536_vm1, %v653_v12 }
 0x11d   : > { %v903_v16 = vpop.permute.xlu0 %902  ;;  %v901_v17 = vpop.permute.xlu1 %900 }
 0x11e   : > { %2254 = vmatpush.xpose.msk.msrb.mxu3 %vm536_vm1, %v903_v16 }
 0x121   : > { %2239 = vmatmul.msk.f32.gmra.mxu1 %vm536_vm1, %v2748_v9  ;;  %2245 = vmatmul.msk.f32.gmra.mxu3 %vm536_vm1, %v655_v15 }
 0x122   : > { %2255 = vmatpush.xpose.msk.msrb.mxu3 %vm536_vm1, %v901_v17 }
 0x125   : > { %v781_v18 = vpop.permute.xlu0 %780  ;;  %v779_v20 = vpop.permute.xlu1 %778 }
 0x126   : > { %2248 = vmatpush.xpose.msk.msrb.mxu0 %vm536_vm1, %v781_v18 }
 0x129   : > { %2256 = vmatmul.msk.f32.vlgmr.msrb.gmra.mxu3 %vm536_vm1, %v897_v19 }
 0x12a   : > { %2249 = vmatpush.xpose.msk.msrb.mxu0 %vm536_vm1, %v779_v20 }
 0x12d   : > { %v775_v21 = vpop.permute.xlu0 %774  ;;  %v777_v23 = vpop.permute.xlu1 %776 }
 0x12e   : > { %2250 = vmatmul.msk.f32.vlgmr.msrb.gmra.mxu0 %vm536_vm1, %v775_v21 }
 0x131   : > { %2257 = vmatmul.msk.f32.gmra.mxu3 %vm536_vm1, %v899_v22 }
 0x136   : > { %2251 = vmatmul.msk.f32.gmra.mxu0 %vm536_vm1, %v777_v23 }
 0x196   : > { %v562_v28 = vpop.f32.mrf.mxu1 }
 0x197   : > { %v563_v29 = vadd.f32 %v562_v28, %v2798_v27 }
 0x199   : > { %v569_v30 = vsel %vm568_vm2, %v563_v29, -inf }
 0x19a   : > { %570 = vmax.xlane.f32.xlu2 %v569_v30 }
 0x19c   : > { %v685_v31 = vpop.f32.mrf.mxu3 }
 0x19d   : > { %v686_v32 = vadd.f32 %v685_v31, %v2798_v27 }
 0x19e   : > { %v565_v33 = vpop.f32.mrf.mxu1 }
 0x19f   : > { %v566_v34 = vadd.f32 %v565_v33, %v2798_v27  ;;  %v691_v35 = vsel %vm568_vm2, %v686_v32, -inf }
 0x1a0   : > { %692 = vmax.xlane.f32.xlu1 %v691_v35 }
 0x1a1   : > { %v572_v36 = vsel %vm568_vm2, %v566_v34, -inf }
 0x1a2   : > { %573 = vmax.xlane.f32.xlu0 %v572_v36 }
 0x1a4   : > { %v688_v37 = vpop.f32.mrf.mxu3 }
 0x1a5   : > { %v689_v48 = vadd.f32 %v688_v37, %v2798_v27 }
 0x1a7   : > { %v694_v49 = vsel %vm568_vm2, %v689_v48, -inf }
 0x1ab   : > { %v807_v38 = vpop.f32.mrf.mxu0 }
 0x1ac   : > { %v808_v39 = vadd.f32 %v807_v38, %v2798_v27  ;;  %v929_v40 = vpop.f32.mrf.mxu3 }
 0x1ad   : > { %v930_v50 = vadd.f32 %v929_v40, %v2798_v27 }
 0x1ae   : > { %v813_v41 = vsel %vm568_vm2, %v808_v39, -inf }
 0x1af   : > { %814 = vmax.xlane.f32.xlu0 %v813_v41  ;;  %v935_v51 = vsel %vm568_vm2, %v930_v50, -inf }
 0x1b3   : > { %v810_v42 = vpop.f32.mrf.mxu0 }
 0x1b4   : > { %v811_v43 = vadd.f32 %v810_v42, %v2798_v27  ;;  %v932_v44 = vpop.f32.mrf.mxu3 }
 0x1b5   : > { %v2810_v45 = vadd.f32 %v932_v44, %v2798_v27 }
 0x1b6   : > { %v816_v46 = vsel %vm568_vm2, %v811_v43, -inf }
 0x1b7   : > { %817 = vmax.xlane.f32.xlu2 %v816_v46  ;;  %v938_v47 = vsel %vm568_vm2, %v2810_v45, -inf }
 0x1b8   : > { %939 = vmax.xlane.f32.xlu1 %v938_v47 }
 0x1bf   : > { %695 = vmax.xlane.f32.xlu2 %v694_v49 }
 0x1c7   : > { %936 = vmax.xlane.f32.xlu2 %v935_v51 }
 0x1d1   : > { %2444 = vrot.lane.b32.xlu1 %v2821_v52, %s3257_s22  ;;  %s3278_s22 = smov 16  }
 0x20d   : > { %v571_v53 = vpop.xlane.xlu2 %570 }
 0x20e   : > { %v575_v54 = vsub.f32 %v563_v29, %v571_v53 }
 0x210   : > { %v577_v55 = vmul.f32 1.442695, %v575_v54 }
 0x212   : > { %2524 = vpow2.f32 %v577_v55 }
 0x213   : > { %v693_v63 = vpop.xlane.xlu1 %692 }
 0x214   : > { %v697_v4 = vsub.f32 %v686_v32, %v693_v63 }
 0x215   : > { %v574_v56 = vpop.xlane.xlu0 %573 }
 0x216   : > { %v576_v57 = vsub.f32 %v566_v34, %v574_v56  ;;  %v699_v6 = vmul.f32 1.442695, %v697_v4 }
 0x218   : > { %v2825_v58 = vpop.eup %2524  ;;  %v579_v59 = vmul.f32 1.442695, %v576_v57 }
 0x219   : > { %v581_v60 = vsel %vm568_vm2, %v2825_v58, 0.0 }
 0x21a   : > { %2526 = vpow2.f32 %v579_v59  ;;  %582 = vadd.xlane.f32.xlu0 %v581_v60 }
 0x220   : > { %v2829_v61 = vpop.eup %2526 }
 0x221   : > { %v584_v62 = vsel %vm568_vm2, %v2829_v61, 0.0 }
 0x222   : > { %585 = vadd.xlane.f32.xlu1 %v584_v62  ;;  %v815_v0 = vpop.xlane.xlu0 %814 }
 0x223   : > { %v819_v1 = vsub.f32 %v808_v39, %v815_v0 }
 0x225   : > { %v821_v5 = vmul.f32 1.442695, %v819_v1 }
 0x227   : > { %2528 = vpow2.f32 %v821_v5 }
 0x228   : > { %2530 = vpow2.f32 %v699_v6 }
 0x22a   : > { %v818_v7 = vpop.xlane.xlu2 %817 }
 0x22b   : > { %v820_v18 = vsub.f32 %v811_v43, %v818_v7  ;;  %v940_v22 = vpop.xlane.xlu1 %939 }
 0x22c   : > { %v942_v24 = vsub.f32 %v2810_v45, %v940_v22 }
 0x22d   : > { %v2833_v8 = vpop.eup %2528  ;;  %v823_v21 = vmul.f32 1.442695, %v820_v18 }
 0x22e   : > { %2439 = vrot.lane.b32.xlu0 %v2821_v52, %s3258_s23  ;;  %v825_v9 = vsel %vm568_vm2, %v2833_v8, 0.0  ;;  %v2839_v11 = vpop.eup %2530  ;;  %v945_v26 = vmul.f32 1.442695, %v942_v24 }
 0x22f   : > { %826 = vadd.xlane.f32.xlu2 %v825_v9  ;;  %v703_v14 = vsel %vm568_vm2, %v2839_v11, 0.0 }
 0x232   : > { %v696_v10 = vpop.xlane.xlu2 %695 }
 0x233   : > { %v698_v12 = vsub.f32 %v689_v48, %v696_v10 }
 0x235   : > { %v701_v13 = vmul.f32 1.442695, %v698_v12 }
 0x237   : > { %2532 = vpow2.f32 %v701_v13  ;;  %704 = vadd.xlane.f32.xlu2 %v703_v14 }
 0x23a   : > { %v937_v15 = vpop.xlane.xlu2 %936 }
 0x23b   : > { %v941_v16 = vsub.f32 %v930_v50, %v937_v15 }
 0x23d   : > { %v2843_v17 = vpop.eup %2532  ;;  %v943_v19 = vmul.f32 1.442695, %v941_v16 }
 0x23e   : > { %v706_v20 = vsel %vm568_vm2, %v2843_v17, 0.0 }
 0x23f   : > { %2534 = vpow2.f32 %v943_v19  ;;  %707 = vadd.xlane.f32.xlu1 %v706_v20 }
 0x240   : > { %2536 = vpow2.f32 %v823_v21 }
 0x241   : > { %2538 = vpow2.f32 %v945_v26 }
 0x243   : > { %v2445_v32 = vpop.permute.xlu1 %2444 }
 0x244   : > { %v2446_v57 = vunpack.i.l.bf16 %v2445_v32  ;;  %v2447_v62 = vunpack.i.h.bf16 %v2445_v32 }
 0x245   : > { %v2847_v23 = vpop.eup %2534 }
 0x246   : > { %v947_v25 = vsel %vm568_vm2, %v2847_v23, 0.0  ;;  %v2852_v28 = vpop.eup %2536 }
 0x247   : > { %948 = vadd.xlane.f32.xlu2 %v947_v25  ;;  %v828_v29 = vsel %vm568_vm2, %v2852_v28, 0.0  ;;  %v2856_v30 = vpop.eup %2538 }
 0x248   : > { %v950_v31 = vsel %vm568_vm2, %v2856_v30, 0.0 }
 0x24f   : > { %829 = vadd.xlane.f32.xlu2 %v828_v29 }
 0x258   : > { %951 = vadd.xlane.f32.xlu0 %v950_v31  ;;  %2454 = vrot.lane.b32.xlu1 %v2821_v52, %s3255_s24  ;;  %s3276_s24 = smov 8  }
 0x267   : > { %2449 = vrot.lane.b32.xlu2 %v2821_v52, %s3256_s18  ;;  %s3277_s18 = smov 24  }
 0x28d   : > { %v583_v33 = vpop.xlane.xlu0 %582 }
 0x28e   : > { %2540 = vrcp.f32 %v583_v33  ;;  %v598_v39 = vand.u32 2147483648, %v583_v33  ;;  %vm592_vm4 = vweird.f32 %v583_v33  ;;  %v596_v42 = vand.u32 2147483647, %v583_v33 }
 0x290   : > { %v599_v45 = vor.u32 1.1754944e-38, %v598_v39  ;;  %vm597_vm6 = vcmp.eq.f32.partialorder %v596_v42, 8.507059e+37 }
 0x294   : > { %v2541_v34 = vpop.eup %2540 }
 0x295   : > { %v588_v35 = vmul.f32 %v2541_v34, %v583_v33  ;;  %v586_v36 = vpop.xlane.xlu1 %585  ;;  %vm593_vm3 = vweird.f32 %v2541_v34 }
 0x296   : > { %2542 = vrcp.f32 %v586_v36  ;;  %vm594_vm5 = vmor %vm592_vm4, %vm593_vm3  ;;  %v613_v52 = vand.u32 2147483648, %v586_v36  ;;  %vm607_vm8 = vweird.f32 %v586_v36  ;;  %v611_v56 = vand.u32 2147483647, %v586_v36 }
 0x297   : > { %v589_v37 = vsub.f32 1.0, %v588_v35 }
 0x298   : > { %v614_v60 = vor.u32 1.1754944e-38, %v613_v52  ;;  %vm612_vm10 = vcmp.eq.f32.partialorder %v611_v56, 8.507059e+37 }
 0x299   : > { %v590_v38 = vmul.f32 %v2541_v34, %v589_v37 }
 0x29b   : > { %v591_v40 = vadd.f32 %v2541_v34, %v590_v38 }
 0x29c   : > { %v2543_v41 = vpop.eup %2542 }
 0x29d   : > { %v603_v43 = vmul.f32 %v2543_v41, %v586_v36  ;;  %v595_v44 = vsel %vm594_vm5, %v2541_v34, %v591_v40  ;;  %vm608_vm7 = vweird.f32 %v2543_v41 }
 0x29e   : > { %v600_v50 = vsel %vm597_vm6, %v599_v45, %v595_v44  ;;  %vm609_vm9 = vmor %vm607_vm8, %vm608_vm7 }
 0x29f   : > { %v604_v46 = vsub.f32 1.0, %v603_v43  ;;  %v601_v54 = vmul.f32 %v2825_v58, %v600_v50 }
 0x2a0   : > { %v2440_v47 = vpop.permute.xlu0 %2439 }
 0x2a1   : > { %v605_v48 = vmul.f32 %v2543_v41, %v604_v46  ;;  %v2441_v49 = vunpack.i.l.bf16 %v2440_v47  ;;  %v2442_v53 = vunpack.i.h.bf16 %v2440_v47 }
 0x2a2   : > { %v2864_v51 = vpop.xlane.xlu2 %826 }
 0x2a3   : > { %643 = vmatpush.msra.mxu2 %v2441_v49  ;;  %v606_v55 = vadd.f32 %v2543_v41, %v605_v48  ;;  %v842_v39 = vand.u32 2147483648, %v2864_v51  ;;  %vm836_vm7 = vweird.f32 %v2864_v51  ;;  %v840_v42 = vand.u32 2147483647, %v2864_v51 }
 0x2a5   : > { %644 = vmatpush.msra.mxu2 %v2442_v53  ;;  %v610_v59 = vsel %vm609_vm9, %v2543_v41, %v606_v55  ;;  %v843_v48 = vor.u32 1.1754944e-38, %v842_v39 }
 0x2a6   : > { %2240 = vmatmul.msk.f32.vlgmr.msra.gmra.mxu2 %vm568_vm2, %v601_v54  ;;  %v615_v63 = vsel %vm612_vm10, %v614_v60, %v610_v59 }
 0x2a7   : > { %765 = vmatpush.msrb.mxu2 %v2446_v57  ;;  %v616_v1 = vmul.f32 %v2829_v61, %v615_v63 }
 0x2a9   : > { %766 = vmatpush.msrb.mxu2 %v2447_v62 }
 0x2aa   : > { %v705_v0 = vpop.xlane.xlu2 %704 }
 0x2ab   : > { %2544 = vrcp.f32 %v705_v0  ;;  %v720_v10 = vand.u32 2147483648, %v705_v0  ;;  %v718_v13 = vand.u32 2147483647, %v705_v0  ;;  %vm714_vm12 = vweird.f32 %v705_v0 }
 0x2ac   : > { %2546 = vrcp.f32 %v2864_v51 }
 0x2ad   : > { %v721_v15 = vor.u32 1.1754944e-38, %v720_v10  ;;  %vm719_vm14 = vcmp.eq.f32.partialorder %v718_v13, 8.507059e+37 }
 0x2ae   : > { %2241 = vmatmul.msk.f32.gmra.mxu2 %vm568_vm2, %v616_v1 }
 0x2b1   : > { %v2545_v58 = vpop.eup %2544 }
 0x2b2   : > { %v710_v4 = vmul.f32 %v2545_v58, %v705_v0  ;;  %v708_v5 = vpop.xlane.xlu1 %707  ;;  %v2871_v6 = vpop.eup %2546  ;;  %vm715_vm11 = vweird.f32 %v2545_v58 }
 0x2b3   : > { %2548 = vrcp.f32 %v708_v5  ;;  %v832_v12 = vmul.f32 %v2871_v6, %v2864_v51  ;;  %vm716_vm13 = vmor %vm714_vm12, %vm715_vm11  ;;  %v735_v24 = vand.u32 2147483648, %v708_v5  ;;  %v733_v29 = vand.u32 2147483647, %v708_v5 }
 0x2b4   : > { %v711_v7 = vsub.f32 1.0, %v710_v4  ;;  %vm729_vm3 = vweird.f32 %v708_v5  ;;  %vm837_vm6 = vweird.f32 %v2871_v6  ;;  %vm841_vm11 = vcmp.eq.f32.partialorder %v840_v42, 8.507059e+37 }
 0x2b5   : > { %v833_v20 = vsub.f32 1.0, %v832_v12  ;;  %v736_v34 = vor.u32 1.1754944e-38, %v735_v24  ;;  %vm734_vm5 = vcmp.eq.f32.partialorder %v733_v29, 8.507059e+37  ;;  %vm2884_vm8 = vmor %vm836_vm7, %vm837_vm6 }
 0x2b6   : > { %v712_v9 = vmul.f32 %v2545_v58, %v711_v7 }
 0x2b7   : > { %v834_v31 = vmul.f32 %v2871_v6, %v833_v20 }
 0x2b8   : > { %v713_v14 = vadd.f32 %v2545_v58, %v712_v9 }
 0x2b9   : > { %v2549_v61 = vpop.eup %2548  ;;  %v835_v38 = vadd.f32 %v2871_v6, %v834_v31 }
 0x2ba   : > { %v725_v16 = vmul.f32 %v2549_v61, %v708_v5  ;;  %v949_v18 = vpop.xlane.xlu2 %948  ;;  %v717_v19 = vsel %vm716_vm13, %v2545_v58, %v713_v14  ;;  %vm730_vm15 = vweird.f32 %v2549_v61 }
 0x2bb   : > { %2550 = vrcp.f32 %v949_v18  ;;  %v722_v22 = vsel %vm719_vm14, %v721_v15, %v717_v19  ;;  %vm731_vm4 = vmor %vm729_vm3, %vm730_vm15  ;;  %v964_v43 = vand.u32 2147483648, %v949_v18  ;;  %v962_v46 = vand.u32 2147483647, %v949_v18 }
 0x2bc   : > { %v726_v21 = vsub.f32 1.0, %v725_v16  ;;  %v723_v25 = vmul.f32 %v2839_v11, %v722_v22  ;;  %v839_v47 = vsel %vm2884_vm8, %v2871_v6, %v835_v38  ;;  %vm958_vm10 = vweird.f32 %v949_v18 }
 0x2bd   : > { %v965_v50 = vor.u32 1.1754944e-38, %v964_v43  ;;  %vm963_vm13 = vcmp.eq.f32.partialorder %v962_v46, 8.507059e+37  ;;  %v844_v55 = vsel %vm841_vm11, %v843_v48, %v839_v47 }
 0x2be   : > { %v727_v26 = vmul.f32 %v2549_v61, %v726_v21  ;;  %2246 = vmatmul.msk.f32.vlgmr.msrb.gmra.mxu2 %vm568_vm2, %v723_v25  ;;  %v845_v58 = vmul.f32 %v2833_v8, %v844_v55 }
 0x2c0   : > { %v728_v32 = vadd.f32 %v2549_v61, %v727_v26 }
 0x2c1   : > { %v2551_v33 = vpop.eup %2550 }
 0x2c2   : > { %v954_v35 = vmul.f32 %v2551_v33, %v949_v18  ;;  %v830_v36 = vpop.xlane.xlu2 %829  ;;  %v732_v37 = vsel %vm731_vm4, %v2549_v61, %v728_v32  ;;  %vm959_vm9 = vweird.f32 %v2551_v33 }
 0x2c3   : > { %2552 = vrcp.f32 %v830_v36  ;;  %v737_v11 = vsel %vm734_vm5, %v736_v34, %v732_v37  ;;  %vm960_vm12 = vmor %vm958_vm10, %vm959_vm9  ;;  %v857_v63 = vand.u32 2147483648, %v830_v36  ;;  %v855_v6 = vand.u32 2147483647, %v830_v36  ;;  %v2397_v37 = vld [vmem:[%s3243_s4] sm:$0xff] }
 0x2c4   : > { %v955_v40 = vsub.f32 1.0, %v954_v35  ;;  %v738_v41 = vmul.f32 %v2843_v17, %v737_v11  ;;  %vm851_vm15 = vweird.f32 %v830_v36  ;;  %vm1046_vm9 = vcmask 195584  }
 0x2c5   : > { %v858_v9 = vor.u32 1.1754944e-38, %v857_v63  ;;  %vm856_vm4 = vcmp.eq.f32.partialorder %v855_v6, 8.507059e+37  ;;  %v2636_v63 = vmov 32.0  }
 0x2c6   : > { %v956_v45 = vmul.f32 %v2551_v33, %v955_v40  ;;  %2247 = vmatmul.msk.f32.gmra.mxu2 %vm568_vm2, %v738_v41 }
 0x2c8   : > { %v957_v17 = vadd.f32 %v2551_v33, %v956_v45 }
 0x2c9   : > { %v2553_v49 = vpop.eup %2552 }
 0x2ca   : > { %v961_v51 = vsel %vm960_vm12, %v2551_v33, %v957_v17  ;;  %v847_v52 = vmul.f32 %v2553_v49, %v830_v36  ;;  %v2455_v53 = vpop.permute.xlu1 %2454  ;;  %v2450_v54 = vpop.permute.xlu2 %2449  ;;  %vm852_vm14 = vweird.f32 %v2553_v49 }
 0x2cb   : > { %v966_v56 = vsel %vm963_vm13, %v965_v50, %v961_v51  ;;  %v2451_v57 = vunpack.i.l.bf16 %v2450_v54  ;;  %v952_v59 = vpop.xlane.xlu0 %951  ;;  %v2456_v60 = vunpack.i.l.bf16 %v2455_v53  ;;  %v2452_v0 = vunpack.i.h.bf16 %v2450_v54  ;;  %vm853_vm3 = vmor %vm851_vm15, %vm852_vm14 }
 0x2cc   : > { %v848_v62 = vsub.f32 1.0, %v847_v52  ;;  %2554 = vrcp.f32 %v952_v59  ;;  %v2457_v1 = vunpack.i.h.bf16 %v2455_v53  ;;  %v967_v5 = vmul.f32 %v2847_v23, %v966_v56  ;;  %v2509_v52 = vld [vmem:[%s3244_s5] ss:$0 sm:$0xff] }
 0x2cd   : > { %887 = vmatpush.msrb.mxu1 %v2456_v60  ;;  %1009 = vmatpush.msra.mxu2 %v2451_v57  ;;  %v979_v61 = vand.u32 2147483648, %v952_v59  ;;  %v977_v16 = vand.u32 2147483647, %v952_v59  ;;  %vm973_vm6 = vweird.f32 %v952_v59  ;;  %2556 = vrcp.f32 %v2636_v63 }
 0x2ce   : > { %v849_v4 = vmul.f32 %v2553_v49, %v848_v62 }
 0x2cf   : > { %888 = vmatpush.msrb.mxu1 %v2457_v1  ;;  %1010 = vmatpush.msra.mxu2 %v2452_v0  ;;  %v980_v19 = vor.u32 1.1754944e-38, %v979_v61  ;;  %vm978_vm8 = vcmp.eq.f32.partialorder %v977_v16, 8.507059e+37 }
 0x2d0   : > { %2252 = vmatmul.msk.f32.vlgmr.msrb.gmra.mxu1 %vm568_vm2, %v845_v58  ;;  %2258 = vmatmul.msk.f32.vlgmr.msra.gmra.mxu2 %vm568_vm2, %v967_v5  ;;  %v850_v7 = vadd.f32 %v2553_v49, %v849_v4 }
 0x2d2   : > { %v2555_v10 = vpop.eup %2554  ;;  %v854_v12 = vsel %vm853_vm3, %v2553_v49, %v850_v7 }
 0x2d3   : > { %v969_v13 = vmul.f32 %v2555_v10, %v952_v59  ;;  %v859_v8 = vsel %vm856_vm4, %v858_v9, %v854_v12  ;;  %vm974_vm5 = vweird.f32 %v2555_v10  ;;  %v2557_v0 = vpop.eup %2556  ;;  %vm1245_vm4 = vcmask 523264  }
 0x2d4   : > { %v860_v23 = vmul.f32 %v2852_v28, %v859_v8  ;;  %vm975_vm7 = vmor %vm973_vm6, %vm974_vm5  ;;  %v1098_v1 = vmul.f32 32.0, %v2557_v0  ;;  %vm1102_vm10 = vweird.f32 %v2557_v0 }
 0x2d5   : > { %v970_v14 = vsub.f32 1.0, %v969_v13 }
 0x2d6   : > { %v1099_v58 = vsub.f32 1.0, %v1098_v1 }
 0x2d7   : > { %v971_v15 = vmul.f32 %v2555_v10, %v970_v14 }
 0x2d8   : > { %2253 = vmatmul.msk.f32.gmra.mxu1 %vm568_vm2, %v860_v23  ;;  %v1100_v4 = vmul.f32 %v2557_v0, %v1099_v58 }
 0x2d9   : > { %v972_v18 = vadd.f32 %v2555_v10, %v971_v15  ;;  %v2400_v15 = vld [vmem:[%s3247_s8 + $0x8] sm:$0xff] }
 0x2da   : > { %v1101_v5 = vadd.f32 %v2557_v0, %v1100_v4  ;;  %1182 = vmatpush.bf16.msra.mxu1 %v2400_v15 }
 0x2db   : > { %v976_v20 = vsel %vm975_vm7, %v2555_v10, %v972_v18 }
 0x2dc   : > { %v981_v21 = vsel %vm978_vm8, %v980_v19, %v976_v20  ;;  %v2923_v6 = vsel %vm1102_vm10, %v2557_v0, %v1101_v5  ;;  %v2399_v19 = vld [vmem:[%s3247_s8] sm:$0xff] }
 0x2dd   : > { %v982_v22 = vmul.f32 %v2856_v30, %v981_v21  ;;  %v2398_v30 = vld [vmem:[%s3243_s4 + $0x8] sm:$0xff] }
 0x2de   : > { %1079 = vmatpush.bf16.msra.mxu0 %v2398_v30  ;;  %1183 = vmatpush.bf16.msra.mxu1 %v2399_v19 }
 0x2df   : > { %2259 = vmatmul.msk.f32.gmra.mxu2 %vm568_vm2, %v982_v22 }
 0x2e2   : > { %1080 = vmatpush.bf16.msra.mxu0 %v2397_v37  ;;  %v2510_v37 = vld [vmem:[%s3245_s6] ss:$0 sm:$0xff] }
 0x329   : > { %v646_v24 = vpop.f32.mrf.mxu2 }
 0x331   : > { %v649_v25 = vpop.f32.mrf.mxu2 }
 0x341   : > { %v768_v26 = vpop.f32.mrf.mxu2 }
 0x349   : > { %v771_v28 = vpop.f32.mrf.mxu2 }
 0x34a   : > { %v2458_v29 = vpack.i.bf16 %v771_v28, %v768_v26 }
 0x34c   : > { %2459 = vrot.lane.b32.xlu1 %v2458_v29, %s3261_s20  ;;  %s3268_s20 = smov 112  }
 0x34d   : > { %v890_v31 = vpop.f32.mrf.mxu1 }
 0x353   : > { %v1012_v34 = vpop.f32.mrf.mxu2 }
 0x355   : > { %v893_v32 = vpop.f32.mrf.mxu1 }
 0x356   : > { %v2463_v33 = vpack.i.bf16 %v893_v32, %v890_v31 }
 0x358   : > { %2464 = vrot.lane.b32.xlu1 %v2463_v33, %s3259_s21 }
 0x362   : > { %v1015_v35 = vpop.f32.mrf.mxu2 }
 0x363   : > { %v2468_v36 = vpack.i.bf16 %v1015_v35, %v1012_v34 }
 0x365   : > { %2469 = vrot.lane.b32.xlu2 %v2468_v36, %s3260_s19  ;;  %s3279_s19 = sshll.u32 %s3281_s30, 4 }
 0x3be   : > { %v2460_v38 = vpop.permute.xlu1 %2459 }
 0x3bf   : > { %v2462_v11 = vunpack.i.h.bf16 %v2460_v38  ;;  %v2461_v39 = vunpack.i.l.bf16 %v2460_v38  ;;  %v2470_v40 = vpop.permute.xlu2 %2469 }
 0x3c0   : > { %v2472_v46 = vunpack.i.h.bf16 %v2470_v40  ;;  %v2471_v47 = vunpack.i.l.bf16 %v2470_v40  ;;  %v2511_v40 = vld [vmem:[%s3246_s7] ss:$0 sm:$0xff] }
 0x3c1   : > { %v1043_v44 = vsel %vm536_vm1, %v649_v25, %v2462_v11  ;;  %v1042_v45 = vsel %vm536_vm1, %v646_v24, %v2461_v39 }
 0x3ca   : > { %v2465_v41 = vpop.permute.xlu1 %2464 }
 0x3cb   : > { %v2467_v42 = vunpack.i.h.bf16 %v2465_v41  ;;  %v2466_v43 = vunpack.i.l.bf16 %v2465_v41 }
 0x3cd   : > { %v1044_v48 = vsel %vm568_vm2, %v1042_v45, %v2466_v43  ;;  %v1045_v17 = vsel %vm568_vm2, %v1043_v44, %v2467_v42 }
 0x3ce   : > { %v1047_v49 = vsel %vm1046_vm9, %v1044_v48, %v2471_v47  ;;  %v1048_v50 = vsel %vm1046_vm9, %v1045_v17, %v2472_v46  ;;  %v2404_v47 = vld [vmem:[%s3249_s10 + $0x18] sm:$0xff]  ;;  %v2403_v48 = vld [vmem:[%s3249_s10 + $0x10] sm:$0xff]  ;;  %v2512_v17 = vld [vmem:[%s3248_s9] ss:$0 sm:$0xff] }
 0x3cf   : > { %v1049_v51 = vpack.c.bf16 %v1048_v50, %v1047_v49  ;;  %1253 = vmatpush.bf16.msra.mxu3 %v2404_v47  ;;  %v2402_v49 = vld [vmem:[%s3249_s10 + $0x8] sm:$0xff] }
 0x3d1   : > { %2268 = vmatmul.msk.bf16.vlgmr.msra.gmra.mxu0 %vm512_vm0, %v1049_v51 }
 0x3d3   : > { %1254 = vmatpush.bf16.msra.mxu3 %v2403_v48 }
 0x3d7   : > { %1255 = vmatpush.bf16.msra.mxu3 %v2402_v49 }
 0x44e   : > { %v1082_v53 = vpop.f32.mrf.mxu0 }
 0x44f   : > { %v1083_v54 = vadd.f32 %v2509_v52, %v1082_v53 }
 0x451   : > { %v1087_v55 = vadd.f32 %v1083_v54, %v2734_v2 }
 0x453   : > { %v1091_v56 = vsel %vm512_vm0, %v1087_v55, 0.0 }
 0x454   : > { %1092 = vadd.xlane.f32.xlu1 %v1091_v56 }
 0x456   : > { %v1084_v57 = vpop.f32.mrf.mxu0 }
 0x457   : > { %v1085_v59 = vadd.f32 %v2509_v52, %v1084_v57  ;;  %v2401_v52 = vld [vmem:[%s3249_s10] sm:$0xff] }
 0x458   : > { %1256 = vmatpush.bf16.msra.mxu3 %v2401_v52 }
 0x459   : > { %v1088_v60 = vadd.f32 %v1085_v59, %v2736_v3 }
 0x45b   : > { %v1094_v62 = vsel %vm512_vm0, %v1088_v60, 0.0 }
 0x45c   : > { %1095 = vadd.xlane.f32.xlu0 %v1094_v62 }
 0x4c7   : > { %v1093_v2 = vpop.xlane.xlu1 %1092 }
 0x4c8   : > { %v1104_v7 = vmul.f32 %v2923_v6, %v1093_v2 }
 0x4ca   : > { %v1106_v9 = vsub.f32 %v1087_v55, %v1104_v7 }
 0x4cc   : > { %v1108_v10 = vmul.f32 %v1106_v9, %v1106_v9 }
 0x4ce   : > { %v1110_v3 = vsel %vm512_vm0, %v1108_v10, 0.0 }
 0x4cf   : > { %v1096_v12 = vpop.xlane.xlu0 %1095  ;;  %1111 = vadd.xlane.f32.xlu2 %v1110_v3 }
 0x4d0   : > { %v1105_v13 = vmul.f32 %v2923_v6, %v1096_v12 }
 0x4d2   : > { %v1107_v8 = vsub.f32 %v1088_v60, %v1105_v13 }
 0x4d4   : > { %v1109_v14 = vmul.f32 %v1107_v8, %v1107_v8 }
 0x4d6   : > { %v1113_v61 = vsel %vm512_vm0, %v1109_v14, 0.0 }
 0x4d7   : > { %1114 = vadd.xlane.f32.xlu0 %v1113_v61 }
 0x542   : > { %v1112_v23 = vpop.xlane.xlu2 %1111 }
 0x543   : > { %v1116_v16 = vmul.f32 %v1112_v23, %v2923_v6 }
 0x545   : > { %v1118_v18 = vadd.f32 1e-12, %v1116_v16 }
 0x547   : > { %2558 = vrsqrt.f32 %v1118_v18  ;;  %vm1126_vm12 = vweird.f32 %v1118_v18 }
 0x54a   : > { %v1115_v20 = vpop.xlane.xlu0 %1114 }
 0x54b   : > { %v1117_v21 = vmul.f32 %v1115_v20, %v2923_v6 }
 0x54d   : > { %v2559_v22 = vpop.eup %2558  ;;  %v1119_v24 = vadd.f32 1e-12, %v1117_v21 }
 0x54e   : > { %v1121_v25 = vmul.f32 %v2559_v22, %v1118_v18  ;;  %vm1127_vm11 = vweird.f32 %v2559_v22 }
 0x54f   : > { %2560 = vrsqrt.f32 %v1119_v24  ;;  %vm1128_vm13 = vmor %vm1126_vm12, %vm1127_vm11  ;;  %vm1136_vm15 = vweird.f32 %v1119_v24 }
 0x550   : > { %v1122_v26 = vmul.f32 %v2559_v22, %v1121_v25 }
 0x552   : > { %v1123_v28 = vmul.f32 0.5, %v1122_v26 }
 0x554   : > { %v1124_v29 = vsub.f32 1.5, %v1123_v28 }
 0x555   : > { %v2561_v31 = vpop.eup %2560 }
 0x556   : > { %v1125_v32 = vmul.f32 %v2559_v22, %v1124_v29  ;;  %v1131_v33 = vmul.f32 %v2561_v31, %v1119_v24  ;;  %vm1137_vm14 = vweird.f32 %v2561_v31 }
 0x557   : > { %vm1138_vm3 = vmor %vm1136_vm15, %vm1137_vm14 }
 0x558   : > { %v1132_v34 = vmul.f32 %v2561_v31, %v1131_v33  ;;  %v1129_v35 = vsel %vm1128_vm13, %v2559_v22, %v1125_v32 }
 0x559   : > { %v1140_v38 = vmul.f32 %v1129_v35, %v1106_v9  ;;  %v2406_v35 = vld [vmem:[%s3241_s2 + $0x18] sm:$0xff] }
 0x55a   : > { %v1133_v36 = vmul.f32 0.5, %v1132_v34  ;;  %1353 = vmatpush.bf16.msrb.mxu2 %v2406_v35 }
 0x55b   : > { %v1145_v41 = vmul.f32 %v2510_v37, %v1140_v38 }
 0x55c   : > { %v1134_v30 = vsub.f32 1.5, %v1133_v36 }
 0x55d   : > { %v1150_v44 = vadd.f32 %v2511_v40, %v1145_v41 }
 0x55e   : > { %v1135_v11 = vmul.f32 %v2561_v31, %v1134_v30 }
 0x560   : > { %v1139_v39 = vsel %vm1138_vm3, %v2561_v31, %v1135_v11 }
 0x561   : > { %v1141_v42 = vmul.f32 %v1139_v39, %v1107_v8  ;;  %v2513_v8 = vld [vmem:[%s3250_s11] ss:$0 sm:$0xff] }
 0x563   : > { %v1146_v43 = vmul.f32 %v2510_v37, %v1141_v42  ;;  %v2405_v37 = vld [vmem:[%s3241_s2 + $0x10] sm:$0xff] }
 0x564   : > { %1354 = vmatpush.bf16.msrb.mxu2 %v2405_v37 }
 0x565   : > { %v1151_v45 = vadd.f32 %v2511_v40, %v1146_v43 }
 0x567   : > { %v1152_v46 = vpack.c.bf16 %v1151_v45, %v1150_v44 }
 0x569   : > { %2277 = vmatmul.msk.bf16.vlgmr.msra.gmra.mxu1 %vm512_vm0, %v1152_v46 }
 0x5e6   : > { %v1185_v50 = vpop.f32.mrf.mxu1 }
 0x5e7   : > { %v1186_v51 = vadd.f32 %v2512_v17, %v1185_v50 }
 0x5e9   : > { %v1190_v53 = vmul.f32 %v1186_v51, %v1186_v51 }
 0x5eb   : > { %v1192_v54 = vmul.f32 %v1190_v53, %v1186_v51 }
 0x5ed   : > { %v1194_v55 = vmul.f32 0.044715, %v1192_v54 }
 0x5ee   : > { %v1187_v56 = vpop.f32.mrf.mxu1 }
 0x5ef   : > { %v1196_v57 = vadd.f32 %v1194_v55, %v1186_v51  ;;  %v1188_v59 = vadd.f32 %v2512_v17, %v1187_v56  ;;  %v2515_v55 = vld [vmem:[%s3252_s13] ss:$0 sm:$0xff] }
 0x5f1   : > { %v1198_v60 = vmul.f32 0.7978846, %v1196_v57  ;;  %v1191_v62 = vmul.f32 %v1188_v59, %v1188_v59 }
 0x5f3   : > { %v1193_v63 = vmul.f32 %v1191_v62, %v1188_v59  ;;  %2562 = vtanh.f32 %v1198_v60 }
 0x5f5   : > { %v1195_v0 = vmul.f32 0.044715, %v1193_v63 }
 0x5f7   : > { %v1197_v1 = vadd.f32 %v1195_v0, %v1188_v59  ;;  %v2516_v0 = vld [vmem:[%s3242_s3 + $0x1] ss:$0 sm:$0xff] }
 0x5f9   : > { %v1199_v58 = vmul.f32 0.7978846, %v1197_v1  ;;  %v2563_v4 = vpop.eup %2562 }
 0x5fa   : > { %v1202_v5 = vadd.f32 1.0, %v2563_v4 }
 0x5fb   : > { %2564 = vtanh.f32 %v1199_v58 }
 0x5fc   : > { %v1204_v7 = vmul.f32 0.5, %v1202_v5 }
 0x5fe   : > { %v1206_v3 = vmul.f32 %v1204_v7, %v1186_v51  ;;  %v2514_v51 = vld [vmem:[%s3251_s12] ss:$0 sm:$0xff] }
 0x601   : > { %v2565_v2 = vpop.eup %2564 }
 0x602   : > { %v1203_v9 = vadd.f32 1.0, %v2565_v2 }
 0x604   : > { %v1205_v10 = vmul.f32 0.5, %v1203_v9 }
 0x606   : > { %v1207_v12 = vmul.f32 %v1205_v10, %v1188_v59 }
 0x608   : > { %v1208_v13 = vpack.c.bf16 %v1207_v12, %v1206_v3 }
 0x60a   : > { %2294 = vmatmul.msk.bf16.vlgmr.msra.gmra.mxu3 %vm1245_vm4, %v1208_v13 }
 0x68d   : > { %v1258_v14 = vpop.f32.mrf.mxu3 }
 0x68e   : > { %v1259_v61 = vadd.f32 %v2513_v8, %v1258_v14 }
 0x690   : > { %v1263_v23 = vadd.f32 %v1259_v61, %v1150_v44 }
 0x692   : > { %v1267_v15 = vsel %vm512_vm0, %v1263_v23, 0.0 }
 0x693   : > { %1268 = vadd.xlane.f32.xlu0 %v1267_v15 }
 0x695   : > { %v1260_v16 = vpop.f32.mrf.mxu3 }
 0x696   : > { %v1261_v18 = vadd.f32 %v2513_v8, %v1260_v16 }
 0x698   : > { %v1264_v19 = vadd.f32 %v1261_v18, %v1151_v45 }
 0x69a   : > { %v1270_v20 = vsel %vm512_vm0, %v1264_v19, 0.0 }
 0x69b   : > { %1271 = vadd.xlane.f32.xlu0 %v1270_v20 }
 0x706   : > { %v1269_v21 = vpop.xlane.xlu0 %1268 }
 0x707   : > { %v1273_v22 = vmul.f32 %v1269_v21, %v2923_v6 }
 0x709   : > { %v1275_v24 = vsub.f32 %v1263_v23, %v1273_v22 }
 0x70b   : > { %v1277_v25 = vmul.f32 %v1275_v24, %v1275_v24 }
 0x70d   : > { %v1279_v26 = vsel %vm512_vm0, %v1277_v25, 0.0 }
 0x70e   : > { %1280 = vadd.xlane.f32.xlu0 %v1279_v26  ;;  %v1272_v28 = vpop.xlane.xlu0 %1271 }
 0x70f   : > { %v1274_v29 = vmul.f32 %v1272_v28, %v2923_v6 }
 0x711   : > { %v1276_v31 = vsub.f32 %v1264_v19, %v1274_v29 }
 0x713   : > { %v1278_v32 = vmul.f32 %v1276_v31, %v1276_v31 }
 0x715   : > { %v1282_v33 = vsel %vm512_vm0, %v1278_v32, 0.0 }
 0x716   : > { %1283 = vadd.xlane.f32.xlu1 %v1282_v33 }
 0x781   : > { %v1281_v34 = vpop.xlane.xlu0 %1280 }
 0x782   : > { %v1285_v36 = vmul.f32 %v1281_v34, %v2923_v6 }
 0x784   : > { %v1287_v30 = vadd.f32 1e-12, %v1285_v36 }
 0x786   : > { %2566 = vrsqrt.f32 %v1287_v30  ;;  %vm1295_vm6 = vweird.f32 %v1287_v30 }
 0x789   : > { %v1284_v38 = vpop.xlane.xlu1 %1283 }
 0x78a   : > { %v1286_v11 = vmul.f32 %v1284_v38, %v2923_v6 }
 0x78c   : > { %v2567_v39 = vpop.eup %2566  ;;  %v1288_v40 = vadd.f32 1e-12, %v1286_v11 }
 0x78d   : > { %v1290_v41 = vmul.f32 %v2567_v39, %v1287_v30  ;;  %vm1296_vm5 = vweird.f32 %v2567_v39 }
 0x78e   : > { %2568 = vrsqrt.f32 %v1288_v40  ;;  %vm1297_vm7 = vmor %vm1295_vm6, %vm1296_vm5  ;;  %vm1305_vm10 = vweird.f32 %v1288_v40 }
 0x78f   : > { %v1291_v42 = vmul.f32 %v2567_v39, %v1290_v41 }
 0x791   : > { %v1292_v43 = vmul.f32 0.5, %v1291_v42 }
 0x793   : > { %v1293_v44 = vsub.f32 1.5, %v1292_v43 }
 0x794   : > { %v2569_v45 = vpop.eup %2568 }
 0x795   : > { %v1294_v46 = vmul.f32 %v2567_v39, %v1293_v44  ;;  %v1300_v47 = vmul.f32 %v2569_v45, %v1288_v40  ;;  %vm1306_vm8 = vweird.f32 %v2569_v45 }
 0x796   : > { %vm1307_vm11 = vmor %vm1305_vm10, %vm1306_vm8 }
 0x797   : > { %v1301_v48 = vmul.f32 %v2569_v45, %v1300_v47  ;;  %v1298_v17 = vsel %vm1297_vm7, %v2567_v39, %v1294_v46 }
 0x798   : > { %v1309_v52 = vmul.f32 %v1298_v17, %v1275_v24 }
 0x799   : > { %v1302_v49 = vmul.f32 0.5, %v1301_v48 }
 0x79a   : > { %v1314_v56 = vmul.f32 %v2514_v51, %v1309_v52 }
 0x79b   : > { %v1303_v50 = vsub.f32 1.5, %v1302_v49 }
 0x79c   : > { %v2983_v60 = vadd.f32 %v2515_v55, %v1314_v56 }
 0x79d   : > { %v1304_v53 = vmul.f32 %v2569_v45, %v1303_v50 }
 0x79f   : > { %v1308_v54 = vsel %vm1307_vm11, %v2569_v45, %v1304_v53 }
 0x7a0   : > { %v1310_v57 = vmul.f32 %v1308_v54, %v1276_v31 }
 0x7a2   : > { %v1315_v59 = vmul.f32 %v2514_v51, %v1310_v57 }
 0x7a4   : > { %v2985_v62 = vadd.f32 %v2515_v55, %v1315_v59 }
 0x7a6   : > { %v1321_v63 = vpack.c.bf16 %v2985_v62, %v2983_v60 }
 0x7a8   : > { %2308 = vmatmul.msk.bf16.vlgmr.msrb.gmra.mxu2 %vm512_vm0, %v1321_v63 }
 0x82b   : > { %v1356_v1 = vpop.f32.mrf.mxu2 }
 0x82c   : > { %v2993_v58 = vadd.f32 %v2516_v0, %v1356_v1 }
 0x82e   : > { %1481 = vrot.lane.b32.xlu1 %v2993_v58, %s2622_s25  ;;  %1485 = vrot.lane.b32.xlu2 %v2993_v58, %s2623_s26 }
 0x833   : > { %v1358_v4 = vpop.f32.mrf.mxu2 }
 0x834   : > { %v2999_v5 = vadd.f32 %v2516_v0, %v1358_v4 }
 0x836   : > { %1487 = vrot.lane.b32.xlu0 %v2999_v5, %s2623_s26  ;;  %1731 = vrot.lane.b32.xlu1 %v2999_v5, %s2626_s15  ;;  %s3269_s26 = smov 104   ;;  %v3061_v44 = vpack.i.bf16 %v2993_v58, %v2999_v5 }
 0x837   : > { %1363 = vrot.lane.b32.xlu2 %v2993_v58, %s2624_s27 }
 0x83e   : > { %1365 = vrot.lane.b32.xlu0 %v2999_v5, %s2624_s27  ;;  %1609 = vrot.lane.b32.xlu1 %v2999_v5, %s2627_s16  ;;  %s3271_s27 = smov 56  }
 0x83f   : > { %1729 = vrot.lane.b32.xlu2 %v2993_v58, %s2626_s15  ;;  %s3272_s15 = smov 40  }
 0x846   : > { %1483 = vrot.lane.b32.xlu0 %v2999_v5, %s2622_s25  ;;  %1603 = vrot.lane.b32.xlu1 %v2993_v58, %s3268_s20  ;;  %s3270_s25 = smov 64  }
 0x847   : > { %1607 = vrot.lane.b32.xlu2 %v2993_v58, %s2627_s16  ;;  %s3273_s16 = smov 48  }
 0x84e   : > { %1725 = vrot.lane.b32.xlu0 %v2993_v58, %s3269_s26 }
 0x84f   : > { %1605 = vrot.lane.b32.xlu2 %v2999_v5, %s3268_s20  ;;  %s481_s20 = scalar_lea.vmem %s3253_s14, %s3279_s19 }
 0x856   : > { %1727 = vrot.lane.b32.xlu0 %v2999_v5, %s3269_s26 }
 0x888   : > { %v1486_v2 = vpop.permute.xlu2 %1485 }
 0x891   : > { %v1364_v9 = vpop.permute.xlu2 %1363 }
 0x899   : > { %v1730_v12 = vpop.permute.xlu2 %1729 }
 0x8a0   : > { %v1482_v7 = vpop.permute.xlu1 %1481 }
 0x8a1   : > { %v1608_v61 = vpop.permute.xlu2 %1607 }
 0x8a8   : > { %v1488_v10 = vpop.permute.xlu0 %1487  ;;  %v1732_v3 = vpop.permute.xlu1 %1731 }
 0x8a9   : > { %2315 = vmatpush.xpose.msk.msrb.mxu3 %vm536_vm1, %v1488_v10  ;;  %v1606_v18 = vpop.permute.xlu2 %1605 }
 0x8ad   : > { %2316 = vmatpush.xpose.msk.msrb.mxu3 %vm536_vm1, %v1486_v2 }
 0x8b0   : > { %v1366_v13 = vpop.permute.xlu0 %1365  ;;  %2317 = vmatmul.msk.f32.vlgmr.msrb.gmra.mxu3 %vm536_vm1, %v1482_v7  ;;  %v1610_v8 = vpop.permute.xlu1 %1609 }
 0x8b1   : > { %2327 = vmatpush.xpose.msk.msra.mxu3 %vm536_vm1, %v1732_v3  ;;  %2309 = vmatpush.xpose.msk.msrb.mxu0 %vm536_vm1, %v1366_v13 }
 0x8b5   : > { %2328 = vmatpush.xpose.msk.msra.mxu3 %vm536_vm1, %v1730_v12  ;;  %2310 = vmatpush.xpose.msk.msrb.mxu0 %vm536_vm1, %v1364_v9 }
 0x8b8   : > { %v1484_v14 = vpop.permute.xlu0 %1483  ;;  %2311 = vmatmul.msk.f32.vlgmr.msrb.gmra.mxu0 %vm536_vm1, %v2993_v58  ;;  %v1604_v15 = vpop.permute.xlu1 %1603 }
 0x8b9   : > { %2321 = vmatpush.xpose.msk.msra.mxu0 %vm536_vm1, %v1610_v8  ;;  %2318 = vmatmul.msk.f32.gmra.mxu3 %vm536_vm1, %v1484_v14 }
 0x8bd   : > { %2322 = vmatpush.xpose.msk.msra.mxu0 %vm536_vm1, %v1608_v61 }
 0x8c0   : > { %v1726_v23 = vpop.permute.xlu0 %1725  ;;  %2312 = vmatmul.msk.f32.gmra.mxu0 %vm536_vm1, %v2999_v5 }
 0x8c1   : > { %2329 = vmatmul.msk.f32.vlgmr.msra.gmra.mxu3 %vm536_vm1, %v1726_v23 }
 0x8c8   : > { %v1728_v16 = vpop.permute.xlu0 %1727  ;;  %2323 = vmatmul.msk.f32.vlgmr.msra.gmra.mxu0 %vm536_vm1, %v1604_v15 }
 0x8c9   : > { %2330 = vmatmul.msk.f32.gmra.mxu3 %vm536_vm1, %v1728_v16 }
 0x8d0   : > { %2324 = vmatmul.msk.f32.gmra.mxu0 %vm536_vm1, %v1606_v18 }
 0x933   : > { %v1514_v19 = vpop.f32.mrf.mxu3 }
 0x934   : > { %v1515_v20 = vadd.f32 %v1514_v19, %v2798_v27 }
 0x935   : > { %v1392_v21 = vpop.f32.mrf.mxu0 }
 0x936   : > { %v1393_v22 = vadd.f32 %v1392_v21, %v2798_v27  ;;  %v1520_v24 = vsel %vm568_vm2, %v1515_v20, -inf }
 0x937   : > { %1521 = vmax.xlane.f32.xlu0 %v1520_v24 }
 0x938   : > { %v1398_v25 = vsel %vm568_vm2, %v1393_v22, -inf }
 0x939   : > { %1399 = vmax.xlane.f32.xlu1 %v1398_v25 }
 0x93c   : > { %v1517_v26 = vpop.f32.mrf.mxu3 }
 0x93d   : > { %v1518_v28 = vadd.f32 %v1517_v26, %v2798_v27  ;;  %v1395_v29 = vpop.f32.mrf.mxu0 }
 0x93e   : > { %v1396_v31 = vadd.f32 %v1395_v29, %v2798_v27 }
 0x93f   : > { %v1523_v32 = vsel %vm568_vm2, %v1518_v28, -inf }
 0x940   : > { %1524 = vmax.xlane.f32.xlu2 %v1523_v32  ;;  %v1401_v33 = vsel %vm568_vm2, %v1396_v31, -inf }
 0x941   : > { %1402 = vmax.xlane.f32.xlu0 %v1401_v33 }
 0x944   : > { %v1758_v34 = vpop.f32.mrf.mxu3 }
 0x945   : > { %v1759_v35 = vadd.f32 %v1758_v34, %v2798_v27  ;;  %v1636_v36 = vpop.f32.mrf.mxu0 }
 0x946   : > { %v1637_v30 = vadd.f32 %v1636_v36, %v2798_v27 }
 0x947   : > { %v1764_v37 = vsel %vm568_vm2, %v1759_v35, -inf }
 0x948   : > { %1765 = vmax.xlane.f32.xlu1 %v1764_v37  ;;  %v1642_v38 = vsel %vm568_vm2, %v1637_v30, -inf }
 0x949   : > { %1643 = vmax.xlane.f32.xlu2 %v1642_v38 }
 0x94c   : > { %v1761_v11 = vpop.f32.mrf.mxu3 }
 0x94d   : > { %v1762_v39 = vadd.f32 %v1761_v11, %v2798_v27  ;;  %v1639_v40 = vpop.f32.mrf.mxu0 }
 0x94e   : > { %v1640_v41 = vadd.f32 %v1639_v40, %v2798_v27 }
 0x94f   : > { %v1767_v42 = vsel %vm568_vm2, %v1762_v39, -inf }
 0x950   : > { %1768 = vmax.xlane.f32.xlu0 %v1767_v42  ;;  %v1645_v43 = vsel %vm568_vm2, %v1640_v41, -inf }
 0x951   : > { %1646 = vmax.xlane.f32.xlu1 %v1645_v43 }
 0x964   : > { %2479 = vrot.lane.b32.xlu0 %v3061_v44, %s3270_s25 }
 0x96a   : > { %2474 = vrot.lane.b32.xlu1 %v3061_v44, %s3271_s27 }
 0x9aa   : > { %v1522_v45 = vpop.xlane.xlu0 %1521 }
 0x9ab   : > { %v1526_v46 = vsub.f32 %v1515_v20, %v1522_v45 }
 0x9ac   : > { %v1400_v47 = vpop.xlane.xlu1 %1399 }
 0x9ad   : > { %v1528_v27 = vmul.f32 1.442695, %v1526_v46  ;;  %v1404_v48 = vsub.f32 %v1393_v22, %v1400_v47 }
 0x9af   : > { %2570 = vpow2.f32 %v1528_v27  ;;  %v1406_v17 = vmul.f32 1.442695, %v1404_v48 }
 0x9b1   : > { %2572 = vpow2.f32 %v1406_v17 }
 0x9b3   : > { %v1525_v49 = vpop.xlane.xlu2 %1524 }
 0x9b4   : > { %v1527_v50 = vsub.f32 %v1518_v28, %v1525_v49  ;;  %v1403_v51 = vpop.xlane.xlu0 %1402 }
 0x9b5   : > { %v3067_v52 = vpop.eup %2570  ;;  %v1405_v53 = vsub.f32 %v1396_v31, %v1403_v51 }
 0x9b6   : > { %v1530_v54 = vmul.f32 1.442695, %v1527_v50  ;;  %v1532_v55 = vsel %vm568_vm2, %v3067_v52, 0.0 }
 0x9b7   : > { %v3071_v56 = vpop.eup %2572  ;;  %v1408_v57 = vmul.f32 1.442695, %v1405_v53  ;;  %1533 = vadd.xlane.f32.xlu2 %v1532_v55 }
 0x9b8   : > { %2574 = vpow2.f32 %v1530_v54  ;;  %v1410_v59 = vsel %vm568_vm2, %v3071_v56, 0.0 }
 0x9b9   : > { %2576 = vpow2.f32 %v1408_v57  ;;  %1411 = vadd.xlane.f32.xlu0 %v1410_v59 }
 0x9bb   : > { %v1766_v63 = vpop.xlane.xlu1 %1765 }
 0x9bc   : > { %v1770_v0 = vsub.f32 %v1759_v35, %v1766_v63  ;;  %v1644_v1 = vpop.xlane.xlu2 %1643 }
 0x9bd   : > { %v1648_v58 = vsub.f32 %v1637_v30, %v1644_v1 }
 0x9be   : > { %v3075_v4 = vpop.eup %2574  ;;  %v1772_v5 = vmul.f32 1.442695, %v1770_v0 }
 0x9bf   : > { %v3077_v2 = vpop.eup %2576  ;;  %v1650_v7 = vmul.f32 1.442695, %v1648_v58  ;;  %v1535_v9 = vsel %vm568_vm2, %v3075_v4, 0.0 }
 0x9c0   : > { %2578 = vpow2.f32 %v1772_v5  ;;  %1536 = vadd.xlane.f32.xlu1 %v1535_v9  ;;  %v1413_v10 = vsel %vm568_vm2, %v3077_v2, 0.0 }
 0x9c1   : > { %2580 = vpow2.f32 %v1650_v7  ;;  %1414 = vadd.xlane.f32.xlu2 %v1413_v10 }
 0x9c3   : > { %v1769_v3 = vpop.xlane.xlu0 %1768 }
 0x9c4   : > { %v1771_v12 = vsub.f32 %v1762_v39, %v1769_v3  ;;  %v1647_v13 = vpop.xlane.xlu1 %1646 }
 0x9c5   : > { %v1649_v15 = vsub.f32 %v1640_v41, %v1647_v13 }
 0x9c6   : > { %v3083_v8 = vpop.eup %2578  ;;  %v1774_v14 = vmul.f32 1.442695, %v1771_v12 }
 0x9c7   : > { %v3085_v61 = vpop.eup %2580  ;;  %v1776_v23 = vsel %vm568_vm2, %v3083_v8, 0.0  ;;  %v1652_v18 = vmul.f32 1.442695, %v1649_v15 }
 0x9c8   : > { %2582 = vpow2.f32 %v1774_v14  ;;  %1777 = vadd.xlane.f32.xlu0 %v1776_v23  ;;  %v1654_v16 = vsel %vm568_vm2, %v3085_v61, 0.0 }
 0x9c9   : > { %1655 = vadd.xlane.f32.xlu2 %v1654_v16  ;;  %2584 = vpow2.f32 %v1652_v18 }
 0x9ce   : > { %v3091_v19 = vpop.eup %2582 }
 0x9cf   : > { %v1779_v20 = vsel %vm568_vm2, %v3091_v19, 0.0  ;;  %v3095_v21 = vpop.eup %2584 }
 0x9d0   : > { %v1657_v26 = vsel %vm568_vm2, %v3095_v21, 0.0 }
 0x9d1   : > { %1780 = vadd.xlane.f32.xlu2 %v1779_v20 }
 0x9d6   : > { %v2480_v22 = vpop.permute.xlu0 %2479 }
 0x9d7   : > { %v2481_v24 = vunpack.i.l.bf16 %v2480_v22  ;;  %v2482_v25 = vunpack.i.h.bf16 %v2480_v22 }
 0x9d9   : > { %1472 = vmatpush.msrb.mxu1 %v2481_v24  ;;  %2484 = vrot.lane.b32.xlu1 %v3061_v44, %s3272_s15 }
 0x9da   : > { %1658 = vadd.xlane.f32.xlu2 %v1657_v26 }
 0x9db   : > { %1473 = vmatpush.msrb.mxu1 %v2482_v25 }
 0x9dc   : > { %2489 = vrot.lane.b32.xlu0 %v3061_v44, %s3273_s16  ;;  %v2475_v28 = vpop.permute.xlu1 %2474 }
 0x9dd   : > { %v2476_v29 = vunpack.i.l.bf16 %v2475_v28  ;;  %v2477_v31 = vunpack.i.h.bf16 %v2475_v28 }
 0x9df   : > { %1594 = vmatpush.msra.mxu2 %v2476_v29 }
 0x9e1   : > { %1595 = vmatpush.msra.mxu2 %v2477_v31 }
 0xa2a   : > { %v1534_v32 = vpop.xlane.xlu2 %1533 }
 0xa2b   : > { %2586 = vrcp.f32 %v1534_v32  ;;  %vm1543_vm13 = vweird.f32 %v1534_v32  ;;  %v1547_v41 = vand.u32 2147483647, %v1534_v32  ;;  %v1549_v42 = vand.u32 2147483648, %v1534_v32 }
 0xa2c   : > { %v1412_v33 = vpop.xlane.xlu0 %1411 }
 0xa2d   : > { %2588 = vrcp.f32 %v1412_v33  ;;  %v1427_v43 = vand.u32 2147483648, %v1412_v33  ;;  %v1425_v46 = vand.u32 2147483647, %v1412_v33  ;;  %vm1421_vm3 = vweird.f32 %v1412_v33 }
 0xa2e   : > { %vm1548_vm5 = vcmp.eq.f32.partialorder %v1547_v41, 8.507059e+37  ;;  %v1550_v50 = vor.u32 1.1754944e-38, %v1549_v42 }
 0xa2f   : > { %v1428_v51 = vor.u32 1.1754944e-38, %v1427_v43  ;;  %vm1426_vm7 = vcmp.eq.f32.partialorder %v1425_v46, 8.507059e+37 }
 0xa31   : > { %v2587_v34 = vpop.eup %2586 }
 0xa32   : > { %v1539_v35 = vmul.f32 %v2587_v34, %v1534_v32  ;;  %vm1544_vm12 = vweird.f32 %v2587_v34 }
 0xa33   : > { %v2589_v36 = vpop.eup %2588  ;;  %v1537_v30 = vpop.xlane.xlu1 %1536  ;;  %vm3106_vm15 = vmor %vm1543_vm13, %vm1544_vm12 }
 0xa34   : > { %v1540_v37 = vsub.f32 1.0, %v1539_v35  ;;  %v1417_v38 = vmul.f32 %v2589_v36, %v1412_v33  ;;  %2590 = vrcp.f32 %v1537_v30  ;;  %v3103_v11 = vpop.xlane.xlu2 %1414  ;;  %vm1422_vm14 = vweird.f32 %v2589_v36 }
 0xa35   : > { %2592 = vrcp.f32 %v3103_v11  ;;  %vm1423_vm6 = vmor %vm1421_vm3, %vm1422_vm14  ;;  %v1564_v58 = vand.u32 2147483648, %v1537_v30  ;;  %v1562_v9 = vand.u32 2147483647, %v1537_v30  ;;  %v1442_v3 = vand.u32 2147483648, %v3103_v11 }
 0xa36   : > { %v1541_v39 = vmul.f32 %v2587_v34, %v1540_v37  ;;  %v1418_v40 = vsub.f32 1.0, %v1417_v38  ;;  %vm1558_vm10 = vweird.f32 %v1537_v30  ;;  %v1440_v23 = vand.u32 2147483647, %v3103_v11 }
 0xa37   : > { %v1565_v16 = vor.u32 1.1754944e-38, %v1564_v58  ;;  %vm1436_vm12 = vweird.f32 %v3103_v11  ;;  %vm1563_vm14 = vcmp.eq.f32.partialorder %v1562_v9, 8.507059e+37  ;;  %v1443_v22 = vor.u32 1.1754944e-38, %v1442_v3 }
 0xa38   : > { %v1542_v44 = vadd.f32 %v2587_v34, %v1541_v39  ;;  %v1419_v45 = vmul.f32 %v2589_v36, %v1418_v40  ;;  %vm1441_vm3 = vcmp.eq.f32.partialorder %v1440_v23, 8.507059e+37 }
 0xa3a   : > { %v2591_v27 = vpop.eup %2590  ;;  %v1546_v48 = vsel %vm3106_vm15, %v2587_v34, %v1542_v44  ;;  %v1420_v17 = vadd.f32 %v2589_v36, %v1419_v45 }
 0xa3b   : > { %v2593_v49 = vpop.eup %2592  ;;  %v1554_v53 = vmul.f32 %v2591_v27, %v1537_v30  ;;  %v3112_v54 = vpop.xlane.xlu0 %1777  ;;  %v1551_v63 = vsel %vm1548_vm5, %v1550_v50, %v1546_v48  ;;  %vm1559_vm8 = vweird.f32 %v2591_v27 }
 0xa3c   : > { %v1424_v55 = vsel %vm1423_vm6, %v2589_v36, %v1420_v17  ;;  %v1432_v57 = vmul.f32 %v2593_v49, %v3103_v11  ;;  %2594 = vrcp.f32 %v3112_v54  ;;  %v3116_v59 = vpop.xlane.xlu2 %1655  ;;  %v1552_v12 = vmul.f32 %v3067_v52, %v1551_v63  ;;  %vm1560_vm13 = vmor %vm1558_vm10, %vm1559_vm8 }
 0xa3d   : > { %v1429_v0 = vsel %vm1426_vm7, %v1428_v51, %v1424_v55  ;;  %v1555_v1 = vsub.f32 1.0, %v1554_v53  ;;  %2596 = vrcp.f32 %v3116_v59  ;;  %vm1437_vm11 = vweird.f32 %v2593_v49 }
 0xa3e   : > { %v1433_v5 = vsub.f32 1.0, %v1432_v57  ;;  %v1430_v13 = vmul.f32 %v3071_v56, %v1429_v0  ;;  %2319 = vmatmul.msk.f32.vlgmr.msra.gmra.mxu2 %vm568_vm2, %v1552_v12  ;;  %vm1438_vm15 = vmor %vm1436_vm12, %vm1437_vm11  ;;  %v1793_v31 = vand.u32 2147483648, %v3112_v54  ;;  %vm1787_vm6 = vweird.f32 %v3112_v54 }
 0xa3f   : > { %v1556_v7 = vmul.f32 %v2591_v27, %v1555_v1  ;;  %v1791_v30 = vand.u32 2147483647, %v3112_v54  ;;  %v1671_v11 = vand.u32 2147483648, %v3116_v59  ;;  %v1669_v39 = vand.u32 2147483647, %v3116_v59 }
 0xa40   : > { %v1434_v10 = vmul.f32 %v2593_v49, %v1433_v5  ;;  %2313 = vmatmul.msk.f32.vlgmr.msrb.gmra.mxu1 %vm568_vm2, %v1430_v13  ;;  %v1794_v41 = vor.u32 1.1754944e-38, %v1793_v31  ;;  %vm1665_vm10 = vweird.f32 %v3116_v59  ;;  %v2407_v31 = vld [vmem:[%s3243_s4 + $0x10] sm:$0xff] }
 0xa41   : > { %v1557_v14 = vadd.f32 %v2591_v27, %v1556_v7  ;;  %vm1792_vm11 = vcmp.eq.f32.partialorder %v1791_v30, 8.507059e+37  ;;  %v1672_v47 = vor.u32 1.1754944e-38, %v1671_v11 }
 0xa42   : > { %v2595_v15 = vpop.eup %2594  ;;  %v1435_v18 = vadd.f32 %v2593_v49, %v1434_v10 }
 0xa43   : > { %v1783_v52 = vmul.f32 %v2595_v15, %v3112_v54  ;;  %v1561_v20 = vsel %vm1560_vm13, %v2591_v27, %v1557_v14  ;;  %v2597_v56 = vpop.eup %2596  ;;  %vm1788_vm5 = vweird.f32 %v2595_v15  ;;  %vm1670_vm13 = vcmp.eq.f32.partialorder %v1669_v39, 8.507059e+37 }
 0xa44   : > { %v3128_v24 = vpop.xlane.xlu2 %1780  ;;  %v1566_v25 = vsel %vm1563_vm14, %v1565_v16, %v1561_v20  ;;  %v1439_v26 = vsel %vm1438_vm15, %v2593_v49, %v1435_v18  ;;  %v1661_v29 = vmul.f32 %v2597_v56, %v3116_v59  ;;  %vm1666_vm7 = vweird.f32 %v2597_v56  ;;  %vm1789_vm8 = vmor %vm1787_vm6, %vm1788_vm5 }
 0xa45   : > { %v1784_v28 = vsub.f32 1.0, %v1783_v52  ;;  %2598 = vrcp.f32 %v3128_v24  ;;  %v1567_v32 = vmul.f32 %v3075_v4, %v1566_v25  ;;  %v1444_v33 = vsel %vm1441_vm3, %v1443_v22, %v1439_v26  ;;  %vm1667_vm12 = vmor %vm1665_vm10, %vm1666_vm7 }
 0xa46   : > { %v1662_v35 = vsub.f32 1.0, %v1661_v29  ;;  %v1445_v36 = vmul.f32 %v3077_v2, %v1444_v33  ;;  %v1808_v51 = vand.u32 2147483648, %v3128_v24  ;;  %v1806_v57 = vand.u32 2147483647, %v3128_v24 }
 0xa47   : > { %v1785_v34 = vmul.f32 %v2595_v15, %v1784_v28  ;;  %2320 = vmatmul.msk.f32.gmra.mxu2 %vm568_vm2, %v1567_v32  ;;  %vm1802_vm15 = vweird.f32 %v3128_v24 }
 0xa48   : > { %v1663_v38 = vmul.f32 %v2597_v56, %v1662_v35  ;;  %2314 = vmatmul.msk.f32.gmra.mxu1 %vm568_vm2, %v1445_v36  ;;  %v1809_v1 = vor.u32 1.1754944e-38, %v1808_v51  ;;  %vm1807_vm5 = vcmp.eq.f32.partialorder %v1806_v57, 8.507059e+37 }
 0xa49   : > { %v1786_v37 = vadd.f32 %v2595_v15, %v1785_v34 }
 0xa4a   : > { %v1664_v2 = vadd.f32 %v2597_v56, %v1663_v38 }
 0xa4b   : > { %v2599_v4 = vpop.eup %2598  ;;  %v1790_v40 = vsel %vm1789_vm8, %v2595_v15, %v1786_v37  ;;  %v2485_v42 = vpop.permute.xlu1 %2484 }
 0xa4c   : > { %v1798_v43 = vmul.f32 %v2599_v4, %v3128_v24  ;;  %v2486_v44 = vunpack.i.l.bf16 %v2485_v42  ;;  %v1795_v45 = vsel %vm1792_vm11, %v1794_v41, %v1790_v40  ;;  %v1668_v46 = vsel %vm1667_vm12, %v2597_v56, %v1664_v2 }
 0xa4d   : > { %v1659_v27 = vpop.xlane.xlu2 %1658  ;;  %v2487_v17 = vunpack.i.h.bf16 %v2485_v42  ;;  %v1673_v50 = vsel %vm1670_vm13, %v1672_v47, %v1668_v46  ;;  %v1796_v55 = vmul.f32 %v3083_v8, %v1795_v45  ;;  %vm1803_vm14 = vweird.f32 %v2599_v4 }
 0xa4e   : > { %v1799_v48 = vsub.f32 1.0, %v1798_v43  ;;  %2600 = vrcp.f32 %v1659_v27  ;;  %v2490_v49 = vpop.permute.xlu0 %2489  ;;  %1838 = vmatpush.msrb.mxu2 %v2486_v44  ;;  %v1674_v63 = vmul.f32 %v3085_v61, %v1673_v50  ;;  %vm1804_vm3 = vmor %vm1802_vm15, %vm1803_vm14  ;;  %v1686_v3 = vand.u32 2147483648, %v1659_v27  ;;  %v2517_v44 = vld [vmem:[%s3244_s5 + $0x1] ss:$0 sm:$0xff] }
 0xa4f   : > { %v2491_v53 = vunpack.i.l.bf16 %v2490_v49  ;;  %v2492_v59 = vunpack.i.h.bf16 %v2490_v49  ;;  %v1684_v13 = vand.u32 2147483647, %v1659_v27  ;;  %vm1680_vm7 = vweird.f32 %v1659_v27 }
 0xa50   : > { %v1800_v54 = vmul.f32 %v2599_v4, %v1799_v48  ;;  %1839 = vmatpush.msrb.mxu2 %v2487_v17  ;;  %v1687_v14 = vor.u32 1.1754944e-38, %v1686_v3 }
 0xa51   : > { %1716 = vmatpush.msra.mxu1 %v2491_v53  ;;  %2331 = vmatmul.msk.f32.vlgmr.msrb.gmra.mxu2 %vm568_vm2, %v1796_v55  ;;  %vm1685_vm10 = vcmp.eq.f32.partialorder %v1684_v13, 8.507059e+37 }
 0xa52   : > { %v1801_v0 = vadd.f32 %v2599_v4, %v1800_v54 }
 0xa53   : > { %1717 = vmatpush.msra.mxu1 %v2492_v59 }
 0xa54   : > { %v2601_v58 = vpop.eup %2600  ;;  %2325 = vmatmul.msk.f32.vlgmr.msra.gmra.mxu1 %vm568_vm2, %v1674_v63  ;;  %v1805_v5 = vsel %vm1804_vm3, %v2599_v4, %v1801_v0 }
 0xa55   : > { %v1676_v8 = vmul.f32 %v2601_v58, %v1659_v27  ;;  %v1810_v7 = vsel %vm1807_vm5, %v1809_v1, %v1805_v5  ;;  %vm1681_vm6 = vweird.f32 %v2601_v58  ;;  %v2410_v5 = vld [vmem:[%s3247_s8 + $0x18] sm:$0xff] }
 0xa56   : > { %v1811_v9 = vmul.f32 %v3091_v19, %v1810_v7  ;;  %vm1682_vm8 = vmor %vm1680_vm7, %vm1681_vm6  ;;  %2009 = vmatpush.bf16.msrb.mxu1 %v2410_v5  ;;  %v2409_v7 = vld [vmem:[%s3247_s8 + $0x10] sm:$0xff] }
 0xa57   : > { %v1677_v10 = vsub.f32 1.0, %v1676_v8 }
 0xa59   : > { %v1678_v12 = vmul.f32 %v2601_v58, %v1677_v10  ;;  %2332 = vmatmul.msk.f32.gmra.mxu2 %vm568_vm2, %v1811_v9 }
 0xa5a   : > { %2010 = vmatpush.bf16.msrb.mxu1 %v2409_v7 }
 0xa5b   : > { %v1679_v61 = vadd.f32 %v2601_v58, %v1678_v12 }
 0xa5d   : > { %v1683_v23 = vsel %vm1682_vm8, %v2601_v58, %v1679_v61 }
 0xa5e   : > { %v1688_v15 = vsel %vm1685_vm10, %v1687_v14, %v1683_v23 }
 0xa5f   : > { %v1689_v16 = vmul.f32 %v3095_v21, %v1688_v15  ;;  %v2408_v21 = vld [vmem:[%s3243_s4 + $0x18] sm:$0xff] }
 0xa60   : > { %1909 = vmatpush.bf16.msrb.mxu0 %v2408_v21 }
 0xa61   : > { %2326 = vmatmul.msk.f32.gmra.mxu1 %vm568_vm2, %v1689_v16 }
 0xa64   : > { %1910 = vmatpush.bf16.msrb.mxu0 %v2407_v31 }
 0xabd   : > { %v1475_v18 = vpop.f32.mrf.mxu1 }
 0xac1   : > { %v1597_v19 = vpop.f32.mrf.mxu2 }
 0xac5   : > { %v1478_v20 = vpop.f32.mrf.mxu1 }
 0xaca   : > { %v1600_v52 = vpop.f32.mrf.mxu2 }
 0xacb   : > { %v2493_v56 = vpack.i.bf16 %v1600_v52, %v1597_v19 }
 0xacd   : > { %2494 = vrot.lane.b32.xlu2 %v2493_v56, %s3276_s24 }
 0xad1   : > { %v1719_v24 = vpop.f32.mrf.mxu1 }
 0xad4   : > { %v1841_v22 = vpop.f32.mrf.mxu2 }
 0xadc   : > { %v1844_v25 = vpop.f32.mrf.mxu2 }
 0xadd   : > { %v2503_v26 = vpack.i.bf16 %v1844_v25, %v1841_v22  ;;  %v2518_v22 = vld [vmem:[%s3245_s6 + $0x1] ss:$0 sm:$0xff] }
 0xade   : > { %v1722_v28 = vpop.f32.mrf.mxu1 }
 0xadf   : > { %v2498_v29 = vpack.i.bf16 %v1722_v28, %v1719_v24  ;;  %2504 = vrot.lane.b32.xlu0 %v2503_v26, %s3277_s18  ;;  %v2519_v28 = vld [vmem:[%s3246_s7 + $0x1] ss:$0 sm:$0xff] }
 0xae1   : > { %2499 = vrot.lane.b32.xlu1 %v2498_v29, %s3278_s22 }
 0xb27   : > { %v2495_v32 = vpop.permute.xlu2 %2494 }
 0xb28   : > { %v2497_v33 = vunpack.i.h.bf16 %v2495_v32  ;;  %v2496_v34 = vunpack.i.l.bf16 %v2495_v32 }
 0xb2a   : > { %v1872_v38 = vsel %vm536_vm1, %v1478_v20, %v2497_v33  ;;  %v1871_v11 = vsel %vm536_vm1, %v1475_v18, %v2496_v34 }
 0xb51   : > { %v2505_v35 = vpop.permute.xlu0 %2504 }
 0xb52   : > { %v2507_v39 = vunpack.i.h.bf16 %v2505_v35  ;;  %v2506_v4 = vunpack.i.l.bf16 %v2505_v35  ;;  %v2414_v35 = vld [vmem:[%s3249_s10 + $0x38] sm:$0xff] }
 0xb53   : > { %v2500_v36 = vpop.permute.xlu1 %2499  ;;  %2081 = vmatpush.bf16.msrb.mxu3 %v2414_v35  ;;  %v2523_v35 = vld [vmem:[%s3252_s13 + $0x1] ss:$0 sm:$0xff] }
 0xb54   : > { %v2502_v30 = vunpack.i.h.bf16 %v2500_v36  ;;  %v2501_v37 = vunpack.i.l.bf16 %v2500_v36  ;;  %v2413_v36 = vld [vmem:[%s3249_s10 + $0x30] sm:$0xff] }
 0xb56   : > { %v1873_v40 = vsel %vm568_vm2, %v1871_v11, %v2501_v37  ;;  %v1874_v41 = vsel %vm568_vm2, %v1872_v38, %v2502_v30  ;;  %v2520_v30 = vld [vmem:[%s3248_s9 + $0x1] ss:$0 sm:$0xff]  ;;  %v2412_v37 = vld [vmem:[%s3249_s10 + $0x28] sm:$0xff] }
 0xb57   : > { %v1875_v2 = vsel %vm1046_vm9, %v1873_v40, %v2506_v4  ;;  %v1876_v42 = vsel %vm1046_vm9, %v1874_v41, %v2507_v39  ;;  %2082 = vmatpush.bf16.msrb.mxu3 %v2413_v36  ;;  %v2411_v39 = vld [vmem:[%s3249_s10 + $0x20] sm:$0xff] }
 0xb58   : > { %v1877_v43 = vpack.c.bf16 %v1876_v42, %v1875_v2 }
 0xb5a   : > { %2346 = vmatmul.msk.bf16.vlgmr.msrb.gmra.mxu0 %vm512_vm0, %v1877_v43 }
 0xb5b   : > { %2083 = vmatpush.bf16.msrb.mxu3 %v2412_v37 }
 0xb5f   : > { %2084 = vmatpush.bf16.msrb.mxu3 %v2411_v39 }
 0xbd7   : > { %v1912_v45 = vpop.f32.mrf.mxu0 }
 0xbd8   : > { %v1913_v46 = vadd.f32 %v2517_v44, %v1912_v45 }
 0xbda   : > { %v1917_v47 = vadd.f32 %v1913_v46, %v2983_v60 }
 0xbdc   : > { %v1923_v27 = vsel %vm512_vm0, %v1917_v47, 0.0 }
 0xbdd   : > { %1924 = vadd.xlane.f32.xlu1 %v1923_v27 }
 0xbdf   : > { %v1914_v48 = vpop.f32.mrf.mxu0 }
 0xbe0   : > { %v1915_v17 = vadd.f32 %v2517_v44, %v1914_v48 }
 0xbe2   : > { %v1918_v49 = vadd.f32 %v1915_v17, %v2985_v62 }
 0xbe4   : > { %v1926_v50 = vsel %vm512_vm0, %v1918_v49, 0.0 }
 0xbe5   : > { %1927 = vadd.xlane.f32.xlu0 %v1926_v50 }
 0xc50   : > { %v1925_v51 = vpop.xlane.xlu1 %1924 }
 0xc51   : > { %v1929_v53 = vmul.f32 %v1925_v51, %v2923_v6 }
 0xc53   : > { %v1931_v54 = vsub.f32 %v1917_v47, %v1929_v53 }
 0xc55   : > { %v1933_v55 = vmul.f32 %v1931_v54, %v1931_v54 }
 0xc57   : > { %v1935_v57 = vsel %vm512_vm0, %v1933_v55, 0.0 }
 0xc58   : > { %v1928_v59 = vpop.xlane.xlu0 %1927  ;;  %1936 = vadd.xlane.f32.xlu2 %v1935_v57 }
 0xc59   : > { %v1930_v60 = vmul.f32 %v1928_v59, %v2923_v6 }
 0xc5b   : > { %v1932_v63 = vsub.f32 %v1918_v49, %v1930_v60  ;;  %v2521_v60 = vld [vmem:[%s3250_s11 + $0x1] ss:$0 sm:$0xff] }
 0xc5d   : > { %v1934_v0 = vmul.f32 %v1932_v63, %v1932_v63 }
 0xc5f   : > { %v1938_v1 = vsel %vm512_vm0, %v1934_v0, 0.0 }
 0xc60   : > { %1939 = vadd.xlane.f32.xlu1 %v1938_v1 }
 0xccb   : > { %v1937_v62 = vpop.xlane.xlu2 %1936 }
 0xccc   : > { %v1941_v58 = vmul.f32 %v1937_v62, %v2923_v6 }
 0xcce   : > { %v1943_v8 = vadd.f32 1e-12, %v1941_v58 }
 0xcd0   : > { %2602 = vrsqrt.f32 %v1943_v8  ;;  %vm1951_vm2 = vweird.f32 %v1943_v8 }
 0xcd3   : > { %v1940_v9 = vpop.xlane.xlu1 %1939 }
 0xcd4   : > { %v1942_v10 = vmul.f32 %v1940_v9, %v2923_v6 }
 0xcd6   : > { %v2603_v3 = vpop.eup %2602  ;;  %v1944_v12 = vadd.f32 1e-12, %v1942_v10 }
 0xcd7   : > { %v1946_v13 = vmul.f32 %v2603_v3, %v1943_v8  ;;  %vm1952_vm1 = vweird.f32 %v2603_v3 }
 0xcd8   : > { %2604 = vrsqrt.f32 %v1944_v12  ;;  %vm1953_vm9 = vmor %vm1951_vm2, %vm1952_vm1  ;;  %vm1961_vm12 = vweird.f32 %v1944_v12 }
 0xcd9   : > { %v1947_v61 = vmul.f32 %v2603_v3, %v1946_v13 }
 0xcdb   : > { %v1948_v14 = vmul.f32 0.5, %v1947_v61 }
 0xcdd   : > { %v1949_v23 = vsub.f32 1.5, %v1948_v14 }
 0xcde   : > { %v2605_v15 = vpop.eup %2604 }
 0xcdf   : > { %v1950_v16 = vmul.f32 %v2603_v3, %v1949_v23  ;;  %v1956_v18 = vmul.f32 %v2605_v15, %v1944_v12  ;;  %vm1962_vm11 = vweird.f32 %v2605_v15 }
 0xce0   : > { %vm1963_vm13 = vmor %vm1961_vm12, %vm1962_vm11 }
 0xce1   : > { %v1957_v19 = vmul.f32 %v2605_v15, %v1956_v18  ;;  %v1954_v52 = vsel %vm1953_vm9, %v2603_v3, %v1950_v16 }
 0xce2   : > { %v1965_v24 = vmul.f32 %v1954_v52, %v1931_v54 }
 0xce3   : > { %v1958_v20 = vmul.f32 0.5, %v1957_v19 }
 0xce4   : > { %v1970_v29 = vmul.f32 %v2518_v22, %v1965_v24 }
 0xce5   : > { %v1959_v56 = vsub.f32 1.5, %v1958_v20 }
 0xce6   : > { %v1975_v32 = vadd.f32 %v2519_v28, %v1970_v29 }
 0xce7   : > { %v1960_v25 = vmul.f32 %v2605_v15, %v1959_v56 }
 0xce9   : > { %v1964_v26 = vsel %vm1963_vm13, %v2605_v15, %v1960_v25 }
 0xcea   : > { %v1966_v21 = vmul.f32 %v1964_v26, %v1932_v63 }
 0xcec   : > { %v1971_v31 = vmul.f32 %v2518_v22, %v1966_v21 }
 0xcee   : > { %v1976_v33 = vadd.f32 %v2519_v28, %v1971_v31 }
 0xcf0   : > { %v1977_v34 = vpack.c.bf16 %v1976_v33, %v1975_v32 }
 0xcf2   : > { %2362 = vmatmul.msk.bf16.vlgmr.msrb.gmra.mxu1 %vm512_vm0, %v1977_v34 }
 0xd6f   : > { %v2012_v38 = vpop.f32.mrf.mxu1 }
 0xd70   : > { %v2013_v11 = vadd.f32 %v2520_v30, %v2012_v38 }
 0xd72   : > { %v2017_v4 = vmul.f32 %v2013_v11, %v2013_v11 }
 0xd74   : > { %v2019_v40 = vmul.f32 %v2017_v4, %v2013_v11 }
 0xd76   : > { %v2021_v41 = vmul.f32 0.044715, %v2019_v40 }
 0xd77   : > { %v2014_v2 = vpop.f32.mrf.mxu1 }
 0xd78   : > { %v2023_v42 = vadd.f32 %v2021_v41, %v2013_v11  ;;  %v2015_v43 = vadd.f32 %v2520_v30, %v2014_v2 }
 0xd7a   : > { %v2025_v44 = vmul.f32 0.7978846, %v2023_v42  ;;  %v2018_v45 = vmul.f32 %v2015_v43, %v2015_v43 }
 0xd7c   : > { %v2020_v46 = vmul.f32 %v2018_v45, %v2015_v43  ;;  %2606 = vtanh.f32 %v2025_v44 }
 0xd7e   : > { %v2022_v47 = vmul.f32 0.044715, %v2020_v46 }
 0xd80   : > { %v2024_v27 = vadd.f32 %v2022_v47, %v2015_v43 }
 0xd82   : > { %v2026_v48 = vmul.f32 0.7978846, %v2024_v27  ;;  %v2607_v17 = vpop.eup %2606 }
 0xd83   : > { %v2029_v49 = vadd.f32 1.0, %v2607_v17 }
 0xd84   : > { %2608 = vtanh.f32 %v2026_v48 }
 0xd85   : > { %v2031_v51 = vmul.f32 0.5, %v2029_v49 }
 0xd87   : > { %v2033_v55 = vmul.f32 %v2031_v51, %v2013_v11 }
 0xd8a   : > { %v2609_v50 = vpop.eup %2608 }
 0xd8b   : > { %v2030_v53 = vadd.f32 1.0, %v2609_v50 }
 0xd8d   : > { %v2032_v54 = vmul.f32 0.5, %v2030_v53 }
 0xd8f   : > { %v2034_v57 = vmul.f32 %v2032_v54, %v2015_v43 }
 0xd91   : > { %v2035_v59 = vpack.c.bf16 %v2034_v57, %v2033_v55 }
 0xd93   : > { %2388 = vmatmul.msk.bf16.vlgmr.msrb.gmra.mxu3 %vm1245_vm4, %v2035_v59 }
 0xe16   : > { %v2086_v63 = vpop.f32.mrf.mxu3 }
 0xe17   : > { %v2087_v0 = vadd.f32 %v2521_v60, %v2086_v63 }
 0xe19   : > { %v2091_v1 = vadd.f32 %v2087_v0, %v1975_v32 }
 0xe1b   : > { %v2097_v62 = vsel %vm512_vm0, %v2091_v1, 0.0 }
 0xe1c   : > { %2098 = vadd.xlane.f32.xlu0 %v2097_v62 }
 0xe1e   : > { %v2088_v58 = vpop.f32.mrf.mxu3 }
 0xe1f   : > { %v2089_v5 = vadd.f32 %v2521_v60, %v2088_v58 }
 0xe21   : > { %v2092_v8 = vadd.f32 %v2089_v5, %v1976_v33  ;;  %v2522_v33 = vld [vmem:[%s3251_s12 + $0x1] ss:$0 sm:$0xff] }
 0xe23   : > { %v2100_v7 = vsel %vm512_vm0, %v2092_v8, 0.0 }
 0xe24   : > { %2101 = vadd.xlane.f32.xlu1 %v2100_v7 }
 0xe8f   : > { %v2099_v9 = vpop.xlane.xlu0 %2098 }
 0xe90   : > { %v2103_v10 = vmul.f32 %v2099_v9, %v2923_v6 }
 0xe92   : > { %v2105_v3 = vsub.f32 %v2091_v1, %v2103_v10 }
 0xe94   : > { %v2107_v12 = vmul.f32 %v2105_v3, %v2105_v3 }
 0xe96   : > { %v2109_v13 = vsel %vm512_vm0, %v2107_v12, 0.0 }
 0xe97   : > { %v2102_v61 = vpop.xlane.xlu1 %2101  ;;  %2110 = vadd.xlane.f32.xlu0 %v2109_v13 }
 0xe98   : > { %v2104_v14 = vmul.f32 %v2102_v61, %v2923_v6 }
 0xe9a   : > { %v2106_v23 = vsub.f32 %v2092_v8, %v2104_v14 }
 0xe9c   : > { %v2108_v15 = vmul.f32 %v2106_v23, %v2106_v23 }
 0xe9e   : > { %v2112_v16 = vsel %vm512_vm0, %v2108_v15, 0.0 }
 0xe9f   : > { %2113 = vadd.xlane.f32.xlu2 %v2112_v16 }
 0xf0a   : > { %v2111_v18 = vpop.xlane.xlu0 %2110 }
 0xf0b   : > { %v2115_v19 = vmul.f32 %v2111_v18, %v2923_v6 }
 0xf0d   : > { %v2117_v52 = vadd.f32 1e-12, %v2115_v19 }
 0xf0f   : > { %2610 = vrsqrt.f32 %v2117_v52  ;;  %vm2125_vm14 = vweird.f32 %v2117_v52 }
 0xf12   : > { %v2114_v20 = vpop.xlane.xlu2 %2113 }
 0xf13   : > { %v2116_v56 = vmul.f32 %v2114_v20, %v2923_v6 }
 0xf15   : > { %v2611_v22 = vpop.eup %2610  ;;  %v2118_v24 = vadd.f32 1e-12, %v2116_v56 }
 0xf16   : > { %v2120_v25 = vmul.f32 %v2611_v22, %v2117_v52  ;;  %vm2126_vm4 = vweird.f32 %v2611_v22 }
 0xf17   : > { %2612 = vrsqrt.f32 %v2118_v24  ;;  %vm2127_vm15 = vmor %vm2125_vm14, %vm2126_vm4  ;;  %vm2135_vm5 = vweird.f32 %v2118_v24 }
 0xf18   : > { %v2121_v26 = vmul.f32 %v2611_v22, %v2120_v25 }
 0xf1a   : > { %v2122_v28 = vmul.f32 0.5, %v2121_v26 }
 0xf1c   : > { %v2123_v29 = vsub.f32 1.5, %v2122_v28 }
 0xf1d   : > { %v2613_v21 = vpop.eup %2612 }
 0xf1e   : > { %v2124_v31 = vmul.f32 %v2611_v22, %v2123_v29  ;;  %v2130_v32 = vmul.f32 %v2613_v21, %v2118_v24  ;;  %vm2136_vm3 = vweird.f32 %v2613_v21 }
 0xf1f   : > { %vm2137_vm6 = vmor %vm2135_vm5, %vm2136_vm3 }
 0xf20   : > { %v2128_v34 = vsel %vm2127_vm15, %v2611_v22, %v2124_v31  ;;  %v2131_v6 = vmul.f32 %v2613_v21, %v2130_v32 }
 0xf21   : > { %v2139_v36 = vmul.f32 %v2128_v34, %v2105_v3 }
 0xf22   : > { %v2132_v30 = vmul.f32 0.5, %v2131_v6 }
 0xf23   : > { %v2144_v37 = vmul.f32 %v2522_v33, %v2139_v36 }
 0xf24   : > { %v2133_v38 = vsub.f32 1.5, %v2132_v30 }
 0xf25   : > { %v2149_v11 = vadd.f32 %v2523_v35, %v2144_v37 }
 0xf26   : > { %v2134_v39 = vmul.f32 %v2613_v21, %v2133_v38 }
 0xf27   : > { %2151 = vst.msk [vmem:[%s481_s20] sm:$0xff] %vm512_vm0, %v2149_v11 }
 0xf28   : > { %v2138_v4 = vsel %vm2137_vm6, %v2613_v21, %v2134_v39 }
 0xf29   : > { %v2140_v40 = vmul.f32 %v2138_v4, %v2106_v23 }
 0xf2b   : > { %v2145_v41 = vmul.f32 %v2522_v33, %v2140_v40 }
 0xf2d   : > { %v2150_v2 = vadd.f32 %v2523_v35, %v2145_v41 }
 0xf2f   : > { %2152 = vst.msk [vmem:[%s481_s20 + $0x8] sm:$0xff] %vm512_vm0, %v2150_v2 }
 0xf30 PF: > { %s24_s29 = sadd.s32 1, %s2620_s29  }
 0xf31   : > { %p21_p4 = scmp.ge.s32.totalorder %s24_s29, 4  }
 0xf33   :  { %23 = sbr.rel (!%p21_p4) target bundleno = 1 (0x1), region = 121 }

</bundles_post_ra>
